<compile_context>
chip_gen: v6e
topology: v6e:2x2x1
jax: 0.10.0
libtpu: 0.0.40
codegen_flags: <defaults>
</compile_context>

<pallas_src>
import jax
import jax.numpy as jnp
from jax import lax
from jax.experimental import pallas as pl
from jax.experimental.pallas import tpu as pltpu

INPUT_SIZE = 7
HIDDEN = 64
NUM_LAYERS = 3
F_PAD = 64          # layer-0 input features zero-padded to 64 -> uniform (64, 4H) Wih shape
SUBLANE = 8         # f32 sublane height; batch padded to a multiple of this


# ---------------------------------------------------------------------------
# Kernel
# ---------------------------------------------------------------------------
def _lstm_kernel(x_ref,                          # (T*B_pad, F_PAD)  flattened time-major input
                 wih0_ref, whh0_ref, b0_ref,     # (64, 256), (64, 256), (1, 256)  gates [i,f,o,g]
                 wih1_ref, whh1_ref, b1_ref,
                 wih2_ref, whh2_ref, b2_ref,
                 wout_ref, bout_ref,             # (1, 64), (1, 1)
                 out_ref,                        # (B_pad, 1)
                 proj_ref,                       # scratch (T*B_pad, 4H)  batched input projections
                 hbuf_ref):                      # scratch (T*B_pad, H)   per-layer hidden outputs
    TB = x_ref.shape[0]
    B = out_ref.shape[0]
    T = TB // B
    H = HIDDEN

    # Static lane mask, hoisted once: lanes [0, 3H) -> sigmoid (i, f, o), [3H, 4H) -> tanh (g).
    lane = lax.broadcasted_iota(jnp.int32, (B, 4 * H), 1)
    sig_mask = lane < 3 * H

    def run_layer(inp_ref, wih_ref, whh_ref, b_ref, write_hbuf):
        # --- Off-critical-path: batched input projection for ALL timesteps, bias folded in.
        #     (T*B, H_in) @ (H_in, 4H)  -> one well-utilized MXU matmul.
        proj_ref[...] = (
            jnp.dot(inp_ref[...], wih_ref[...], preferred_element_type=jnp.float32)
            + b_ref[...])

        def step(t, carry):
            h, c = carry
            row = pl.multiple_of(t * B, SUBLANE)
            # --- Critical path: only the K=64 recurrent matmul + an add.
            gates = proj_ref[pl.ds(row, B), :] + jnp.dot(
                h, whh_ref[...], preferred_element_type=jnp.float32)
            # Full-vreg EUP passes; per-lane select instead of misaligned slices.
            act = jnp.where(sig_mask, jax.nn.sigmoid(gates), jnp.tanh(gates))
            i = act[:, 0 * H:1 * H]
            f = act[:, 1 * H:2 * H]
            o = act[:, 2 * H:3 * H]
            g = act[:, 3 * H:4 * H]
            c_new = f * c + i * g
            h_new = o * jnp.tanh(c_new)
            if write_hbuf:
                hbuf_ref[pl.ds(row, B), :] = h_new
            return h_new, c_new

        z = jnp.zeros((B, H), jnp.float32)
        return lax.fori_loop(0, T, step, (z, z), unroll=(T <= 32))

    # Layer-outer / time-inner. hbuf carries layer l's outputs into layer l+1's
    # batched projection (the full read in run_layer's prologue happens before
    # the overwriting stores of the next recurrence).
    run_layer(x_ref, wih0_ref, whh0_ref, b0_ref, True)
    run_layer(hbuf_ref, wih1_ref, whh1_ref, b1_ref, True)
    h_top, _ = run_layer(hbuf_ref, wih2_ref, whh2_ref, b2_ref, False)

    # Linear(64, 1) head as VPU multiply + lane reduction (no N=1 MXU matmul).
    out_ref[...] = (jnp.sum(h_top * wout_ref[...], axis=-1, keepdims=True)
                    + bout_ref[...])


# ---------------------------------------------------------------------------
# Weight packing (done ONCE, outside the per-call path)
# ---------------------------------------------------------------------------
def _reorder_gates(w_4h):
    """Reorder gate columns from PyTorch [i, f, g, o] to kernel [i, f, o, g]."""
    H = HIDDEN
    return jnp.concatenate(
        [w_4h[..., 0 * H:2 * H], w_4h[..., 3 * H:4 * H], w_4h[..., 2 * H:3 * H]],
        axis=-1)


def pack_params(params):
    """Build kernel-layout weights from PyTorch-layout params. Call once."""
    (wih0, whh0, b0, wih1, whh1, b1, wih2, whh2, b2, wout, bout) = params
    wih0_p = jnp.zeros((F_PAD, 4 * HIDDEN), jnp.float32).at[:INPUT_SIZE].set(wih0)
    return (
        _reorder_gates(wih0_p), _reorder_gates(whh0), _reorder_gates(b0),
        _reorder_gates(wih1), _reorder_gates(whh1), _reorder_gates(b1),
        _reorder_gates(wih2), _reorder_gates(whh2), _reorder_gates(b2),
        wout.reshape(1, HIDDEN), bout.reshape(1, 1),
    )


# ---------------------------------------------------------------------------
# Forward wrapper
# ---------------------------------------------------------------------------
def rnn_forward(x_btf, packed):
    """x_btf: (B, T, INPUT_SIZE) float32, batch_first like the torch module. Returns (B, 1)."""
    B, T, F = x_btf.shape
    assert F == INPUT_SIZE

    B_pad = max(SUBLANE, ((B + SUBLANE - 1) // SUBLANE) * SUBLANE)

    # Time-major, zero-pad batch to B_pad and features to F_PAD, flatten (T, B) -> rows.
    x_tbf = jnp.transpose(x_btf, (1, 0, 2))                           # (T, B, F)
    x_pad = jnp.zeros((T, B_pad, F_PAD), jnp.float32)
    x_pad = x_pad.at[:, :B, :INPUT_SIZE].set(x_tbf)
    x_flat = x_pad.reshape(T * B_pad, F_PAD)

    full = lambda a: pl.BlockSpec(a.shape, lambda i: (0,) * a.ndim)

    grid_spec = pltpu.PrefetchScalarGridSpec(
        num_scalar_prefetch=0,
        grid=(1,),
        in_specs=[full(x_flat)] + [full(w) for w in packed],
        out_specs=pl.BlockSpec((B_pad, 1), lambda i: (0, 0)),
        scratch_shapes=[
            pltpu.VMEM((T * B_pad, 4 * HIDDEN), jnp.float32),   # proj_ref
            pltpu.VMEM((T * B_pad, HIDDEN), jnp.float32),       # hbuf_ref
        ],
    )

    out_pad = pl.pallas_call(
        _lstm_kernel,
        out_shape=jax.ShapeDtypeStruct((B_pad, 1), jnp.float32),
        grid_spec=grid_spec,
        compiler_params=pltpu.CompilerParams(
            dimension_semantics=("arbitrary",)),
    )(x_flat, *packed)

    return out_pad[:B]


# ---------------------------------------------------------------------------
# Init + pure-JAX reference (PyTorch-equivalent semantics, gate order i,f,g,o)
# ---------------------------------------------------------------------------
def init_params(key):
    """Deterministic init, PyTorch-style U(-1/sqrt(H), 1/sqrt(H)), gate order [i,f,g,o]."""
    k = 1.0 / jnp.sqrt(jnp.float32(HIDDEN))
    keys = jax.random.split(key, 4 * NUM_LAYERS + 2)
    params = []
    ki = 0
    for layer in range(NUM_LAYERS):
        f_in = INPUT_SIZE if layer == 0 else HIDDEN
        wih = jax.random.uniform(keys[ki], (f_in, 4 * HIDDEN), jnp.float32, -k, k); ki += 1
        whh = jax.random.uniform(keys[ki], (HIDDEN, 4 * HIDDEN), jnp.float32, -k, k); ki += 1
        b_ih = jax.random.uniform(keys[ki], (1, 4 * HIDDEN), jnp.float32, -k, k); ki += 1
        b_hh = jax.random.uniform(keys[ki], (1, 4 * HIDDEN), jnp.float32, -k, k); ki += 1
        params += [wih, whh, b_ih + b_hh]
    wout = jax.random.uniform(keys[ki], (HIDDEN, 1), jnp.float32, -k, k); ki += 1
    bout = jax.random.uniform(keys[ki], (1, 1), jnp.float32, -k, k); ki += 1
    params += [wout, bout]                       # <- previously missing
    return tuple(params)


def rnn_reference(x_btf, params):
    """Pure-JAX reference of the same forward (PyTorch gate order), for correctness."""
    (wih0, whh0, b0, wih1, whh1, b1, wih2, whh2, b2, wout, bout) = params
    B = x_btf.shape[0]

    def run_layer(inp_btf, wih, whh, b):
        def step(carry, x_t):
            h, c = carry
            gates = x_t @ wih + h @ whh + b
            i = jax.nn.sigmoid(gates[:, 0 * HIDDEN:1 * HIDDEN])
            f = jax.nn.sigmoid(gates[:, 1 * HIDDEN:2 * HIDDEN])
            g = jnp.tanh(gates[:, 2 * HIDDEN:3 * HIDDEN])
            o = jax.nn.sigmoid(gates[:, 3 * HIDDEN:4 * HIDDEN])
            c = f * c + i * g
            h = o * jnp.tanh(c)
            return (h, c), h

        h0 = jnp.zeros((B, HIDDEN), jnp.float32)
        c0 = jnp.zeros((B, HIDDEN), jnp.float32)
        _, hs = jax.lax.scan(step, (h0, c0), jnp.transpose(inp_btf, (1, 0, 2)))
        return jnp.transpose(hs, (1, 0, 2))

    a = run_layer(x_btf, wih0, whh0, b0)
    a = run_layer(a, wih1, whh1, b1)
    a = run_layer(a, wih2, whh2, b2)
    return a[:, -1, :] @ wout + bout


if __name__ == "__main__":
    B, T = 2, 8
    key = jax.random.PRNGKey(0)
    kx, kp = jax.random.split(key)
    x = jax.random.normal(kx, (B, T, INPUT_SIZE), jnp.float32)
    params = init_params(kp)

    packed = pack_params(params)                 # one-time weight packing (not per call)
    fwd = jax.jit(rnn_forward)

    out = jax.block_until_ready(fwd(x, packed))
    ref = jax.block_until_ready(rnn_reference(x, params))

    assert out.shape == (B, 1), out.shape
    assert jnp.allclose(out, ref, atol=1e-4, rtol=1e-4), (out, ref)

    print("KERNEL_OK")
</pallas_src>

<mosaic_0001>
module attributes {stable_mosaic.version = 11 : i64} {
  func.func @_lstm_kernel(%arg0: i32, %arg1: memref<64x64xf32, #tpu.memory_space<vmem>>, %arg2: memref<64x256xf32, #tpu.memory_space<vmem>>, %arg3: memref<64x256xf32, #tpu.memory_space<vmem>>, %arg4: memref<1x256xf32, #tpu.memory_space<vmem>>, %arg5: memref<64x256xf32, #tpu.memory_space<vmem>>, %arg6: memref<64x256xf32, #tpu.memory_space<vmem>>, %arg7: memref<1x256xf32, #tpu.memory_space<vmem>>, %arg8: memref<64x256xf32, #tpu.memory_space<vmem>>, %arg9: memref<64x256xf32, #tpu.memory_space<vmem>>, %arg10: memref<1x256xf32, #tpu.memory_space<vmem>>, %arg11: memref<1x64xf32, #tpu.memory_space<vmem>>, %arg12: memref<1x1xf32, #tpu.memory_space<vmem>>, %arg13: memref<8x1xf32, #tpu.memory_space<vmem>>, %arg14: memref<64x256xf32, #tpu.memory_space<vmem>>, %arg15: memref<64x64xf32, #tpu.memory_space<vmem>>) attributes {dimension_semantics = [#tpu.dimension_semantics<arbitrary>], iteration_bounds = array<i64: 1>, scalar_prefetch = 0 : i64, scratch_operands = 2 : i64, tpu.core_type = #tpu.core_type<tc>, window_params = [{pipeline_mode = #tpu.pipeline_mode<synchronous>, transform_indices = @transform_0, window_bounds = array<i64: 64, 64>}, {pipeline_mode = #tpu.pipeline_mode<synchronous>, transform_indices = @transform_1, window_bounds = array<i64: 64, 256>}, {pipeline_mode = #tpu.pipeline_mode<synchronous>, transform_indices = @transform_2, window_bounds = array<i64: 64, 256>}, {pipeline_mode = #tpu.pipeline_mode<synchronous>, transform_indices = @transform_3, window_bounds = array<i64: 1, 256>}, {pipeline_mode = #tpu.pipeline_mode<synchronous>, transform_indices = @transform_4, window_bounds = array<i64: 64, 256>}, {pipeline_mode = #tpu.pipeline_mode<synchronous>, transform_indices = @transform_5, window_bounds = array<i64: 64, 256>}, {pipeline_mode = #tpu.pipeline_mode<synchronous>, transform_indices = @transform_6, window_bounds = array<i64: 1, 256>}, {pipeline_mode = #tpu.pipeline_mode<synchronous>, transform_indices = @transform_7, window_bounds = array<i64: 64, 256>}, {pipeline_mode = #tpu.pipeline_mode<synchronous>, transform_indices = @transform_8, window_bounds = array<i64: 64, 256>}, {pipeline_mode = #tpu.pipeline_mode<synchronous>, transform_indices = @transform_9, window_bounds = array<i64: 1, 256>}, {pipeline_mode = #tpu.pipeline_mode<synchronous>, transform_indices = @transform_10, window_bounds = array<i64: 1, 64>}, {pipeline_mode = #tpu.pipeline_mode<synchronous>, transform_indices = @transform_11, window_bounds = array<i64: 1, 1>}, {pipeline_mode = #tpu.pipeline_mode<synchronous>, transform_indices = @transform_12, window_bounds = array<i64: 8, 1>}]} {
    %0 = tpu.iota {dimensions = array<i32: 1>} : vector<8x256xi32>
    %c192_i32 = arith.constant 192 : i32
    %1 = vector.broadcast %c192_i32 : i32 to vector<8x256xi32>
    %2 = arith.cmpi slt, %0, %1 : vector<8x256xi32>
    %c0 = arith.constant 0 : index
    %c0_0 = arith.constant 0 : index
    %3 = vector.load %arg1[%c0, %c0_0] : memref<64x64xf32, #tpu.memory_space<vmem>>, vector<64x64xf32>
    %c0_1 = arith.constant 0 : index
    %c0_2 = arith.constant 0 : index
    %4 = vector.load %arg2[%c0_1, %c0_2] : memref<64x256xf32, #tpu.memory_space<vmem>>, vector<64x256xf32>
    %cst = arith.constant dense<0.000000e+00> : vector<64x256xf32>
    %5 = tpu.matmul %3, %4, %cst {dimension_numbers = #tpu.dot_dimension_numbers<[1], [0], [0], [1], [0, 0, 1, 1], [], []>} : vector<64x64xf32>, vector<64x256xf32>, vector<64x256xf32> -> vector<64x256xf32>
    %c0_3 = arith.constant 0 : index
    %c0_4 = arith.constant 0 : index
    %6 = vector.load %arg4[%c0_3, %c0_4] : memref<1x256xf32, #tpu.memory_space<vmem>>, vector<1x256xf32>
    %7 = vector.broadcast %6 : vector<1x256xf32> to vector<64x256xf32>
    %8 = arith.addf %5, %7 : vector<64x256xf32>
    %c0_5 = arith.constant 0 : index
    %c0_6 = arith.constant 0 : index
    %9 = vector.load %arg14[%c0_5, %c0_6] : memref<64x256xf32, #tpu.memory_space<vmem>>, vector<64x256xf32>
    tpu.vector_store %arg14[%c0_5, %c0_6], %8 {strides = array<i32>} : memref<64x256xf32, #tpu.memory_space<vmem>>, vector<64x256xf32>,
    %cst_7 = arith.constant 0.000000e+00 : f32
    %10 = vector.broadcast %cst_7 : f32 to vector<8x64xf32>
    %c0_i32 = arith.constant 0 : i32
    %c8_i32 = arith.constant 8 : i32
    %11 = arith.muli %c0_i32, %c8_i32 : i32
    %12 = tpu.assume_multiple %11, 8 : i32
    %13 = arith.index_cast %12 : i32 to index
    %c0_8 = arith.constant 0 : index
    %14 = vector.load %arg14[%13, %c0_8] : memref<64x256xf32, #tpu.memory_space<vmem>>, vector<8x256xf32>
    %c0_9 = arith.constant 0 : index
    %c0_10 = arith.constant 0 : index
    %15 = vector.load %arg3[%c0_9, %c0_10] : memref<64x256xf32, #tpu.memory_space<vmem>>, vector<64x256xf32>
    %cst_11 = arith.constant dense<0.000000e+00> : vector<8x256xf32>
    %16 = tpu.matmul %10, %15, %cst_11 {dimension_numbers = #tpu.dot_dimension_numbers<[1], [0], [0], [1], [0, 0, 1, 1], [], []>} : vector<8x64xf32>, vector<64x256xf32>, vector<8x256xf32> -> vector<8x256xf32>
    %17 = arith.addf %14, %16 : vector<8x256xf32>
    %18 = arith.negf %17 : vector<8x256xf32>
    %19 = math.exp %18 : vector<8x256xf32>
    %cst_12 = arith.constant 1.000000e+00 : f32
    %20 = vector.broadcast %cst_12 : f32 to vector<8x256xf32>
    %21 = arith.addf %20, %19 : vector<8x256xf32>
    %22 = arith.divf %20, %21 : vector<8x256xf32>
    %23 = math.tanh %17 : vector<8x256xf32>
    %24 = arith.select %2, %22, %23 : vector<8x256xi1>, vector<8x256xf32>
    %25 = vector.extract_strided_slice %24 {offsets = [0, 0], sizes = [8, 64], strides = [1, 1]} : vector<8x256xf32> to vector<8x64xf32>
    %26 = vector.extract_strided_slice %24 {offsets = [0, 64], sizes = [8, 64], strides = [1, 1]} : vector<8x256xf32> to vector<8x64xf32>
    %27 = vector.extract_strided_slice %24 {offsets = [0, 128], sizes = [8, 64], strides = [1, 1]} : vector<8x256xf32> to vector<8x64xf32>
    %28 = vector.extract_strided_slice %24 {offsets = [0, 192], sizes = [8, 64], strides = [1, 1]} : vector<8x256xf32> to vector<8x64xf32>
    %29 = arith.mulf %26, %10 : vector<8x64xf32>
    %30 = arith.mulf %25, %28 : vector<8x64xf32>
    %31 = arith.addf %29, %30 : vector<8x64xf32>
    %32 = math.tanh %31 : vector<8x64xf32>
    %33 = arith.mulf %27, %32 : vector<8x64xf32>
    %34 = arith.index_cast %12 : i32 to index
    %c0_13 = arith.constant 0 : index
    %35 = vector.load %arg15[%34, %c0_13] : memref<64x64xf32, #tpu.memory_space<vmem>>, vector<8x64xf32>
    tpu.vector_store %arg15[%34, %c0_13], %33 {strides = array<i32>} : memref<64x64xf32, #tpu.memory_space<vmem>>, vector<8x64xf32>,
    %c1_i32 = arith.constant 1 : i32
    %c8_i32_14 = arith.constant 8 : i32
    %36 = arith.muli %c1_i32, %c8_i32_14 : i32
    %37 = tpu.assume_multiple %36, 8 : i32
    %38 = arith.index_cast %37 : i32 to index
    %c0_15 = arith.constant 0 : index
    %39 = vector.load %arg14[%38, %c0_15] : memref<64x256xf32, #tpu.memory_space<vmem>>, vector<8x256xf32>
    %c0_16 = arith.constant 0 : index
    %c0_17 = arith.constant 0 : index
    %40 = vector.load %arg3[%c0_16, %c0_17] : memref<64x256xf32, #tpu.memory_space<vmem>>, vector<64x256xf32>
    %cst_18 = arith.constant dense<0.000000e+00> : vector<8x256xf32>
    %41 = tpu.matmul %33, %40, %cst_18 {dimension_numbers = #tpu.dot_dimension_numbers<[1], [0], [0], [1], [0, 0, 1, 1], [], []>} : vector<8x64xf32>, vector<64x256xf32>, vector<8x256xf32> -> vector<8x256xf32>
    %42 = arith.addf %39, %41 : vector<8x256xf32>
    %43 = arith.negf %42 : vector<8x256xf32>
    %44 = math.exp %43 : vector<8x256xf32>
    %cst_19 = arith.constant 1.000000e+00 : f32
    %45 = vector.broadcast %cst_19 : f32 to vector<8x256xf32>
    %46 = arith.addf %45, %44 : vector<8x256xf32>
    %47 = arith.divf %45, %46 : vector<8x256xf32>
    %48 = math.tanh %42 : vector<8x256xf32>
    %49 = arith.select %2, %47, %48 : vector<8x256xi1>, vector<8x256xf32>
    %50 = vector.extract_strided_slice %49 {offsets = [0, 0], sizes = [8, 64], strides = [1, 1]} : vector<8x256xf32> to vector<8x64xf32>
    %51 = vector.extract_strided_slice %49 {offsets = [0, 64], sizes = [8, 64], strides = [1, 1]} : vector<8x256xf32> to vector<8x64xf32>
    %52 = vector.extract_strided_slice %49 {offsets = [0, 128], sizes = [8, 64], strides = [1, 1]} : vector<8x256xf32> to vector<8x64xf32>
    %53 = vector.extract_strided_slice %49 {offsets = [0, 192], sizes = [8, 64], strides = [1, 1]} : vector<8x256xf32> to vector<8x64xf32>
    %54 = arith.mulf %51, %31 : vector<8x64xf32>
    %55 = arith.mulf %50, %53 : vector<8x64xf32>
    %56 = arith.addf %54, %55 : vector<8x64xf32>
    %57 = math.tanh %56 : vector<8x64xf32>
    %58 = arith.mulf %52, %57 : vector<8x64xf32>
    %59 = arith.index_cast %37 : i32 to index
    %c0_20 = arith.constant 0 : index
    %60 = vector.load %arg15[%59, %c0_20] : memref<64x64xf32, #tpu.memory_space<vmem>>, vector<8x64xf32>
    tpu.vector_store %arg15[%59, %c0_20], %58 {strides = array<i32>} : memref<64x64xf32, #tpu.memory_space<vmem>>, vector<8x64xf32>,
    %c2_i32 = arith.constant 2 : i32
    %c8_i32_21 = arith.constant 8 : i32
    %61 = arith.muli %c2_i32, %c8_i32_21 : i32
    %62 = tpu.assume_multiple %61, 8 : i32
    %63 = arith.index_cast %62 : i32 to index
    %c0_22 = arith.constant 0 : index
    %64 = vector.load %arg14[%63, %c0_22] : memref<64x256xf32, #tpu.memory_space<vmem>>, vector<8x256xf32>
    %c0_23 = arith.constant 0 : index
    %c0_24 = arith.constant 0 : index
    %65 = vector.load %arg3[%c0_23, %c0_24] : memref<64x256xf32, #tpu.memory_space<vmem>>, vector<64x256xf32>
    %cst_25 = arith.constant dense<0.000000e+00> : vector<8x256xf32>
    %66 = tpu.matmul %58, %65, %cst_25 {dimension_numbers = #tpu.dot_dimension_numbers<[1], [0], [0], [1], [0, 0, 1, 1], [], []>} : vector<8x64xf32>, vector<64x256xf32>, vector<8x256xf32> -> vector<8x256xf32>
    %67 = arith.addf %64, %66 : vector<8x256xf32>
    %68 = arith.negf %67 : vector<8x256xf32>
    %69 = math.exp %68 : vector<8x256xf32>
    %cst_26 = arith.constant 1.000000e+00 : f32
    %70 = vector.broadcast %cst_26 : f32 to vector<8x256xf32>
    %71 = arith.addf %70, %69 : vector<8x256xf32>
    %72 = arith.divf %70, %71 : vector<8x256xf32>
    %73 = math.tanh %67 : vector<8x256xf32>
    %74 = arith.select %2, %72, %73 : vector<8x256xi1>, vector<8x256xf32>
    %75 = vector.extract_strided_slice %74 {offsets = [0, 0], sizes = [8, 64], strides = [1, 1]} : vector<8x256xf32> to vector<8x64xf32>
    %76 = vector.extract_strided_slice %74 {offsets = [0, 64], sizes = [8, 64], strides = [1, 1]} : vector<8x256xf32> to vector<8x64xf32>
    %77 = vector.extract_strided_slice %74 {offsets = [0, 128], sizes = [8, 64], strides = [1, 1]} : vector<8x256xf32> to vector<8x64xf32>
    %78 = vector.extract_strided_slice %74 {offsets = [0, 192], sizes = [8, 64], strides = [1, 1]} : vector<8x256xf32> to vector<8x64xf32>
    %79 = arith.mulf %76, %56 : vector<8x64xf32>
    %80 = arith.mulf %75, %78 : vector<8x64xf32>
    %81 = arith.addf %79, %80 : vector<8x64xf32>
    %82 = math.tanh %81 : vector<8x64xf32>
    %83 = arith.mulf %77, %82 : vector<8x64xf32>
    %84 = arith.index_cast %62 : i32 to index
    %c0_27 = arith.constant 0 : index
    %85 = vector.load %arg15[%84, %c0_27] : memref<64x64xf32, #tpu.memory_space<vmem>>, vector<8x64xf32>
    tpu.vector_store %arg15[%84, %c0_27], %83 {strides = array<i32>} : memref<64x64xf32, #tpu.memory_space<vmem>>, vector<8x64xf32>,
    %c3_i32 = arith.constant 3 : i32
    %c8_i32_28 = arith.constant 8 : i32
    %86 = arith.muli %c3_i32, %c8_i32_28 : i32
    %87 = tpu.assume_multiple %86, 8 : i32
    %88 = arith.index_cast %87 : i32 to index
    %c0_29 = arith.constant 0 : index
    %89 = vector.load %arg14[%88, %c0_29] : memref<64x256xf32, #tpu.memory_space<vmem>>, vector<8x256xf32>
    %c0_30 = arith.constant 0 : index
    %c0_31 = arith.constant 0 : index
    %90 = vector.load %arg3[%c0_30, %c0_31] : memref<64x256xf32, #tpu.memory_space<vmem>>, vector<64x256xf32>
    %cst_32 = arith.constant dense<0.000000e+00> : vector<8x256xf32>
    %91 = tpu.matmul %83, %90, %cst_32 {dimension_numbers = #tpu.dot_dimension_numbers<[1], [0], [0], [1], [0, 0, 1, 1], [], []>} : vector<8x64xf32>, vector<64x256xf32>, vector<8x256xf32> -> vector<8x256xf32>
    %92 = arith.addf %89, %91 : vector<8x256xf32>
    %93 = arith.negf %92 : vector<8x256xf32>
    %94 = math.exp %93 : vector<8x256xf32>
    %cst_33 = arith.constant 1.000000e+00 : f32
    %95 = vector.broadcast %cst_33 : f32 to vector<8x256xf32>
    %96 = arith.addf %95, %94 : vector<8x256xf32>
    %97 = arith.divf %95, %96 : vector<8x256xf32>
    %98 = math.tanh %92 : vector<8x256xf32>
    %99 = arith.select %2, %97, %98 : vector<8x256xi1>, vector<8x256xf32>
    %100 = vector.extract_strided_slice %99 {offsets = [0, 0], sizes = [8, 64], strides = [1, 1]} : vector<8x256xf32> to vector<8x64xf32>
    %101 = vector.extract_strided_slice %99 {offsets = [0, 64], sizes = [8, 64], strides = [1, 1]} : vector<8x256xf32> to vector<8x64xf32>
    %102 = vector.extract_strided_slice %99 {offsets = [0, 128], sizes = [8, 64], strides = [1, 1]} : vector<8x256xf32> to vector<8x64xf32>
    %103 = vector.extract_strided_slice %99 {offsets = [0, 192], sizes = [8, 64], strides = [1, 1]} : vector<8x256xf32> to vector<8x64xf32>
    %104 = arith.mulf %101, %81 : vector<8x64xf32>
    %105 = arith.mulf %100, %103 : vector<8x64xf32>
    %106 = arith.addf %104, %105 : vector<8x64xf32>
    %107 = math.tanh %106 : vector<8x64xf32>
    %108 = arith.mulf %102, %107 : vector<8x64xf32>
    %109 = arith.index_cast %87 : i32 to index
    %c0_34 = arith.constant 0 : index
    %110 = vector.load %arg15[%109, %c0_34] : memref<64x64xf32, #tpu.memory_space<vmem>>, vector<8x64xf32>
    tpu.vector_store %arg15[%109, %c0_34], %108 {strides = array<i32>} : memref<64x64xf32, #tpu.memory_space<vmem>>, vector<8x64xf32>,
    %c4_i32 = arith.constant 4 : i32
    %c8_i32_35 = arith.constant 8 : i32
    %111 = arith.muli %c4_i32, %c8_i32_35 : i32
    %112 = tpu.assume_multiple %111, 8 : i32
    %113 = arith.index_cast %112 : i32 to index
    %c0_36 = arith.constant 0 : index
    %114 = vector.load %arg14[%113, %c0_36] : memref<64x256xf32, #tpu.memory_space<vmem>>, vector<8x256xf32>
    %c0_37 = arith.constant 0 : index
    %c0_38 = arith.constant 0 : index
    %115 = vector.load %arg3[%c0_37, %c0_38] : memref<64x256xf32, #tpu.memory_space<vmem>>, vector<64x256xf32>
    %cst_39 = arith.constant dense<0.000000e+00> : vector<8x256xf32>
    %116 = tpu.matmul %108, %115, %cst_39 {dimension_numbers = #tpu.dot_dimension_numbers<[1], [0], [0], [1], [0, 0, 1, 1], [], []>} : vector<8x64xf32>, vector<64x256xf32>, vector<8x256xf32> -> vector<8x256xf32>
    %117 = arith.addf %114, %116 : vector<8x256xf32>
    %118 = arith.negf %117 : vector<8x256xf32>
    %119 = math.exp %118 : vector<8x256xf32>
    %cst_40 = arith.constant 1.000000e+00 : f32
    %120 = vector.broadcast %cst_40 : f32 to vector<8x256xf32>
    %121 = arith.addf %120, %119 : vector<8x256xf32>
    %122 = arith.divf %120, %121 : vector<8x256xf32>
    %123 = math.tanh %117 : vector<8x256xf32>
    %124 = arith.select %2, %122, %123 : vector<8x256xi1>, vector<8x256xf32>
    %125 = vector.extract_strided_slice %124 {offsets = [0, 0], sizes = [8, 64], strides = [1, 1]} : vector<8x256xf32> to vector<8x64xf32>
    %126 = vector.extract_strided_slice %124 {offsets = [0, 64], sizes = [8, 64], strides = [1, 1]} : vector<8x256xf32> to vector<8x64xf32>
    %127 = vector.extract_strided_slice %124 {offsets = [0, 128], sizes = [8, 64], strides = [1, 1]} : vector<8x256xf32> to vector<8x64xf32>
    %128 = vector.extract_strided_slice %124 {offsets = [0, 192], sizes = [8, 64], strides = [1, 1]} : vector<8x256xf32> to vector<8x64xf32>
    %129 = arith.mulf %126, %106 : vector<8x64xf32>
    %130 = arith.mulf %125, %128 : vector<8x64xf32>
    %131 = arith.addf %129, %130 : vector<8x64xf32>
    %132 = math.tanh %131 : vector<8x64xf32>
    %133 = arith.mulf %127, %132 : vector<8x64xf32>
    %134 = arith.index_cast %112 : i32 to index
    %c0_41 = arith.constant 0 : index
    %135 = vector.load %arg15[%134, %c0_41] : memref<64x64xf32, #tpu.memory_space<vmem>>, vector<8x64xf32>
    tpu.vector_store %arg15[%134, %c0_41], %133 {strides = array<i32>} : memref<64x64xf32, #tpu.memory_space<vmem>>, vector<8x64xf32>,
    %c5_i32 = arith.constant 5 : i32
    %c8_i32_42 = arith.constant 8 : i32
    %136 = arith.muli %c5_i32, %c8_i32_42 : i32
    %137 = tpu.assume_multiple %136, 8 : i32
    %138 = arith.index_cast %137 : i32 to index
    %c0_43 = arith.constant 0 : index
    %139 = vector.load %arg14[%138, %c0_43] : memref<64x256xf32, #tpu.memory_space<vmem>>, vector<8x256xf32>
    %c0_44 = arith.constant 0 : index
    %c0_45 = arith.constant 0 : index
    %140 = vector.load %arg3[%c0_44, %c0_45] : memref<64x256xf32, #tpu.memory_space<vmem>>, vector<64x256xf32>
    %cst_46 = arith.constant dense<0.000000e+00> : vector<8x256xf32>
    %141 = tpu.matmul %133, %140, %cst_46 {dimension_numbers = #tpu.dot_dimension_numbers<[1], [0], [0], [1], [0, 0, 1, 1], [], []>} : vector<8x64xf32>, vector<64x256xf32>, vector<8x256xf32> -> vector<8x256xf32>
    %142 = arith.addf %139, %141 : vector<8x256xf32>
    %143 = arith.negf %142 : vector<8x256xf32>
    %144 = math.exp %143 : vector<8x256xf32>
    %cst_47 = arith.constant 1.000000e+00 : f32
    %145 = vector.broadcast %cst_47 : f32 to vector<8x256xf32>
    %146 = arith.addf %145, %144 : vector<8x256xf32>
    %147 = arith.divf %145, %146 : vector<8x256xf32>
    %148 = math.tanh %142 : vector<8x256xf32>
    %149 = arith.select %2, %147, %148 : vector<8x256xi1>, vector<8x256xf32>
    %150 = vector.extract_strided_slice %149 {offsets = [0, 0], sizes = [8, 64], strides = [1, 1]} : vector<8x256xf32> to vector<8x64xf32>
    %151 = vector.extract_strided_slice %149 {offsets = [0, 64], sizes = [8, 64], strides = [1, 1]} : vector<8x256xf32> to vector<8x64xf32>
    %152 = vector.extract_strided_slice %149 {offsets = [0, 128], sizes = [8, 64], strides = [1, 1]} : vector<8x256xf32> to vector<8x64xf32>
    %153 = vector.extract_strided_slice %149 {offsets = [0, 192], sizes = [8, 64], strides = [1, 1]} : vector<8x256xf32> to vector<8x64xf32>
    %154 = arith.mulf %151, %131 : vector<8x64xf32>
    %155 = arith.mulf %150, %153 : vector<8x64xf32>
    %156 = arith.addf %154, %155 : vector<8x64xf32>
    %157 = math.tanh %156 : vector<8x64xf32>
    %158 = arith.mulf %152, %157 : vector<8x64xf32>
    %159 = arith.index_cast %137 : i32 to index
    %c0_48 = arith.constant 0 : index
    %160 = vector.load %arg15[%159, %c0_48] : memref<64x64xf32, #tpu.memory_space<vmem>>, vector<8x64xf32>
    tpu.vector_store %arg15[%159, %c0_48], %158 {strides = array<i32>} : memref<64x64xf32, #tpu.memory_space<vmem>>, vector<8x64xf32>,
    %c6_i32 = arith.constant 6 : i32
    %c8_i32_49 = arith.constant 8 : i32
    %161 = arith.muli %c6_i32, %c8_i32_49 : i32
    %162 = tpu.assume_multiple %161, 8 : i32
    %163 = arith.index_cast %162 : i32 to index
    %c0_50 = arith.constant 0 : index
    %164 = vector.load %arg14[%163, %c0_50] : memref<64x256xf32, #tpu.memory_space<vmem>>, vector<8x256xf32>
    %c0_51 = arith.constant 0 : index
    %c0_52 = arith.constant 0 : index
    %165 = vector.load %arg3[%c0_51, %c0_52] : memref<64x256xf32, #tpu.memory_space<vmem>>, vector<64x256xf32>
    %cst_53 = arith.constant dense<0.000000e+00> : vector<8x256xf32>
    %166 = tpu.matmul %158, %165, %cst_53 {dimension_numbers = #tpu.dot_dimension_numbers<[1], [0], [0], [1], [0, 0, 1, 1], [], []>} : vector<8x64xf32>, vector<64x256xf32>, vector<8x256xf32> -> vector<8x256xf32>
    %167 = arith.addf %164, %166 : vector<8x256xf32>
    %168 = arith.negf %167 : vector<8x256xf32>
    %169 = math.exp %168 : vector<8x256xf32>
    %cst_54 = arith.constant 1.000000e+00 : f32
    %170 = vector.broadcast %cst_54 : f32 to vector<8x256xf32>
    %171 = arith.addf %170, %169 : vector<8x256xf32>
    %172 = arith.divf %170, %171 : vector<8x256xf32>
    %173 = math.tanh %167 : vector<8x256xf32>
    %174 = arith.select %2, %172, %173 : vector<8x256xi1>, vector<8x256xf32>
    %175 = vector.extract_strided_slice %174 {offsets = [0, 0], sizes = [8, 64], strides = [1, 1]} : vector<8x256xf32> to vector<8x64xf32>
    %176 = vector.extract_strided_slice %174 {offsets = [0, 64], sizes = [8, 64], strides = [1, 1]} : vector<8x256xf32> to vector<8x64xf32>
    %177 = vector.extract_strided_slice %174 {offsets = [0, 128], sizes = [8, 64], strides = [1, 1]} : vector<8x256xf32> to vector<8x64xf32>
    %178 = vector.extract_strided_slice %174 {offsets = [0, 192], sizes = [8, 64], strides = [1, 1]} : vector<8x256xf32> to vector<8x64xf32>
    %179 = arith.mulf %176, %156 : vector<8x64xf32>
    %180 = arith.mulf %175, %178 : vector<8x64xf32>
    %181 = arith.addf %179, %180 : vector<8x64xf32>
    %182 = math.tanh %181 : vector<8x64xf32>
    %183 = arith.mulf %177, %182 : vector<8x64xf32>
    %184 = arith.index_cast %162 : i32 to index
    %c0_55 = arith.constant 0 : index
    %185 = vector.load %arg15[%184, %c0_55] : memref<64x64xf32, #tpu.memory_space<vmem>>, vector<8x64xf32>
    tpu.vector_store %arg15[%184, %c0_55], %183 {strides = array<i32>} : memref<64x64xf32, #tpu.memory_space<vmem>>, vector<8x64xf32>,
    %c7_i32 = arith.constant 7 : i32
    %c8_i32_56 = arith.constant 8 : i32
    %186 = arith.muli %c7_i32, %c8_i32_56 : i32
    %187 = tpu.assume_multiple %186, 8 : i32
    %188 = arith.index_cast %187 : i32 to index
    %c0_57 = arith.constant 0 : index
    %189 = vector.load %arg14[%188, %c0_57] : memref<64x256xf32, #tpu.memory_space<vmem>>, vector<8x256xf32>
    %c0_58 = arith.constant 0 : index
    %c0_59 = arith.constant 0 : index
    %190 = vector.load %arg3[%c0_58, %c0_59] : memref<64x256xf32, #tpu.memory_space<vmem>>, vector<64x256xf32>
    %cst_60 = arith.constant dense<0.000000e+00> : vector<8x256xf32>
    %191 = tpu.matmul %183, %190, %cst_60 {dimension_numbers = #tpu.dot_dimension_numbers<[1], [0], [0], [1], [0, 0, 1, 1], [], []>} : vector<8x64xf32>, vector<64x256xf32>, vector<8x256xf32> -> vector<8x256xf32>
    %192 = arith.addf %189, %191 : vector<8x256xf32>
    %193 = arith.negf %192 : vector<8x256xf32>
    %194 = math.exp %193 : vector<8x256xf32>
    %cst_61 = arith.constant 1.000000e+00 : f32
    %195 = vector.broadcast %cst_61 : f32 to vector<8x256xf32>
    %196 = arith.addf %195, %194 : vector<8x256xf32>
    %197 = arith.divf %195, %196 : vector<8x256xf32>
    %198 = math.tanh %192 : vector<8x256xf32>
    %199 = arith.select %2, %197, %198 : vector<8x256xi1>, vector<8x256xf32>
    %200 = vector.extract_strided_slice %199 {offsets = [0, 0], sizes = [8, 64], strides = [1, 1]} : vector<8x256xf32> to vector<8x64xf32>
    %201 = vector.extract_strided_slice %199 {offsets = [0, 64], sizes = [8, 64], strides = [1, 1]} : vector<8x256xf32> to vector<8x64xf32>
    %202 = vector.extract_strided_slice %199 {offsets = [0, 128], sizes = [8, 64], strides = [1, 1]} : vector<8x256xf32> to vector<8x64xf32>
    %203 = vector.extract_strided_slice %199 {offsets = [0, 192], sizes = [8, 64], strides = [1, 1]} : vector<8x256xf32> to vector<8x64xf32>
    %204 = arith.mulf %201, %181 : vector<8x64xf32>
    %205 = arith.mulf %200, %203 : vector<8x64xf32>
    %206 = arith.addf %204, %205 : vector<8x64xf32>
    %207 = math.tanh %206 : vector<8x64xf32>
    %208 = arith.mulf %202, %207 : vector<8x64xf32>
    %209 = arith.index_cast %187 : i32 to index
    %c0_62 = arith.constant 0 : index
    %210 = vector.load %arg15[%209, %c0_62] : memref<64x64xf32, #tpu.memory_space<vmem>>, vector<8x64xf32>
    tpu.vector_store %arg15[%209, %c0_62], %208 {strides = array<i32>} : memref<64x64xf32, #tpu.memory_space<vmem>>, vector<8x64xf32>,
    %c8_i32_63 = arith.constant 8 : i32
    %c0_64 = arith.constant 0 : index
    %c0_65 = arith.constant 0 : index
    %211 = vector.load %arg15[%c0_64, %c0_65] : memref<64x64xf32, #tpu.memory_space<vmem>>, vector<64x64xf32>
    %c0_66 = arith.constant 0 : index
    %c0_67 = arith.constant 0 : index
    %212 = vector.load %arg5[%c0_66, %c0_67] : memref<64x256xf32, #tpu.memory_space<vmem>>, vector<64x256xf32>
    %cst_68 = arith.constant dense<0.000000e+00> : vector<64x256xf32>
    %213 = tpu.matmul %211, %212, %cst_68 {dimension_numbers = #tpu.dot_dimension_numbers<[1], [0], [0], [1], [0, 0, 1, 1], [], []>} : vector<64x64xf32>, vector<64x256xf32>, vector<64x256xf32> -> vector<64x256xf32>
    %c0_69 = arith.constant 0 : index
    %c0_70 = arith.constant 0 : index
    %214 = vector.load %arg7[%c0_69, %c0_70] : memref<1x256xf32, #tpu.memory_space<vmem>>, vector<1x256xf32>
    %215 = vector.broadcast %214 : vector<1x256xf32> to vector<64x256xf32>
    %216 = arith.addf %213, %215 : vector<64x256xf32>
    %c0_71 = arith.constant 0 : index
    %c0_72 = arith.constant 0 : index
    %217 = vector.load %arg14[%c0_71, %c0_72] : memref<64x256xf32, #tpu.memory_space<vmem>>, vector<64x256xf32>
    tpu.vector_store %arg14[%c0_71, %c0_72], %216 {strides = array<i32>} : memref<64x256xf32, #tpu.memory_space<vmem>>, vector<64x256xf32>,
    %cst_73 = arith.constant 0.000000e+00 : f32
    %218 = vector.broadcast %cst_73 : f32 to vector<8x64xf32>
    %c0_i32_74 = arith.constant 0 : i32
    %c8_i32_75 = arith.constant 8 : i32
    %219 = arith.muli %c0_i32_74, %c8_i32_75 : i32
    %220 = tpu.assume_multiple %219, 8 : i32
    %221 = arith.index_cast %220 : i32 to index
    %c0_76 = arith.constant 0 : index
    %222 = vector.load %arg14[%221, %c0_76] : memref<64x256xf32, #tpu.memory_space<vmem>>, vector<8x256xf32>
    %c0_77 = arith.constant 0 : index
    %c0_78 = arith.constant 0 : index
    %223 = vector.load %arg6[%c0_77, %c0_78] : memref<64x256xf32, #tpu.memory_space<vmem>>, vector<64x256xf32>
    %cst_79 = arith.constant dense<0.000000e+00> : vector<8x256xf32>
    %224 = tpu.matmul %218, %223, %cst_79 {dimension_numbers = #tpu.dot_dimension_numbers<[1], [0], [0], [1], [0, 0, 1, 1], [], []>} : vector<8x64xf32>, vector<64x256xf32>, vector<8x256xf32> -> vector<8x256xf32>
    %225 = arith.addf %222, %224 : vector<8x256xf32>
    %226 = arith.negf %225 : vector<8x256xf32>
    %227 = math.exp %226 : vector<8x256xf32>
    %cst_80 = arith.constant 1.000000e+00 : f32
    %228 = vector.broadcast %cst_80 : f32 to vector<8x256xf32>
    %229 = arith.addf %228, %227 : vector<8x256xf32>
    %230 = arith.divf %228, %229 : vector<8x256xf32>
    %231 = math.tanh %225 : vector<8x256xf32>
    %232 = arith.select %2, %230, %231 : vector<8x256xi1>, vector<8x256xf32>
    %233 = vector.extract_strided_slice %232 {offsets = [0, 0], sizes = [8, 64], strides = [1, 1]} : vector<8x256xf32> to vector<8x64xf32>
    %234 = vector.extract_strided_slice %232 {offsets = [0, 64], sizes = [8, 64], strides = [1, 1]} : vector<8x256xf32> to vector<8x64xf32>
    %235 = vector.extract_strided_slice %232 {offsets = [0, 128], sizes = [8, 64], strides = [1, 1]} : vector<8x256xf32> to vector<8x64xf32>
    %236 = vector.extract_strided_slice %232 {offsets = [0, 192], sizes = [8, 64], strides = [1, 1]} : vector<8x256xf32> to vector<8x64xf32>
    %237 = arith.mulf %234, %218 : vector<8x64xf32>
    %238 = arith.mulf %233, %236 : vector<8x64xf32>
    %239 = arith.addf %237, %238 : vector<8x64xf32>
    %240 = math.tanh %239 : vector<8x64xf32>
    %241 = arith.mulf %235, %240 : vector<8x64xf32>
    %242 = arith.index_cast %220 : i32 to index
    %c0_81 = arith.constant 0 : index
    %243 = vector.load %arg15[%242, %c0_81] : memref<64x64xf32, #tpu.memory_space<vmem>>, vector<8x64xf32>
    tpu.vector_store %arg15[%242, %c0_81], %241 {strides = array<i32>} : memref<64x64xf32, #tpu.memory_space<vmem>>, vector<8x64xf32>,
    %c1_i32_82 = arith.constant 1 : i32
    %c8_i32_83 = arith.constant 8 : i32
    %244 = arith.muli %c1_i32_82, %c8_i32_83 : i32
    %245 = tpu.assume_multiple %244, 8 : i32
    %246 = arith.index_cast %245 : i32 to index
    %c0_84 = arith.constant 0 : index
    %247 = vector.load %arg14[%246, %c0_84] : memref<64x256xf32, #tpu.memory_space<vmem>>, vector<8x256xf32>
    %c0_85 = arith.constant 0 : index
    %c0_86 = arith.constant 0 : index
    %248 = vector.load %arg6[%c0_85, %c0_86] : memref<64x256xf32, #tpu.memory_space<vmem>>, vector<64x256xf32>
    %cst_87 = arith.constant dense<0.000000e+00> : vector<8x256xf32>
    %249 = tpu.matmul %241, %248, %cst_87 {dimension_numbers = #tpu.dot_dimension_numbers<[1], [0], [0], [1], [0, 0, 1, 1], [], []>} : vector<8x64xf32>, vector<64x256xf32>, vector<8x256xf32> -> vector<8x256xf32>
    %250 = arith.addf %247, %249 : vector<8x256xf32>
    %251 = arith.negf %250 : vector<8x256xf32>
    %252 = math.exp %251 : vector<8x256xf32>
    %cst_88 = arith.constant 1.000000e+00 : f32
    %253 = vector.broadcast %cst_88 : f32 to vector<8x256xf32>
    %254 = arith.addf %253, %252 : vector<8x256xf32>
    %255 = arith.divf %253, %254 : vector<8x256xf32>
    %256 = math.tanh %250 : vector<8x256xf32>
    %257 = arith.select %2, %255, %256 : vector<8x256xi1>, vector<8x256xf32>
    %258 = vector.extract_strided_slice %257 {offsets = [0, 0], sizes = [8, 64], strides = [1, 1]} : vector<8x256xf32> to vector<8x64xf32>
    %259 = vector.extract_strided_slice %257 {offsets = [0, 64], sizes = [8, 64], strides = [1, 1]} : vector<8x256xf32> to vector<8x64xf32>
    %260 = vector.extract_strided_slice %257 {offsets = [0, 128], sizes = [8, 64], strides = [1, 1]} : vector<8x256xf32> to vector<8x64xf32>
    %261 = vector.extract_strided_slice %257 {offsets = [0, 192], sizes = [8, 64], strides = [1, 1]} : vector<8x256xf32> to vector<8x64xf32>
    %262 = arith.mulf %259, %239 : vector<8x64xf32>
    %263 = arith.mulf %258, %261 : vector<8x64xf32>
    %264 = arith.addf %262, %263 : vector<8x64xf32>
    %265 = math.tanh %264 : vector<8x64xf32>
    %266 = arith.mulf %260, %265 : vector<8x64xf32>
    %267 = arith.index_cast %245 : i32 to index
    %c0_89 = arith.constant 0 : index
    %268 = vector.load %arg15[%267, %c0_89] : memref<64x64xf32, #tpu.memory_space<vmem>>, vector<8x64xf32>
    tpu.vector_store %arg15[%267, %c0_89], %266 {strides = array<i32>} : memref<64x64xf32, #tpu.memory_space<vmem>>, vector<8x64xf32>,
    %c2_i32_90 = arith.constant 2 : i32
    %c8_i32_91 = arith.constant 8 : i32
    %269 = arith.muli %c2_i32_90, %c8_i32_91 : i32
    %270 = tpu.assume_multiple %269, 8 : i32
    %271 = arith.index_cast %270 : i32 to index
    %c0_92 = arith.constant 0 : index
    %272 = vector.load %arg14[%271, %c0_92] : memref<64x256xf32, #tpu.memory_space<vmem>>, vector<8x256xf32>
    %c0_93 = arith.constant 0 : index
    %c0_94 = arith.constant 0 : index
    %273 = vector.load %arg6[%c0_93, %c0_94] : memref<64x256xf32, #tpu.memory_space<vmem>>, vector<64x256xf32>
    %cst_95 = arith.constant dense<0.000000e+00> : vector<8x256xf32>
    %274 = tpu.matmul %266, %273, %cst_95 {dimension_numbers = #tpu.dot_dimension_numbers<[1], [0], [0], [1], [0, 0, 1, 1], [], []>} : vector<8x64xf32>, vector<64x256xf32>, vector<8x256xf32> -> vector<8x256xf32>
    %275 = arith.addf %272, %274 : vector<8x256xf32>
    %276 = arith.negf %275 : vector<8x256xf32>
    %277 = math.exp %276 : vector<8x256xf32>
    %cst_96 = arith.constant 1.000000e+00 : f32
    %278 = vector.broadcast %cst_96 : f32 to vector<8x256xf32>
    %279 = arith.addf %278, %277 : vector<8x256xf32>
    %280 = arith.divf %278, %279 : vector<8x256xf32>
    %281 = math.tanh %275 : vector<8x256xf32>
    %282 = arith.select %2, %280, %281 : vector<8x256xi1>, vector<8x256xf32>
    %283 = vector.extract_strided_slice %282 {offsets = [0, 0], sizes = [8, 64], strides = [1, 1]} : vector<8x256xf32> to vector<8x64xf32>
    %284 = vector.extract_strided_slice %282 {offsets = [0, 64], sizes = [8, 64], strides = [1, 1]} : vector<8x256xf32> to vector<8x64xf32>
    %285 = vector.extract_strided_slice %282 {offsets = [0, 128], sizes = [8, 64], strides = [1, 1]} : vector<8x256xf32> to vector<8x64xf32>
    %286 = vector.extract_strided_slice %282 {offsets = [0, 192], sizes = [8, 64], strides = [1, 1]} : vector<8x256xf32> to vector<8x64xf32>
    %287 = arith.mulf %284, %264 : vector<8x64xf32>
    %288 = arith.mulf %283, %286 : vector<8x64xf32>
    %289 = arith.addf %287, %288 : vector<8x64xf32>
    %290 = math.tanh %289 : vector<8x64xf32>
    %291 = arith.mulf %285, %290 : vector<8x64xf32>
    %292 = arith.index_cast %270 : i32 to index
    %c0_97 = arith.constant 0 : index
    %293 = vector.load %arg15[%292, %c0_97] : memref<64x64xf32, #tpu.memory_space<vmem>>, vector<8x64xf32>
    tpu.vector_store %arg15[%292, %c0_97], %291 {strides = array<i32>} : memref<64x64xf32, #tpu.memory_space<vmem>>, vector<8x64xf32>,
    %c3_i32_98 = arith.constant 3 : i32
    %c8_i32_99 = arith.constant 8 : i32
    %294 = arith.muli %c3_i32_98, %c8_i32_99 : i32
    %295 = tpu.assume_multiple %294, 8 : i32
    %296 = arith.index_cast %295 : i32 to index
    %c0_100 = arith.constant 0 : index
    %297 = vector.load %arg14[%296, %c0_100] : memref<64x256xf32, #tpu.memory_space<vmem>>, vector<8x256xf32>
    %c0_101 = arith.constant 0 : index
    %c0_102 = arith.constant 0 : index
    %298 = vector.load %arg6[%c0_101, %c0_102] : memref<64x256xf32, #tpu.memory_space<vmem>>, vector<64x256xf32>
    %cst_103 = arith.constant dense<0.000000e+00> : vector<8x256xf32>
    %299 = tpu.matmul %291, %298, %cst_103 {dimension_numbers = #tpu.dot_dimension_numbers<[1], [0], [0], [1], [0, 0, 1, 1], [], []>} : vector<8x64xf32>, vector<64x256xf32>, vector<8x256xf32> -> vector<8x256xf32>
    %300 = arith.addf %297, %299 : vector<8x256xf32>
    %301 = arith.negf %300 : vector<8x256xf32>
    %302 = math.exp %301 : vector<8x256xf32>
    %cst_104 = arith.constant 1.000000e+00 : f32
    %303 = vector.broadcast %cst_104 : f32 to vector<8x256xf32>
    %304 = arith.addf %303, %302 : vector<8x256xf32>
    %305 = arith.divf %303, %304 : vector<8x256xf32>
    %306 = math.tanh %300 : vector<8x256xf32>
    %307 = arith.select %2, %305, %306 : vector<8x256xi1>, vector<8x256xf32>
    %308 = vector.extract_strided_slice %307 {offsets = [0, 0], sizes = [8, 64], strides = [1, 1]} : vector<8x256xf32> to vector<8x64xf32>
    %309 = vector.extract_strided_slice %307 {offsets = [0, 64], sizes = [8, 64], strides = [1, 1]} : vector<8x256xf32> to vector<8x64xf32>
    %310 = vector.extract_strided_slice %307 {offsets = [0, 128], sizes = [8, 64], strides = [1, 1]} : vector<8x256xf32> to vector<8x64xf32>
    %311 = vector.extract_strided_slice %307 {offsets = [0, 192], sizes = [8, 64], strides = [1, 1]} : vector<8x256xf32> to vector<8x64xf32>
    %312 = arith.mulf %309, %289 : vector<8x64xf32>
    %313 = arith.mulf %308, %311 : vector<8x64xf32>
    %314 = arith.addf %312, %313 : vector<8x64xf32>
    %315 = math.tanh %314 : vector<8x64xf32>
    %316 = arith.mulf %310, %315 : vector<8x64xf32>
    %317 = arith.index_cast %295 : i32 to index
    %c0_105 = arith.constant 0 : index
    %318 = vector.load %arg15[%317, %c0_105] : memref<64x64xf32, #tpu.memory_space<vmem>>, vector<8x64xf32>
    tpu.vector_store %arg15[%317, %c0_105], %316 {strides = array<i32>} : memref<64x64xf32, #tpu.memory_space<vmem>>, vector<8x64xf32>,
    %c4_i32_106 = arith.constant 4 : i32
    %c8_i32_107 = arith.constant 8 : i32
    %319 = arith.muli %c4_i32_106, %c8_i32_107 : i32
    %320 = tpu.assume_multiple %319, 8 : i32
    %321 = arith.index_cast %320 : i32 to index
    %c0_108 = arith.constant 0 : index
    %322 = vector.load %arg14[%321, %c0_108] : memref<64x256xf32, #tpu.memory_space<vmem>>, vector<8x256xf32>
    %c0_109 = arith.constant 0 : index
    %c0_110 = arith.constant 0 : index
    %323 = vector.load %arg6[%c0_109, %c0_110] : memref<64x256xf32, #tpu.memory_space<vmem>>, vector<64x256xf32>
    %cst_111 = arith.constant dense<0.000000e+00> : vector<8x256xf32>
    %324 = tpu.matmul %316, %323, %cst_111 {dimension_numbers = #tpu.dot_dimension_numbers<[1], [0], [0], [1], [0, 0, 1, 1], [], []>} : vector<8x64xf32>, vector<64x256xf32>, vector<8x256xf32> -> vector<8x256xf32>
    %325 = arith.addf %322, %324 : vector<8x256xf32>
    %326 = arith.negf %325 : vector<8x256xf32>
    %327 = math.exp %326 : vector<8x256xf32>
    %cst_112 = arith.constant 1.000000e+00 : f32
    %328 = vector.broadcast %cst_112 : f32 to vector<8x256xf32>
    %329 = arith.addf %328, %327 : vector<8x256xf32>
    %330 = arith.divf %328, %329 : vector<8x256xf32>
    %331 = math.tanh %325 : vector<8x256xf32>
    %332 = arith.select %2, %330, %331 : vector<8x256xi1>, vector<8x256xf32>
    %333 = vector.extract_strided_slice %332 {offsets = [0, 0], sizes = [8, 64], strides = [1, 1]} : vector<8x256xf32> to vector<8x64xf32>
    %334 = vector.extract_strided_slice %332 {offsets = [0, 64], sizes = [8, 64], strides = [1, 1]} : vector<8x256xf32> to vector<8x64xf32>
    %335 = vector.extract_strided_slice %332 {offsets = [0, 128], sizes = [8, 64], strides = [1, 1]} : vector<8x256xf32> to vector<8x64xf32>
    %336 = vector.extract_strided_slice %332 {offsets = [0, 192], sizes = [8, 64], strides = [1, 1]} : vector<8x256xf32> to vector<8x64xf32>
    %337 = arith.mulf %334, %314 : vector<8x64xf32>
    %338 = arith.mulf %333, %336 : vector<8x64xf32>
    %339 = arith.addf %337, %338 : vector<8x64xf32>
    %340 = math.tanh %339 : vector<8x64xf32>
    %341 = arith.mulf %335, %340 : vector<8x64xf32>
    %342 = arith.index_cast %320 : i32 to index
    %c0_113 = arith.constant 0 : index
    %343 = vector.load %arg15[%342, %c0_113] : memref<64x64xf32, #tpu.memory_space<vmem>>, vector<8x64xf32>
    tpu.vector_store %arg15[%342, %c0_113], %341 {strides = array<i32>} : memref<64x64xf32, #tpu.memory_space<vmem>>, vector<8x64xf32>,
    %c5_i32_114 = arith.constant 5 : i32
    %c8_i32_115 = arith.constant 8 : i32
    %344 = arith.muli %c5_i32_114, %c8_i32_115 : i32
    %345 = tpu.assume_multiple %344, 8 : i32
    %346 = arith.index_cast %345 : i32 to index
    %c0_116 = arith.constant 0 : index
    %347 = vector.load %arg14[%346, %c0_116] : memref<64x256xf32, #tpu.memory_space<vmem>>, vector<8x256xf32>
    %c0_117 = arith.constant 0 : index
    %c0_118 = arith.constant 0 : index
    %348 = vector.load %arg6[%c0_117, %c0_118] : memref<64x256xf32, #tpu.memory_space<vmem>>, vector<64x256xf32>
    %cst_119 = arith.constant dense<0.000000e+00> : vector<8x256xf32>
    %349 = tpu.matmul %341, %348, %cst_119 {dimension_numbers = #tpu.dot_dimension_numbers<[1], [0], [0], [1], [0, 0, 1, 1], [], []>} : vector<8x64xf32>, vector<64x256xf32>, vector<8x256xf32> -> vector<8x256xf32>
    %350 = arith.addf %347, %349 : vector<8x256xf32>
    %351 = arith.negf %350 : vector<8x256xf32>
    %352 = math.exp %351 : vector<8x256xf32>
    %cst_120 = arith.constant 1.000000e+00 : f32
    %353 = vector.broadcast %cst_120 : f32 to vector<8x256xf32>
    %354 = arith.addf %353, %352 : vector<8x256xf32>
    %355 = arith.divf %353, %354 : vector<8x256xf32>
    %356 = math.tanh %350 : vector<8x256xf32>
    %357 = arith.select %2, %355, %356 : vector<8x256xi1>, vector<8x256xf32>
    %358 = vector.extract_strided_slice %357 {offsets = [0, 0], sizes = [8, 64], strides = [1, 1]} : vector<8x256xf32> to vector<8x64xf32>
    %359 = vector.extract_strided_slice %357 {offsets = [0, 64], sizes = [8, 64], strides = [1, 1]} : vector<8x256xf32> to vector<8x64xf32>
    %360 = vector.extract_strided_slice %357 {offsets = [0, 128], sizes = [8, 64], strides = [1, 1]} : vector<8x256xf32> to vector<8x64xf32>
    %361 = vector.extract_strided_slice %357 {offsets = [0, 192], sizes = [8, 64], strides = [1, 1]} : vector<8x256xf32> to vector<8x64xf32>
    %362 = arith.mulf %359, %339 : vector<8x64xf32>
    %363 = arith.mulf %358, %361 : vector<8x64xf32>
    %364 = arith.addf %362, %363 : vector<8x64xf32>
    %365 = math.tanh %364 : vector<8x64xf32>
    %366 = arith.mulf %360, %365 : vector<8x64xf32>
    %367 = arith.index_cast %345 : i32 to index
    %c0_121 = arith.constant 0 : index
    %368 = vector.load %arg15[%367, %c0_121] : memref<64x64xf32, #tpu.memory_space<vmem>>, vector<8x64xf32>
    tpu.vector_store %arg15[%367, %c0_121], %366 {strides = array<i32>} : memref<64x64xf32, #tpu.memory_space<vmem>>, vector<8x64xf32>,
    %c6_i32_122 = arith.constant 6 : i32
    %c8_i32_123 = arith.constant 8 : i32
    %369 = arith.muli %c6_i32_122, %c8_i32_123 : i32
    %370 = tpu.assume_multiple %369, 8 : i32
    %371 = arith.index_cast %370 : i32 to index
    %c0_124 = arith.constant 0 : index
    %372 = vector.load %arg14[%371, %c0_124] : memref<64x256xf32, #tpu.memory_space<vmem>>, vector<8x256xf32>
    %c0_125 = arith.constant 0 : index
    %c0_126 = arith.constant 0 : index
    %373 = vector.load %arg6[%c0_125, %c0_126] : memref<64x256xf32, #tpu.memory_space<vmem>>, vector<64x256xf32>
    %cst_127 = arith.constant dense<0.000000e+00> : vector<8x256xf32>
    %374 = tpu.matmul %366, %373, %cst_127 {dimension_numbers = #tpu.dot_dimension_numbers<[1], [0], [0], [1], [0, 0, 1, 1], [], []>} : vector<8x64xf32>, vector<64x256xf32>, vector<8x256xf32> -> vector<8x256xf32>
    %375 = arith.addf %372, %374 : vector<8x256xf32>
    %376 = arith.negf %375 : vector<8x256xf32>
    %377 = math.exp %376 : vector<8x256xf32>
    %cst_128 = arith.constant 1.000000e+00 : f32
    %378 = vector.broadcast %cst_128 : f32 to vector<8x256xf32>
    %379 = arith.addf %378, %377 : vector<8x256xf32>
    %380 = arith.divf %378, %379 : vector<8x256xf32>
    %381 = math.tanh %375 : vector<8x256xf32>
    %382 = arith.select %2, %380, %381 : vector<8x256xi1>, vector<8x256xf32>
    %383 = vector.extract_strided_slice %382 {offsets = [0, 0], sizes = [8, 64], strides = [1, 1]} : vector<8x256xf32> to vector<8x64xf32>
    %384 = vector.extract_strided_slice %382 {offsets = [0, 64], sizes = [8, 64], strides = [1, 1]} : vector<8x256xf32> to vector<8x64xf32>
    %385 = vector.extract_strided_slice %382 {offsets = [0, 128], sizes = [8, 64], strides = [1, 1]} : vector<8x256xf32> to vector<8x64xf32>
    %386 = vector.extract_strided_slice %382 {offsets = [0, 192], sizes = [8, 64], strides = [1, 1]} : vector<8x256xf32> to vector<8x64xf32>
    %387 = arith.mulf %384, %364 : vector<8x64xf32>
    %388 = arith.mulf %383, %386 : vector<8x64xf32>
    %389 = arith.addf %387, %388 : vector<8x64xf32>
    %390 = math.tanh %389 : vector<8x64xf32>
    %391 = arith.mulf %385, %390 : vector<8x64xf32>
    %392 = arith.index_cast %370 : i32 to index
    %c0_129 = arith.constant 0 : index
    %393 = vector.load %arg15[%392, %c0_129] : memref<64x64xf32, #tpu.memory_space<vmem>>, vector<8x64xf32>
    tpu.vector_store %arg15[%392, %c0_129], %391 {strides = array<i32>} : memref<64x64xf32, #tpu.memory_space<vmem>>, vector<8x64xf32>,
    %c7_i32_130 = arith.constant 7 : i32
    %c8_i32_131 = arith.constant 8 : i32
    %394 = arith.muli %c7_i32_130, %c8_i32_131 : i32
    %395 = tpu.assume_multiple %394, 8 : i32
    %396 = arith.index_cast %395 : i32 to index
    %c0_132 = arith.constant 0 : index
    %397 = vector.load %arg14[%396, %c0_132] : memref<64x256xf32, #tpu.memory_space<vmem>>, vector<8x256xf32>
    %c0_133 = arith.constant 0 : index
    %c0_134 = arith.constant 0 : index
    %398 = vector.load %arg6[%c0_133, %c0_134] : memref<64x256xf32, #tpu.memory_space<vmem>>, vector<64x256xf32>
    %cst_135 = arith.constant dense<0.000000e+00> : vector<8x256xf32>
    %399 = tpu.matmul %391, %398, %cst_135 {dimension_numbers = #tpu.dot_dimension_numbers<[1], [0], [0], [1], [0, 0, 1, 1], [], []>} : vector<8x64xf32>, vector<64x256xf32>, vector<8x256xf32> -> vector<8x256xf32>
    %400 = arith.addf %397, %399 : vector<8x256xf32>
    %401 = arith.negf %400 : vector<8x256xf32>
    %402 = math.exp %401 : vector<8x256xf32>
    %cst_136 = arith.constant 1.000000e+00 : f32
    %403 = vector.broadcast %cst_136 : f32 to vector<8x256xf32>
    %404 = arith.addf %403, %402 : vector<8x256xf32>
    %405 = arith.divf %403, %404 : vector<8x256xf32>
    %406 = math.tanh %400 : vector<8x256xf32>
    %407 = arith.select %2, %405, %406 : vector<8x256xi1>, vector<8x256xf32>
    %408 = vector.extract_strided_slice %407 {offsets = [0, 0], sizes = [8, 64], strides = [1, 1]} : vector<8x256xf32> to vector<8x64xf32>
    %409 = vector.extract_strided_slice %407 {offsets = [0, 64], sizes = [8, 64], strides = [1, 1]} : vector<8x256xf32> to vector<8x64xf32>
    %410 = vector.extract_strided_slice %407 {offsets = [0, 128], sizes = [8, 64], strides = [1, 1]} : vector<8x256xf32> to vector<8x64xf32>
    %411 = vector.extract_strided_slice %407 {offsets = [0, 192], sizes = [8, 64], strides = [1, 1]} : vector<8x256xf32> to vector<8x64xf32>
    %412 = arith.mulf %409, %389 : vector<8x64xf32>
    %413 = arith.mulf %408, %411 : vector<8x64xf32>
    %414 = arith.addf %412, %413 : vector<8x64xf32>
    %415 = math.tanh %414 : vector<8x64xf32>
    %416 = arith.mulf %410, %415 : vector<8x64xf32>
    %417 = arith.index_cast %395 : i32 to index
    %c0_137 = arith.constant 0 : index
    %418 = vector.load %arg15[%417, %c0_137] : memref<64x64xf32, #tpu.memory_space<vmem>>, vector<8x64xf32>
    tpu.vector_store %arg15[%417, %c0_137], %416 {strides = array<i32>} : memref<64x64xf32, #tpu.memory_space<vmem>>, vector<8x64xf32>,
    %c8_i32_138 = arith.constant 8 : i32
    %c0_139 = arith.constant 0 : index
    %c0_140 = arith.constant 0 : index
    %419 = vector.load %arg15[%c0_139, %c0_140] : memref<64x64xf32, #tpu.memory_space<vmem>>, vector<64x64xf32>
    %c0_141 = arith.constant 0 : index
    %c0_142 = arith.constant 0 : index
    %420 = vector.load %arg8[%c0_141, %c0_142] : memref<64x256xf32, #tpu.memory_space<vmem>>, vector<64x256xf32>
    %cst_143 = arith.constant dense<0.000000e+00> : vector<64x256xf32>
    %421 = tpu.matmul %419, %420, %cst_143 {dimension_numbers = #tpu.dot_dimension_numbers<[1], [0], [0], [1], [0, 0, 1, 1], [], []>} : vector<64x64xf32>, vector<64x256xf32>, vector<64x256xf32> -> vector<64x256xf32>
    %c0_144 = arith.constant 0 : index
    %c0_145 = arith.constant 0 : index
    %422 = vector.load %arg10[%c0_144, %c0_145] : memref<1x256xf32, #tpu.memory_space<vmem>>, vector<1x256xf32>
    %423 = vector.broadcast %422 : vector<1x256xf32> to vector<64x256xf32>
    %424 = arith.addf %421, %423 : vector<64x256xf32>
    %c0_146 = arith.constant 0 : index
    %c0_147 = arith.constant 0 : index
    %425 = vector.load %arg14[%c0_146, %c0_147] : memref<64x256xf32, #tpu.memory_space<vmem>>, vector<64x256xf32>
    tpu.vector_store %arg14[%c0_146, %c0_147], %424 {strides = array<i32>} : memref<64x256xf32, #tpu.memory_space<vmem>>, vector<64x256xf32>,
    %cst_148 = arith.constant 0.000000e+00 : f32
    %426 = vector.broadcast %cst_148 : f32 to vector<8x64xf32>
    %c0_i32_149 = arith.constant 0 : i32
    %c8_i32_150 = arith.constant 8 : i32
    %427 = arith.muli %c0_i32_149, %c8_i32_150 : i32
    %428 = tpu.assume_multiple %427, 8 : i32
    %429 = arith.index_cast %428 : i32 to index
    %c0_151 = arith.constant 0 : index
    %430 = vector.load %arg14[%429, %c0_151] : memref<64x256xf32, #tpu.memory_space<vmem>>, vector<8x256xf32>
    %c0_152 = arith.constant 0 : index
    %c0_153 = arith.constant 0 : index
    %431 = vector.load %arg9[%c0_152, %c0_153] : memref<64x256xf32, #tpu.memory_space<vmem>>, vector<64x256xf32>
    %cst_154 = arith.constant dense<0.000000e+00> : vector<8x256xf32>
    %432 = tpu.matmul %426, %431, %cst_154 {dimension_numbers = #tpu.dot_dimension_numbers<[1], [0], [0], [1], [0, 0, 1, 1], [], []>} : vector<8x64xf32>, vector<64x256xf32>, vector<8x256xf32> -> vector<8x256xf32>
    %433 = arith.addf %430, %432 : vector<8x256xf32>
    %434 = arith.negf %433 : vector<8x256xf32>
    %435 = math.exp %434 : vector<8x256xf32>
    %cst_155 = arith.constant 1.000000e+00 : f32
    %436 = vector.broadcast %cst_155 : f32 to vector<8x256xf32>
    %437 = arith.addf %436, %435 : vector<8x256xf32>
    %438 = arith.divf %436, %437 : vector<8x256xf32>
    %439 = math.tanh %433 : vector<8x256xf32>
    %440 = arith.select %2, %438, %439 : vector<8x256xi1>, vector<8x256xf32>
    %441 = vector.extract_strided_slice %440 {offsets = [0, 0], sizes = [8, 64], strides = [1, 1]} : vector<8x256xf32> to vector<8x64xf32>
    %442 = vector.extract_strided_slice %440 {offsets = [0, 64], sizes = [8, 64], strides = [1, 1]} : vector<8x256xf32> to vector<8x64xf32>
    %443 = vector.extract_strided_slice %440 {offsets = [0, 128], sizes = [8, 64], strides = [1, 1]} : vector<8x256xf32> to vector<8x64xf32>
    %444 = vector.extract_strided_slice %440 {offsets = [0, 192], sizes = [8, 64], strides = [1, 1]} : vector<8x256xf32> to vector<8x64xf32>
    %445 = arith.mulf %442, %426 : vector<8x64xf32>
    %446 = arith.mulf %441, %444 : vector<8x64xf32>
    %447 = arith.addf %445, %446 : vector<8x64xf32>
    %448 = math.tanh %447 : vector<8x64xf32>
    %449 = arith.mulf %443, %448 : vector<8x64xf32>
    %c1_i32_156 = arith.constant 1 : i32
    %c8_i32_157 = arith.constant 8 : i32
    %450 = arith.muli %c1_i32_156, %c8_i32_157 : i32
    %451 = tpu.assume_multiple %450, 8 : i32
    %452 = arith.index_cast %451 : i32 to index
    %c0_158 = arith.constant 0 : index
    %453 = vector.load %arg14[%452, %c0_158] : memref<64x256xf32, #tpu.memory_space<vmem>>, vector<8x256xf32>
    %c0_159 = arith.constant 0 : index
    %c0_160 = arith.constant 0 : index
    %454 = vector.load %arg9[%c0_159, %c0_160] : memref<64x256xf32, #tpu.memory_space<vmem>>, vector<64x256xf32>
    %cst_161 = arith.constant dense<0.000000e+00> : vector<8x256xf32>
    %455 = tpu.matmul %449, %454, %cst_161 {dimension_numbers = #tpu.dot_dimension_numbers<[1], [0], [0], [1], [0, 0, 1, 1], [], []>} : vector<8x64xf32>, vector<64x256xf32>, vector<8x256xf32> -> vector<8x256xf32>
    %456 = arith.addf %453, %455 : vector<8x256xf32>
    %457 = arith.negf %456 : vector<8x256xf32>
    %458 = math.exp %457 : vector<8x256xf32>
    %cst_162 = arith.constant 1.000000e+00 : f32
    %459 = vector.broadcast %cst_162 : f32 to vector<8x256xf32>
    %460 = arith.addf %459, %458 : vector<8x256xf32>
    %461 = arith.divf %459, %460 : vector<8x256xf32>
    %462 = math.tanh %456 : vector<8x256xf32>
    %463 = arith.select %2, %461, %462 : vector<8x256xi1>, vector<8x256xf32>
    %464 = vector.extract_strided_slice %463 {offsets = [0, 0], sizes = [8, 64], strides = [1, 1]} : vector<8x256xf32> to vector<8x64xf32>
    %465 = vector.extract_strided_slice %463 {offsets = [0, 64], sizes = [8, 64], strides = [1, 1]} : vector<8x256xf32> to vector<8x64xf32>
    %466 = vector.extract_strided_slice %463 {offsets = [0, 128], sizes = [8, 64], strides = [1, 1]} : vector<8x256xf32> to vector<8x64xf32>
    %467 = vector.extract_strided_slice %463 {offsets = [0, 192], sizes = [8, 64], strides = [1, 1]} : vector<8x256xf32> to vector<8x64xf32>
    %468 = arith.mulf %465, %447 : vector<8x64xf32>
    %469 = arith.mulf %464, %467 : vector<8x64xf32>
    %470 = arith.addf %468, %469 : vector<8x64xf32>
    %471 = math.tanh %470 : vector<8x64xf32>
    %472 = arith.mulf %466, %471 : vector<8x64xf32>
    %c2_i32_163 = arith.constant 2 : i32
    %c8_i32_164 = arith.constant 8 : i32
    %473 = arith.muli %c2_i32_163, %c8_i32_164 : i32
    %474 = tpu.assume_multiple %473, 8 : i32
    %475 = arith.index_cast %474 : i32 to index
    %c0_165 = arith.constant 0 : index
    %476 = vector.load %arg14[%475, %c0_165] : memref<64x256xf32, #tpu.memory_space<vmem>>, vector<8x256xf32>
    %c0_166 = arith.constant 0 : index
    %c0_167 = arith.constant 0 : index
    %477 = vector.load %arg9[%c0_166, %c0_167] : memref<64x256xf32, #tpu.memory_space<vmem>>, vector<64x256xf32>
    %cst_168 = arith.constant dense<0.000000e+00> : vector<8x256xf32>
    %478 = tpu.matmul %472, %477, %cst_168 {dimension_numbers = #tpu.dot_dimension_numbers<[1], [0], [0], [1], [0, 0, 1, 1], [], []>} : vector<8x64xf32>, vector<64x256xf32>, vector<8x256xf32> -> vector<8x256xf32>
    %479 = arith.addf %476, %478 : vector<8x256xf32>
    %480 = arith.negf %479 : vector<8x256xf32>
    %481 = math.exp %480 : vector<8x256xf32>
    %cst_169 = arith.constant 1.000000e+00 : f32
    %482 = vector.broadcast %cst_169 : f32 to vector<8x256xf32>
    %483 = arith.addf %482, %481 : vector<8x256xf32>
    %484 = arith.divf %482, %483 : vector<8x256xf32>
    %485 = math.tanh %479 : vector<8x256xf32>
    %486 = arith.select %2, %484, %485 : vector<8x256xi1>, vector<8x256xf32>
    %487 = vector.extract_strided_slice %486 {offsets = [0, 0], sizes = [8, 64], strides = [1, 1]} : vector<8x256xf32> to vector<8x64xf32>
    %488 = vector.extract_strided_slice %486 {offsets = [0, 64], sizes = [8, 64], strides = [1, 1]} : vector<8x256xf32> to vector<8x64xf32>
    %489 = vector.extract_strided_slice %486 {offsets = [0, 128], sizes = [8, 64], strides = [1, 1]} : vector<8x256xf32> to vector<8x64xf32>
    %490 = vector.extract_strided_slice %486 {offsets = [0, 192], sizes = [8, 64], strides = [1, 1]} : vector<8x256xf32> to vector<8x64xf32>
    %491 = arith.mulf %488, %470 : vector<8x64xf32>
    %492 = arith.mulf %487, %490 : vector<8x64xf32>
    %493 = arith.addf %491, %492 : vector<8x64xf32>
    %494 = math.tanh %493 : vector<8x64xf32>
    %495 = arith.mulf %489, %494 : vector<8x64xf32>
    %c3_i32_170 = arith.constant 3 : i32
    %c8_i32_171 = arith.constant 8 : i32
    %496 = arith.muli %c3_i32_170, %c8_i32_171 : i32
    %497 = tpu.assume_multiple %496, 8 : i32
    %498 = arith.index_cast %497 : i32 to index
    %c0_172 = arith.constant 0 : index
    %499 = vector.load %arg14[%498, %c0_172] : memref<64x256xf32, #tpu.memory_space<vmem>>, vector<8x256xf32>
    %c0_173 = arith.constant 0 : index
    %c0_174 = arith.constant 0 : index
    %500 = vector.load %arg9[%c0_173, %c0_174] : memref<64x256xf32, #tpu.memory_space<vmem>>, vector<64x256xf32>
    %cst_175 = arith.constant dense<0.000000e+00> : vector<8x256xf32>
    %501 = tpu.matmul %495, %500, %cst_175 {dimension_numbers = #tpu.dot_dimension_numbers<[1], [0], [0], [1], [0, 0, 1, 1], [], []>} : vector<8x64xf32>, vector<64x256xf32>, vector<8x256xf32> -> vector<8x256xf32>
    %502 = arith.addf %499, %501 : vector<8x256xf32>
    %503 = arith.negf %502 : vector<8x256xf32>
    %504 = math.exp %503 : vector<8x256xf32>
    %cst_176 = arith.constant 1.000000e+00 : f32
    %505 = vector.broadcast %cst_176 : f32 to vector<8x256xf32>
    %506 = arith.addf %505, %504 : vector<8x256xf32>
    %507 = arith.divf %505, %506 : vector<8x256xf32>
    %508 = math.tanh %502 : vector<8x256xf32>
    %509 = arith.select %2, %507, %508 : vector<8x256xi1>, vector<8x256xf32>
    %510 = vector.extract_strided_slice %509 {offsets = [0, 0], sizes = [8, 64], strides = [1, 1]} : vector<8x256xf32> to vector<8x64xf32>
    %511 = vector.extract_strided_slice %509 {offsets = [0, 64], sizes = [8, 64], strides = [1, 1]} : vector<8x256xf32> to vector<8x64xf32>
    %512 = vector.extract_strided_slice %509 {offsets = [0, 128], sizes = [8, 64], strides = [1, 1]} : vector<8x256xf32> to vector<8x64xf32>
    %513 = vector.extract_strided_slice %509 {offsets = [0, 192], sizes = [8, 64], strides = [1, 1]} : vector<8x256xf32> to vector<8x64xf32>
    %514 = arith.mulf %511, %493 : vector<8x64xf32>
    %515 = arith.mulf %510, %513 : vector<8x64xf32>
    %516 = arith.addf %514, %515 : vector<8x64xf32>
    %517 = math.tanh %516 : vector<8x64xf32>
    %518 = arith.mulf %512, %517 : vector<8x64xf32>
    %c4_i32_177 = arith.constant 4 : i32
    %c8_i32_178 = arith.constant 8 : i32
    %519 = arith.muli %c4_i32_177, %c8_i32_178 : i32
    %520 = tpu.assume_multiple %519, 8 : i32
    %521 = arith.index_cast %520 : i32 to index
    %c0_179 = arith.constant 0 : index
    %522 = vector.load %arg14[%521, %c0_179] : memref<64x256xf32, #tpu.memory_space<vmem>>, vector<8x256xf32>
    %c0_180 = arith.constant 0 : index
    %c0_181 = arith.constant 0 : index
    %523 = vector.load %arg9[%c0_180, %c0_181] : memref<64x256xf32, #tpu.memory_space<vmem>>, vector<64x256xf32>
    %cst_182 = arith.constant dense<0.000000e+00> : vector<8x256xf32>
    %524 = tpu.matmul %518, %523, %cst_182 {dimension_numbers = #tpu.dot_dimension_numbers<[1], [0], [0], [1], [0, 0, 1, 1], [], []>} : vector<8x64xf32>, vector<64x256xf32>, vector<8x256xf32> -> vector<8x256xf32>
    %525 = arith.addf %522, %524 : vector<8x256xf32>
    %526 = arith.negf %525 : vector<8x256xf32>
    %527 = math.exp %526 : vector<8x256xf32>
    %cst_183 = arith.constant 1.000000e+00 : f32
    %528 = vector.broadcast %cst_183 : f32 to vector<8x256xf32>
    %529 = arith.addf %528, %527 : vector<8x256xf32>
    %530 = arith.divf %528, %529 : vector<8x256xf32>
    %531 = math.tanh %525 : vector<8x256xf32>
    %532 = arith.select %2, %530, %531 : vector<8x256xi1>, vector<8x256xf32>
    %533 = vector.extract_strided_slice %532 {offsets = [0, 0], sizes = [8, 64], strides = [1, 1]} : vector<8x256xf32> to vector<8x64xf32>
    %534 = vector.extract_strided_slice %532 {offsets = [0, 64], sizes = [8, 64], strides = [1, 1]} : vector<8x256xf32> to vector<8x64xf32>
    %535 = vector.extract_strided_slice %532 {offsets = [0, 128], sizes = [8, 64], strides = [1, 1]} : vector<8x256xf32> to vector<8x64xf32>
    %536 = vector.extract_strided_slice %532 {offsets = [0, 192], sizes = [8, 64], strides = [1, 1]} : vector<8x256xf32> to vector<8x64xf32>
    %537 = arith.mulf %534, %516 : vector<8x64xf32>
    %538 = arith.mulf %533, %536 : vector<8x64xf32>
    %539 = arith.addf %537, %538 : vector<8x64xf32>
    %540 = math.tanh %539 : vector<8x64xf32>
    %541 = arith.mulf %535, %540 : vector<8x64xf32>
    %c5_i32_184 = arith.constant 5 : i32
    %c8_i32_185 = arith.constant 8 : i32
    %542 = arith.muli %c5_i32_184, %c8_i32_185 : i32
    %543 = tpu.assume_multiple %542, 8 : i32
    %544 = arith.index_cast %543 : i32 to index
    %c0_186 = arith.constant 0 : index
    %545 = vector.load %arg14[%544, %c0_186] : memref<64x256xf32, #tpu.memory_space<vmem>>, vector<8x256xf32>
    %c0_187 = arith.constant 0 : index
    %c0_188 = arith.constant 0 : index
    %546 = vector.load %arg9[%c0_187, %c0_188] : memref<64x256xf32, #tpu.memory_space<vmem>>, vector<64x256xf32>
    %cst_189 = arith.constant dense<0.000000e+00> : vector<8x256xf32>
    %547 = tpu.matmul %541, %546, %cst_189 {dimension_numbers = #tpu.dot_dimension_numbers<[1], [0], [0], [1], [0, 0, 1, 1], [], []>} : vector<8x64xf32>, vector<64x256xf32>, vector<8x256xf32> -> vector<8x256xf32>
    %548 = arith.addf %545, %547 : vector<8x256xf32>
    %549 = arith.negf %548 : vector<8x256xf32>
    %550 = math.exp %549 : vector<8x256xf32>
    %cst_190 = arith.constant 1.000000e+00 : f32
    %551 = vector.broadcast %cst_190 : f32 to vector<8x256xf32>
    %552 = arith.addf %551, %550 : vector<8x256xf32>
    %553 = arith.divf %551, %552 : vector<8x256xf32>
    %554 = math.tanh %548 : vector<8x256xf32>
    %555 = arith.select %2, %553, %554 : vector<8x256xi1>, vector<8x256xf32>
    %556 = vector.extract_strided_slice %555 {offsets = [0, 0], sizes = [8, 64], strides = [1, 1]} : vector<8x256xf32> to vector<8x64xf32>
    %557 = vector.extract_strided_slice %555 {offsets = [0, 64], sizes = [8, 64], strides = [1, 1]} : vector<8x256xf32> to vector<8x64xf32>
    %558 = vector.extract_strided_slice %555 {offsets = [0, 128], sizes = [8, 64], strides = [1, 1]} : vector<8x256xf32> to vector<8x64xf32>
    %559 = vector.extract_strided_slice %555 {offsets = [0, 192], sizes = [8, 64], strides = [1, 1]} : vector<8x256xf32> to vector<8x64xf32>
    %560 = arith.mulf %557, %539 : vector<8x64xf32>
    %561 = arith.mulf %556, %559 : vector<8x64xf32>
    %562 = arith.addf %560, %561 : vector<8x64xf32>
    %563 = math.tanh %562 : vector<8x64xf32>
    %564 = arith.mulf %558, %563 : vector<8x64xf32>
    %c6_i32_191 = arith.constant 6 : i32
    %c8_i32_192 = arith.constant 8 : i32
    %565 = arith.muli %c6_i32_191, %c8_i32_192 : i32
    %566 = tpu.assume_multiple %565, 8 : i32
    %567 = arith.index_cast %566 : i32 to index
    %c0_193 = arith.constant 0 : index
    %568 = vector.load %arg14[%567, %c0_193] : memref<64x256xf32, #tpu.memory_space<vmem>>, vector<8x256xf32>
    %c0_194 = arith.constant 0 : index
    %c0_195 = arith.constant 0 : index
    %569 = vector.load %arg9[%c0_194, %c0_195] : memref<64x256xf32, #tpu.memory_space<vmem>>, vector<64x256xf32>
    %cst_196 = arith.constant dense<0.000000e+00> : vector<8x256xf32>
    %570 = tpu.matmul %564, %569, %cst_196 {dimension_numbers = #tpu.dot_dimension_numbers<[1], [0], [0], [1], [0, 0, 1, 1], [], []>} : vector<8x64xf32>, vector<64x256xf32>, vector<8x256xf32> -> vector<8x256xf32>
    %571 = arith.addf %568, %570 : vector<8x256xf32>
    %572 = arith.negf %571 : vector<8x256xf32>
    %573 = math.exp %572 : vector<8x256xf32>
    %cst_197 = arith.constant 1.000000e+00 : f32
    %574 = vector.broadcast %cst_197 : f32 to vector<8x256xf32>
    %575 = arith.addf %574, %573 : vector<8x256xf32>
    %576 = arith.divf %574, %575 : vector<8x256xf32>
    %577 = math.tanh %571 : vector<8x256xf32>
    %578 = arith.select %2, %576, %577 : vector<8x256xi1>, vector<8x256xf32>
    %579 = vector.extract_strided_slice %578 {offsets = [0, 0], sizes = [8, 64], strides = [1, 1]} : vector<8x256xf32> to vector<8x64xf32>
    %580 = vector.extract_strided_slice %578 {offsets = [0, 64], sizes = [8, 64], strides = [1, 1]} : vector<8x256xf32> to vector<8x64xf32>
    %581 = vector.extract_strided_slice %578 {offsets = [0, 128], sizes = [8, 64], strides = [1, 1]} : vector<8x256xf32> to vector<8x64xf32>
    %582 = vector.extract_strided_slice %578 {offsets = [0, 192], sizes = [8, 64], strides = [1, 1]} : vector<8x256xf32> to vector<8x64xf32>
    %583 = arith.mulf %580, %562 : vector<8x64xf32>
    %584 = arith.mulf %579, %582 : vector<8x64xf32>
    %585 = arith.addf %583, %584 : vector<8x64xf32>
    %586 = math.tanh %585 : vector<8x64xf32>
    %587 = arith.mulf %581, %586 : vector<8x64xf32>
    %c7_i32_198 = arith.constant 7 : i32
    %c8_i32_199 = arith.constant 8 : i32
    %588 = arith.muli %c7_i32_198, %c8_i32_199 : i32
    %589 = tpu.assume_multiple %588, 8 : i32
    %590 = arith.index_cast %589 : i32 to index
    %c0_200 = arith.constant 0 : index
    %591 = vector.load %arg14[%590, %c0_200] : memref<64x256xf32, #tpu.memory_space<vmem>>, vector<8x256xf32>
    %c0_201 = arith.constant 0 : index
    %c0_202 = arith.constant 0 : index
    %592 = vector.load %arg9[%c0_201, %c0_202] : memref<64x256xf32, #tpu.memory_space<vmem>>, vector<64x256xf32>
    %cst_203 = arith.constant dense<0.000000e+00> : vector<8x256xf32>
    %593 = tpu.matmul %587, %592, %cst_203 {dimension_numbers = #tpu.dot_dimension_numbers<[1], [0], [0], [1], [0, 0, 1, 1], [], []>} : vector<8x64xf32>, vector<64x256xf32>, vector<8x256xf32> -> vector<8x256xf32>
    %594 = arith.addf %591, %593 : vector<8x256xf32>
    %595 = arith.negf %594 : vector<8x256xf32>
    %596 = math.exp %595 : vector<8x256xf32>
    %cst_204 = arith.constant 1.000000e+00 : f32
    %597 = vector.broadcast %cst_204 : f32 to vector<8x256xf32>
    %598 = arith.addf %597, %596 : vector<8x256xf32>
    %599 = arith.divf %597, %598 : vector<8x256xf32>
    %600 = math.tanh %594 : vector<8x256xf32>
    %601 = arith.select %2, %599, %600 : vector<8x256xi1>, vector<8x256xf32>
    %602 = vector.extract_strided_slice %601 {offsets = [0, 0], sizes = [8, 64], strides = [1, 1]} : vector<8x256xf32> to vector<8x64xf32>
    %603 = vector.extract_strided_slice %601 {offsets = [0, 64], sizes = [8, 64], strides = [1, 1]} : vector<8x256xf32> to vector<8x64xf32>
    %604 = vector.extract_strided_slice %601 {offsets = [0, 128], sizes = [8, 64], strides = [1, 1]} : vector<8x256xf32> to vector<8x64xf32>
    %605 = vector.extract_strided_slice %601 {offsets = [0, 192], sizes = [8, 64], strides = [1, 1]} : vector<8x256xf32> to vector<8x64xf32>
    %606 = arith.mulf %603, %585 : vector<8x64xf32>
    %607 = arith.mulf %602, %605 : vector<8x64xf32>
    %608 = arith.addf %606, %607 : vector<8x64xf32>
    %609 = math.tanh %608 : vector<8x64xf32>
    %610 = arith.mulf %604, %609 : vector<8x64xf32>
    %c8_i32_205 = arith.constant 8 : i32
    %c0_206 = arith.constant 0 : index
    %c0_207 = arith.constant 0 : index
    %611 = vector.load %arg11[%c0_206, %c0_207] : memref<1x64xf32, #tpu.memory_space<vmem>>, vector<1x64xf32>
    %612 = vector.broadcast %611 : vector<1x64xf32> to vector<8x64xf32>
    %613 = arith.mulf %610, %612 : vector<8x64xf32>
    %cst_208 = arith.constant dense<0.000000e+00> : vector<8xf32>
    %614 = vector.multi_reduction <add>, %613, %cst_208 [1] : vector<8x64xf32> to vector<8xf32>
    %615 = vector.shape_cast %614 : vector<8xf32> to vector<8x1xf32>
    %c0_209 = arith.constant 0 : index
    %c0_210 = arith.constant 0 : index
    %616 = vector.load %arg12[%c0_209, %c0_210] : memref<1x1xf32, #tpu.memory_space<vmem>>, vector<1x1xf32>
    %617 = vector.broadcast %616 : vector<1x1xf32> to vector<8x1xf32>
    %618 = arith.addf %615, %617 : vector<8x1xf32>
    %c0_211 = arith.constant 0 : index
    %c0_212 = arith.constant 0 : index
    %619 = vector.load %arg13[%c0_211, %c0_212] : memref<8x1xf32, #tpu.memory_space<vmem>>, vector<8x1xf32>
    tpu.vector_store %arg13[%c0_211, %c0_212], %618 {strides = array<i32>} : memref<8x1xf32, #tpu.memory_space<vmem>>, vector<8x1xf32>,
    return
  }
  func.func @transform_0(%arg0: i32) -> (i32, i32) {
    %c0_i32 = arith.constant 0 : i32
    %c0_i32_0 = arith.constant 0 : i32
    %c0_i32_1 = arith.constant 0 : i32
    return %c0_i32, %c0_i32_0 : i32, i32
  }
  func.func @transform_1(%arg0: i32) -> (i32, i32) {
    %c0_i32 = arith.constant 0 : i32
    %c0_i32_0 = arith.constant 0 : i32
    %c0_i32_1 = arith.constant 0 : i32
    return %c0_i32, %c0_i32_0 : i32, i32
  }
  func.func @transform_2(%arg0: i32) -> (i32, i32) {
    %c0_i32 = arith.constant 0 : i32
    %c0_i32_0 = arith.constant 0 : i32
    %c0_i32_1 = arith.constant 0 : i32
    return %c0_i32, %c0_i32_0 : i32, i32
  }
  func.func @transform_3(%arg0: i32) -> (i32, i32) {
    %c0_i32 = arith.constant 0 : i32
    %c0_i32_0 = arith.constant 0 : i32
    %c0_i32_1 = arith.constant 0 : i32
    return %c0_i32, %c0_i32_0 : i32, i32
  }
  func.func @transform_4(%arg0: i32) -> (i32, i32) {
    %c0_i32 = arith.constant 0 : i32
    %c0_i32_0 = arith.constant 0 : i32
    %c0_i32_1 = arith.constant 0 : i32
    return %c0_i32, %c0_i32_0 : i32, i32
  }
  func.func @transform_5(%arg0: i32) -> (i32, i32) {
    %c0_i32 = arith.constant 0 : i32
    %c0_i32_0 = arith.constant 0 : i32
    %c0_i32_1 = arith.constant 0 : i32
    return %c0_i32, %c0_i32_0 : i32, i32
  }
  func.func @transform_6(%arg0: i32) -> (i32, i32) {
    %c0_i32 = arith.constant 0 : i32
    %c0_i32_0 = arith.constant 0 : i32
    %c0_i32_1 = arith.constant 0 : i32
    return %c0_i32, %c0_i32_0 : i32, i32
  }
  func.func @transform_7(%arg0: i32) -> (i32, i32) {
    %c0_i32 = arith.constant 0 : i32
    %c0_i32_0 = arith.constant 0 : i32
    %c0_i32_1 = arith.constant 0 : i32
    return %c0_i32, %c0_i32_0 : i32, i32
  }
  func.func @transform_8(%arg0: i32) -> (i32, i32) {
    %c0_i32 = arith.constant 0 : i32
    %c0_i32_0 = arith.constant 0 : i32
    %c0_i32_1 = arith.constant 0 : i32
    return %c0_i32, %c0_i32_0 : i32, i32
  }
  func.func @transform_9(%arg0: i32) -> (i32, i32) {
    %c0_i32 = arith.constant 0 : i32
    %c0_i32_0 = arith.constant 0 : i32
    %c0_i32_1 = arith.constant 0 : i32
    return %c0_i32, %c0_i32_0 : i32, i32
  }
  func.func @transform_10(%arg0: i32) -> (i32, i32) {
    %c0_i32 = arith.constant 0 : i32
    %c0_i32_0 = arith.constant 0 : i32
    %c0_i32_1 = arith.constant 0 : i32
    return %c0_i32, %c0_i32_0 : i32, i32
  }
  func.func @transform_11(%arg0: i32) -> (i32, i32) {
    %c0_i32 = arith.constant 0 : i32
    %c0_i32_0 = arith.constant 0 : i32
    %c0_i32_1 = arith.constant 0 : i32
    return %c0_i32, %c0_i32_0 : i32, i32
  }
  func.func @transform_12(%arg0: i32) -> (i32, i32) {
    %c0_i32 = arith.constant 0 : i32
    %c0_i32_0 = arith.constant 0 : i32
    %c0_i32_1 = arith.constant 0 : i32
    return %c0_i32, %c0_i32_0 : i32, i32
  }
}

</mosaic_0001>

<bundles_post_ra>
// kernel: rnn_forward.1
= control target key start
LH: loop header
LB: loop body
LE: loop exit
PB: predicated region body
PF: predicated region fallthrough
CT: control target
= control target key end

     0   :  { %s5357_s0 = inlined_call_operand.vmem [shape: f32[64,64], index: 0, kind: input, shape index: {}]   ;;  %s5358_s1 = inlined_call_operand.vmem [shape: f32[64,256], index: 1, kind: input, shape index: {}]   ;;  %s5359_s2 = inlined_call_operand.hbm [shape: f32[64,256], index: 2, kind: input, shape index: {}]   ;;  %s5360_s3 = inlined_call_operand.vmem [shape: f32[1,256], index: 3, kind: input, shape index: {}]   ;;  %s5361_s4 = inlined_call_operand.hbm [shape: f32[64,256], index: 4, kind: input, shape index: {}]   ;;  %s5362_s5 = inlined_call_operand.hbm [shape: f32[64,256], index: 5, kind: input, shape index: {}]   ;;  %s5363_s6 = inlined_call_operand.hbm [shape: f32[1,256], index: 6, kind: input, shape index: {}]   ;;  %s5364_s7 = inlined_call_operand.hbm [shape: f32[64,256], index: 7, kind: input, shape index: {}]   ;;  %s5365_s8 = inlined_call_operand.hbm [shape: f32[64,256], index: 8, kind: input, shape index: {}]   ;;  %s5366_s9 = inlined_call_operand.hbm [shape: f32[1,256], index: 9, kind: input, shape index: {}]   ;;  %s5367_s10 = inlined_call_operand.hbm [shape: f32[1,64], index: 10, kind: input, shape index: {}]   ;;  %s5368_s11 = inlined_call_operand.<no memory space> [shape: f32[1,1], index: 11, kind: input, shape index: {}]   ;;  %s5369_s12 = inlined_call_operand.vmem [shape: f32[8,1], index: 12, kind: output, shape index: {}]  }
   0x1   :  { %v17_v0 = vstv %s5368_s11 }
   0x2   :  { %18 = vst [vmem:[#allocation4] sm:$0x1] %v17_v0 }
   0x3   :  { %19 = vsyncpa [#allocation6], 0 }
   0x4   :  { %20 = vsyncpa [#allocation8], 0 }
   0x5   :  { %21 = vsyncpa [#allocation11], 0 }
   0x6   :  { %22 = vsyncpa [#allocation14], 0 }
   0x7   :  { %23 = vsyncpa [#allocation17], 0  ;;  %s4298_s23 = smov [#allocation7]   ;;  %s4299_s25 = smov [#allocation10]  }
   0x8   :  { %s47_s24 = sshll.u32 %s4298_s23, 4  ;;  %s72_s26 = sshll.u32 %s4299_s25, 4  ;;  %s48_s24 = int_to_ptr.vmem [resolvable:$true] %s47_s24  ;;  %s73_s26 = int_to_ptr.vmem [resolvable:$true] %s72_s26 }
   0x9   :  { %s4136_s27 = scalar_lea.vmem %s48_s24, 2048  ;;  %p4141_p1 = scmp.lt.s32.totalorder %s48_s24, %s48_s24 }
   0xa   :  { %p4137_p0 = scmp.ne.s32.totalorder %s48_s24, %s4136_s27  ;;  %p4142_p2 = scmp.lt.s32.totalorder %s4136_s27, %s4136_s27 }
   0xc   :  { %p4143_p3 = por %p4142_p2, %p4141_p1 }
   0xe   :  { %p4144_p4 = pnand %p4143_p3, %p4137_p0 }
  0x10   :  { %4147 = shalt.err (!%p4144_p4)
}
  0x11   :  { %s4300_s11 = smov 256   ;;  %s4301_s28 = smov 16  }
  0x12   :  { %53 = dma.hbm_to_vmem [thread:$0]  %s5361_s4, 2048, %s48_s24, [#allocation8], %s4300_s11, %s4300_s11, %s4301_s28  }
  0x13   :  { %s4156_s13 = scalar_lea.vmem %s73_s26, 32  ;;  %p4161_p6 = scmp.lt.s32.totalorder %s73_s26, %s73_s26 }
  0x14   :  { %p4157_p5 = scmp.ne.s32.totalorder %s73_s26, %s4156_s13  ;;  %p4162_p7 = scmp.lt.s32.totalorder %s4156_s13, %s4156_s13 }
  0x16   :  { %p4163_p8 = por %p4162_p7, %p4161_p6 }
  0x18   :  { %p4164_p9 = pnand %p4163_p8, %p4157_p5 }
  0x1a   :  { %4167 = shalt.err (!%p4164_p9)
}
  0x1b   :  { %75 = dma.hbm_to_vmem [thread:$0]  %s5363_s6, 32, %s73_s26, [#allocation11]  }
  0x1c   :  { %s4302_s16 = smov [#allocation13]   ;;  %s4303_s18 = smov [#allocation5]  }
  0x1d   :  { %s93_s17 = sshll.u32 %s4302_s16, 4  ;;  %s33_s19 = sshll.u32 %s4303_s18, 4  ;;  %s94_s17 = int_to_ptr.vmem [resolvable:$true] %s93_s17  ;;  %s34_s19 = int_to_ptr.vmem [resolvable:$true] %s33_s19 }
  0x1e   :  { %s4176_s20 = scalar_lea.vmem %s94_s17, 2048  ;;  %p4181_p11 = scmp.lt.s32.totalorder %s94_s17, %s94_s17 }
  0x1f   :  { %p4177_p10 = scmp.ne.s32.totalorder %s94_s17, %s4176_s20  ;;  %p4182_p12 = scmp.lt.s32.totalorder %s4176_s20, %s4176_s20 }
  0x21   :  { %p4183_p13 = por %p4182_p12, %p4181_p11 }
  0x23   :  { %p4184_p0 = pnand %p4183_p13, %p4177_p10 }
  0x25   :  { %4187 = shalt.err (!%p4184_p0)
}
  0x26   :  { %99 = dma.hbm_to_vmem [thread:$0]  %s5365_s8, 2048, %s94_s17, [#allocation14], %s4300_s11, %s4300_s11, %s4301_s28  }
  0x27   :  { %s4196_s6 = scalar_lea.vmem %s34_s19, 2048  ;;  %p4201_p2 = scmp.lt.s32.totalorder %s34_s19, %s34_s19 }
  0x28   :  { %p4197_p1 = scmp.ne.s32.totalorder %s34_s19, %s4196_s6  ;;  %p4202_p3 = scmp.lt.s32.totalorder %s4196_s6, %s4196_s6 }
  0x2a   :  { %p4203_p4 = por %p4202_p3, %p4201_p2 }
  0x2c   :  { %p4204_p5 = pnand %p4203_p4, %p4197_p1 }
  0x2e   :  { %4207 = shalt.err (!%p4204_p5)
}
  0x2f   :  { %39 = dma.hbm_to_vmem [thread:$0]  %s5359_s2, 2048, %s34_s19, [#allocation6], %s4300_s11, %s4300_s11, %s4301_s28  }
  0x30   :  { %s4304_s24 = smov [#allocation9]   ;;  %s4305_s26 = smov [#allocation12]  }
  0x31   :  { %s59_s25 = sshll.u32 %s4304_s24, 4  ;;  %s81_s27 = sshll.u32 %s4305_s26, 4  ;;  %s60_s25 = int_to_ptr.vmem [resolvable:$true] %s59_s25  ;;  %s82_s27 = int_to_ptr.vmem [resolvable:$true] %s81_s27 }
  0x32   :  { %s4216_s8 = scalar_lea.vmem %s60_s25, 2048  ;;  %p4221_p7 = scmp.lt.s32.totalorder %s60_s25, %s60_s25 }
  0x33   :  { %p4217_p6 = scmp.ne.s32.totalorder %s60_s25, %s4216_s8  ;;  %p4222_p8 = scmp.lt.s32.totalorder %s4216_s8, %s4216_s8 }
  0x35   :  { %p4223_p9 = por %p4222_p8, %p4221_p7 }
  0x37   :  { %p4224_p10 = pnand %p4223_p9, %p4217_p6 }
  0x39   :  { %4227 = shalt.err (!%p4224_p10)
}
  0x3a   :  { %65 = dma.hbm_to_vmem [thread:$0]  %s5362_s5, 2048, %s60_s25, [#allocation8], %s4300_s11, %s4300_s11, %s4301_s28  }
  0x3b   :  { %s4236_s2 = scalar_lea.vmem %s82_s27, 2048  ;;  %p4241_p12 = scmp.lt.s32.totalorder %s82_s27, %s82_s27 }
  0x3c   :  { %p4237_p11 = scmp.ne.s32.totalorder %s82_s27, %s4236_s2  ;;  %p4242_p13 = scmp.lt.s32.totalorder %s4236_s2, %s4236_s2 }
  0x3e   :  { %p4243_p0 = por %p4242_p13, %p4241_p12 }
  0x40   :  { %p4244_p1 = pnand %p4243_p0, %p4237_p11 }
  0x42   :  { %4247 = shalt.err (!%p4244_p1)
}
  0x43   :  { %87 = dma.hbm_to_vmem [thread:$0]  %s5364_s7, 2048, %s82_s27, [#allocation11], %s4300_s11, %s4300_s11, %s4301_s28  }
  0x44   :  { %s4306_s15 = smov [#allocation15]   ;;  %s4307_s17 = smov [#allocation16]  }
  0x45   :  { %s106_s16 = sshll.u32 %s4306_s15, 4  ;;  %s116_s18 = sshll.u32 %s4307_s17, 4  ;;  %s107_s16 = int_to_ptr.vmem [resolvable:$true] %s106_s16  ;;  %s117_s18 = int_to_ptr.vmem [resolvable:$true] %s116_s18 }
  0x46   :  { %s4256_s5 = scalar_lea.vmem %s107_s16, 32  ;;  %p4261_p3 = scmp.lt.s32.totalorder %s107_s16, %s107_s16 }
  0x47   :  { %p4257_p2 = scmp.ne.s32.totalorder %s107_s16, %s4256_s5  ;;  %p4262_p4 = scmp.lt.s32.totalorder %s4256_s5, %s4256_s5 }
  0x49   :  { %p4263_p5 = por %p4262_p4, %p4261_p3 }
  0x4b   :  { %p4264_p6 = pnand %p4263_p5, %p4257_p2 }
  0x4d   :  { %4267 = shalt.err (!%p4264_p6)
}
  0x4e   :  { %109 = dma.hbm_to_vmem [thread:$0]  %s5366_s9, 32, %s107_s16, [#allocation14]  }
  0x4f   :  { %s4276_s4 = scalar_lea.vmem %s117_s18, 16  ;;  %s4280_s7 = scalar_lea.vmem %s117_s18, 32 }
  0x50   :  { %p4277_p7 = scmp.ne.s32.totalorder %s117_s18, %s4276_s4  ;;  %p4281_p8 = scmp.lt.s32.totalorder %s117_s18, %s117_s18 }
  0x51   :  { %p4282_p9 = scmp.lt.s32.totalorder %s4280_s7, %s4276_s4 }
  0x53   :  { %p4283_p10 = por %p4282_p9, %p4281_p8 }
  0x55   :  { %p4284_p11 = pnand %p4283_p10, %p4277_p7 }
  0x57   :  { %4287 = shalt.err (!%p4284_p11)
}
  0x58   :  { %119 = dma.hbm_to_vmem [thread:$0]  %s5367_s10, 16, %s117_s18, [#allocation17]  }
  0x59   :  { %4288 = dma.done.wait [#allocation6], 2048  }
  0x5a   :  { %4289 = vsyncadd [#allocation6], 4294965248 }
  0x5b   :  { %4290 = dma.done.wait [#allocation8], 4096  }
  0x5c   :  { %4291 = vsyncadd [#allocation8], 4294963200 }
  0x5d   :  { %4292 = dma.done.wait [#allocation11], 2080  }
  0x5e   :  { %4293 = vsyncadd [#allocation11], 4294965216 }
  0x5f   :  { %4294 = dma.done.wait [#allocation14], 2080  }
  0x60   :  { %4295 = vsyncadd [#allocation14], 4294965216 }
  0x61   :  { %4296 = dma.done.wait [#allocation17], 16  }
  0x62   :  { %4297 = vsyncadd [#allocation17], 4294967280  ;;  %v4308_v1 = vmov 0.0   ;;  %v174_v2 = vld [vmem:[%s5358_s1 + $0x78] sm:$0xff]  ;;  %v173_v4 = vld [vmem:[%s5358_s1 + $0x70] sm:$0xff]  ;;  %vm187_vm0 = vcmask 523264   ;;  %v146_v35 = vlaneseq }
  0x63   :  { %276 = vmatprep.mubr.f32.mxu0 %v4308_v1  ;;  %429 = vmatprep.mubr.f32.mxu1 %v4308_v1  ;;  %v4422_v3 = vld [vmem:[#allocation5 + $0x78] sm:$0xff]  ;;  %v4428_v5 = vld [vmem:[#allocation5 + $0x70] sm:$0xff]  ;;  %v172_v6 = vld [vmem:[%s5358_s1 + $0x68] sm:$0xff]  ;;  %vm3715_vm2 = vcmask 7168  }
  0x64   :  { %228 = vmatprep.subr.mxu0 %v174_v2  ;;  %381 = vmatprep.subr.mxu1 %v4422_v3  ;;  %v4433_v7 = vld [vmem:[#allocation5 + $0x68] sm:$0xff]  ;;  %v171_v8 = vld [vmem:[%s5358_s1 + $0x60] sm:$0xff]  ;;  %v170_v10 = vld [vmem:[%s5358_s1 + $0x58] sm:$0xff]  ;;  %v178_v36 = vshrl.u32 %v146_v35, 7  ;;  %v147_v53 = vand.u32 127, %v146_v35 }
  0x65   :  { %229 = vmatpush1.msra.mxu0 %v173_v4  ;;  %382 = vmatpush1.msra.mxu1 %v4428_v5  ;;  %v4439_v9 = vld [vmem:[#allocation5 + $0x60] sm:$0xff]  ;;  %v4445_v11 = vld [vmem:[#allocation5 + $0x58] sm:$0xff]  ;;  %v169_v12 = vld [vmem:[%s5358_s1 + $0x50] sm:$0xff] }
  0x66   :  { %230 = vmatprep.subr.mxu0 %v172_v6  ;;  %383 = vmatprep.subr.mxu1 %v4433_v7  ;;  %v4450_v13 = vld [vmem:[#allocation5 + $0x50] sm:$0xff]  ;;  %v168_v14 = vld [vmem:[%s5358_s1 + $0x48] sm:$0xff]  ;;  %v167_v16 = vld [vmem:[%s5358_s1 + $0x40] sm:$0xff]  ;;  %v4556_v37 = vsub.s32 0, %v178_v36  ;;  %v4561_v39 = vsub.s32 1, %v178_v36  ;;  %v4571_v54 = vadd.s32 128, %v147_v53 }
  0x67   :  { %231 = vmatpush1.msra.mxu0 %v171_v8  ;;  %384 = vmatpush1.msra.mxu1 %v4439_v9  ;;  %v4456_v15 = vld [vmem:[#allocation5 + $0x48] sm:$0xff]  ;;  %v4462_v17 = vld [vmem:[#allocation5 + $0x40] sm:$0xff]  ;;  %v166_v18 = vld [vmem:[%s5358_s1 + $0x38] sm:$0xff] }
  0x68   :  { %232 = vmatprep.subr.mxu0 %v170_v10  ;;  %385 = vmatprep.subr.mxu1 %v4445_v11  ;;  %v4468_v19 = vld [vmem:[#allocation5 + $0x38] sm:$0xff]  ;;  %v165_v20 = vld [vmem:[%s5358_s1 + $0x30] sm:$0xff]  ;;  %v164_v22 = vld [vmem:[%s5358_s1 + $0x28] sm:$0xff]  ;;  %vm150_vm1 = vcmp.lt.s32.totalorder %v4571_v54, 192 }
  0x69   :  { %233 = vmatpush1.msra.mxu0 %v169_v12  ;;  %386 = vmatpush1.msra.mxu1 %v4450_v13  ;;  %v4474_v21 = vld [vmem:[#allocation5 + $0x30] sm:$0xff]  ;;  %v4480_v23 = vld [vmem:[#allocation5 + $0x28] sm:$0xff]  ;;  %v163_v24 = vld [vmem:[%s5358_s1 + $0x20] sm:$0xff] }
  0x6a   :  { %234 = vmatprep.subr.mxu0 %v168_v14  ;;  %387 = vmatprep.subr.mxu1 %v4456_v15  ;;  %v4486_v25 = vld [vmem:[#allocation5 + $0x20] sm:$0xff]  ;;  %v162_v26 = vld [vmem:[%s5358_s1 + $0x18] sm:$0xff]  ;;  %v161_v28 = vld [vmem:[%s5358_s1 + $0x10] sm:$0xff] }
  0x6b   :  { %235 = vmatpush1.msra.mxu0 %v167_v16  ;;  %388 = vmatpush1.msra.mxu1 %v4462_v17  ;;  %v4492_v27 = vld [vmem:[#allocation5 + $0x18] sm:$0xff]  ;;  %v4498_v29 = vld [vmem:[#allocation5 + $0x10] sm:$0xff]  ;;  %v160_v30 = vld [vmem:[%s5358_s1 + $0x8] sm:$0xff] }
  0x6c   :  { %236 = vmatprep.subr.mxu0 %v166_v18  ;;  %389 = vmatprep.subr.mxu1 %v4468_v19  ;;  %v4504_v31 = vld [vmem:[#allocation5 + $0x8] sm:$0xff]  ;;  %v159_v32 = vld [vmem:[%s5358_s1] sm:$0xff]  ;;  %v158_v53 = vld [vmem:[%s5357_s0 + $0x38] sm:$0xff] }
  0x6d   :  { %237 = vmatpush1.msra.mxu0 %v165_v20  ;;  %390 = vmatpush1.msra.mxu1 %v4474_v21  ;;  %v4510_v33 = vld [vmem:[#allocation5] sm:$0xff] }
  0x6e   :  { %238 = vmatprep.subr.mxu0 %v164_v22  ;;  %391 = vmatprep.subr.mxu1 %v4480_v23  ;;  %v151_v34 = vld [vmem:[%s5357_s0] sm:$0xff]  ;;  %v152_v0 = vld [vmem:[%s5357_s0 + $0x8] sm:$0xff] }
  0x6f   :  { %239 = vmatpush1.msra.mxu0 %v163_v24  ;;  %392 = vmatpush1.msra.mxu1 %v4486_v25  ;;  %v175_v38 = vld [vmem:[%s5360_s3] sm:$0x3]  ;;  %s4309_s3 = smov 64  }
  0x70   :  { %240 = vmatprep.subr.mxu0 %v162_v26  ;;  %393 = vmatprep.subr.mxu1 %v4492_v27  ;;  %v4564_v40 = vrot.slane %v175_v38, %v4556_v37  ;;  %v4567_v41 = vrot.slane %v175_v38, %v4561_v39 }
  0x71   :  { %241 = vmatpush1.msra.mxu0 %v161_v28  ;;  %394 = vmatpush1.msra.mxu1 %v4498_v29 }
  0x72   :  { %242 = vmatprep.subr.mxu0 %v160_v30  ;;  %395 = vmatprep.subr.mxu1 %v4504_v31 }
  0x73   :  { %243 = vmatpush1.msra.mxu0 %v159_v32  ;;  %396 = vmatpush1.msra.mxu1 %v4510_v33 }
  0x74   :  { %3733 = vmatmul.mubr.msk.f32.vlgmr.msra.gmra.mxu0 %vm187_vm0, %v151_v34  ;;  %430 = vmatmul.mubr.f32.vlgmr.msra.gmra.mxu1 %v4308_v1 }
  0x75   :  { %512 = vmatprep.subr.mxu1 %v4422_v3  ;;  %282 = vmatprep.mubr.f32.mxu0 %v4308_v1 }
  0x76   :  { %513 = vmatpush1.msra.mxu1 %v4428_v5  ;;  %560 = vmatprep.mubr.f32.mxu1 %v4308_v1 }
  0x77   :  { %514 = vmatprep.subr.mxu1 %v4433_v7  ;;  %644 = vmatprep.subr.mxu0 %v4422_v3 }
  0x78   :  { %515 = vmatpush1.msra.mxu1 %v4439_v9  ;;  %645 = vmatpush1.msra.mxu0 %v4428_v5 }
  0x79   :  { %516 = vmatprep.subr.mxu1 %v4445_v11  ;;  %646 = vmatprep.subr.mxu0 %v4433_v7 }
  0x7a   :  { %517 = vmatpush1.msra.mxu1 %v4450_v13  ;;  %647 = vmatpush1.msra.mxu0 %v4439_v9 }
  0x7b   :  { %518 = vmatprep.subr.mxu1 %v4456_v15  ;;  %648 = vmatprep.subr.mxu0 %v4445_v11 }
  0x7c   :  { %519 = vmatpush1.msra.mxu1 %v4462_v17  ;;  %649 = vmatpush1.msra.mxu0 %v4450_v13 }
  0x7d   :  { %520 = vmatprep.subr.mxu1 %v4468_v19  ;;  %650 = vmatprep.subr.mxu0 %v4456_v15 }
  0x7e   :  { %521 = vmatpush1.msra.mxu1 %v4474_v21  ;;  %651 = vmatpush1.msra.mxu0 %v4462_v17 }
  0x7f   :  { %522 = vmatprep.subr.mxu1 %v4480_v23  ;;  %652 = vmatprep.subr.mxu0 %v4468_v19 }
  0x80   :  { %523 = vmatpush1.msra.mxu1 %v4486_v25  ;;  %653 = vmatpush1.msra.mxu0 %v4474_v21 }
  0x81   :  { %524 = vmatprep.subr.mxu1 %v4492_v27  ;;  %654 = vmatprep.subr.mxu0 %v4480_v23 }
  0x82   :  { %525 = vmatpush1.msra.mxu1 %v4498_v29  ;;  %655 = vmatpush1.msra.mxu0 %v4486_v25 }
  0x83   :  { %526 = vmatprep.subr.mxu1 %v4504_v31  ;;  %656 = vmatprep.subr.mxu0 %v4492_v27 }
  0x84   :  { %527 = vmatpush1.msra.mxu1 %v4510_v33  ;;  %657 = vmatpush1.msra.mxu0 %v4498_v29 }
  0x85   :  { %658 = vmatprep.subr.mxu0 %v4504_v31  ;;  %776 = vmatprep.subr.mxu1 %v4422_v3 }
  0x86   :  { %659 = vmatpush1.msra.mxu0 %v4510_v33 }
  0x87   :  { %908 = vmatprep.subr.mxu0 %v4422_v3  ;;  %3734 = vmatmul.mubr.msk.f32.gmra.mxu0 %vm187_vm0, %v152_v0 }
  0x88   :  { %288 = vmatprep.mubr.f32.mxu0 %v4308_v1 }
 0x134   :  { %v278_v42 = vpop.f32.mrf.mxu0  ;;  %v431_v43 = vpop.f32.mrf.mxu1 }
 0x135   :  { %v279_v44 = vadd.f32 %v278_v42, %v4564_v40 }
 0x136   :  { %v280_v45 = vpop.f32.mrf.mxu0  ;;  %v433_v48 = vpop.f32.mrf.mxu1 }
 0x137   :  { %v436_v46 = vadd.f32 %v431_v43, %v279_v44  ;;  %v281_v47 = vadd.f32 %v280_v45, %v4567_v41 }
 0x139   :  { %v437_v49 = vadd.f32 %v433_v48, %v281_v47  ;;  %v3741_v58 = vmul.f32 -1.442695, %v436_v46  ;;  %v153_v48 = vld [vmem:[%s5357_s0 + $0x10] sm:$0xff] }
 0x13a   :  { %3735 = vmatmul.mubr.msk.f32.gmra.mxu0 %vm187_vm0, %v153_v48 }
 0x13b   :  { %v3742_v50 = vmul.f32 -1.442695, %v437_v49  ;;  %294 = vmatprep.mubr.f32.mxu0 %v4308_v1 }
 0x13d   :  { %3840 = vpow2.f32 %v3742_v50  ;;  %v155_v50 = vld [vmem:[%s5357_s0 + $0x20] sm:$0xff] }
 0x13e   :  { %3842 = vtanh.f32 %v437_v49  ;;  %v154_v49 = vld [vmem:[%s5357_s0 + $0x18] sm:$0xff] }
 0x13f   :  { %3736 = vmatmul.mubr.msk.f32.gmra.mxu0 %vm187_vm0, %v154_v49 }
 0x140   :  { %300 = vmatprep.mubr.f32.mxu0 %v4308_v1 }
 0x143   :  { %3737 = vmatmul.mubr.msk.f32.gmra.mxu0 %vm187_vm0, %v155_v50 }
 0x144   :  { %306 = vmatprep.mubr.f32.mxu0 %v4308_v1 }
 0x147   :  { %v284_v14 = vpop.f32.mrf.mxu0 }
 0x148   :  { %v285_v16 = vadd.f32 %v284_v14, %v4564_v40 }
 0x149   :  { %v286_v18 = vpop.f32.mrf.mxu0 }
 0x14a   :  { %v3841_v51 = vpop.eup %3840  ;;  %v287_v22 = vadd.f32 %v286_v18, %v4567_v41 }
 0x14b   :  { %v445_v52 = vadd.f32 1.0, %v3841_v51  ;;  %v3843_v55 = vpop.eup %3842  ;;  %v156_v51 = vld [vmem:[%s5357_s0 + $0x28] sm:$0xff] }
 0x14c   :  { %3738 = vmatmul.mubr.msk.f32.gmra.mxu0 %vm187_vm0, %v156_v51 }
 0x14d   :  { %3844 = vrcp.f32 %v445_v52  ;;  %312 = vmatprep.mubr.f32.mxu0 %v4308_v1  ;;  %v157_v52 = vld [vmem:[%s5357_s0 + $0x30] sm:$0xff] }
 0x14e   :  { %3846 = vpow2.f32 %v3741_v58 }
 0x150   :  { %3739 = vmatmul.mubr.msk.f32.gmra.mxu0 %vm187_vm0, %v157_v52 }
 0x151   :  { %318 = vmatprep.mubr.f32.mxu0 %v4308_v1 }
 0x154   :  { %3740 = vmatmul.mubr.msk.f32.gmra.mxu0 %vm187_vm0, %v158_v53 }
 0x155   :  { %692 = vmatprep.mubr.f32.mxu0 %v4308_v1 }
 0x15a   :  { %v3845_v56 = vpop.eup %3844 }
 0x15b   :  { %v453_v57 = vsel %vm150_vm1, %v3845_v56, %v3843_v55  ;;  %v3847_v59 = vpop.eup %3846 }
 0x15c   :  { %456 = vrot.lane.b32.xlu0 %v453_v57, %s4309_s3  ;;  %v444_v60 = vadd.f32 1.0, %v3847_v59 }
 0x15e   :  { %3848 = vrcp.f32 %v444_v60 }
 0x16b   :  { %v3849_v61 = vpop.eup %3848 }
 0x16c   :  { %v454_v2 = vmul.f32 0.0, %v3849_v61 }
 0x1ce   :  { %v457_v62 = vpop.permute.xlu0 %456 }
 0x1cf   :  { %v459_v63 = vmul.f32 %v3849_v61, %v457_v62 }
 0x1d1   :  { %461 = vrot.lane.b32.xlu0 %v459_v63, %s4309_s3 }
 0x1fa   :  { %v290_v61 = vpop.f32.mrf.mxu0 }
 0x1fc   :  { %v292_v62 = vpop.f32.mrf.mxu0 }
 0x1ff   :  { %v296_v63 = vpop.f32.mrf.mxu0 }
 0x200   :  { %v297_v53 = vadd.f32 %v296_v63, %v4564_v40 }
 0x201   :  { %v298_v0 = vpop.f32.mrf.mxu0 }
 0x243   :  { %v462_v4 = vpop.permute.xlu0 %461 }
 0x244   :  { %v4583_v6 = vadd.f32 %v462_v4, %v454_v2  ;;  %v4663_v2 = vpop.f32.mrf.mxu0 }
 0x246   :  { %3850 = vtanh.f32 %v4583_v6  ;;  %v4665_v4 = vpop.f32.mrf.mxu0 }
 0x253   :  { %v3851_v8 = vpop.eup %3850 }
 0x254   :  { %467 = vrot.lane.b32.xlu1 %v3851_v8, %s4309_s3 }
 0x2c6   :  { %v468_v10 = vpop.permute.xlu1 %467 }
 0x2c7   :  { %v470_v12 = vmul.f32 %v468_v10, %v453_v57 }
 0x2c9   :  { %471 = vst.msk [vmem:[#allocation3] sm:$0xff] %vm187_vm0, %v470_v12  ;;  %3743 = vmatmul.mubr.msk.f32.vlgmr.msra.gmra.mxu1 %vm187_vm0, %v470_v12 }
 0x2ca   :  { %777 = vmatpush1.msra.mxu1 %v4428_v5  ;;  %824 = vmatprep.mubr.f32.mxu1 %v4308_v1 }
 0x2cb   :  { %778 = vmatprep.subr.mxu1 %v4433_v7 }
 0x2cc   :  { %779 = vmatpush1.msra.mxu1 %v4439_v9 }
 0x2cd   :  { %780 = vmatprep.subr.mxu1 %v4445_v11 }
 0x2ce   :  { %781 = vmatpush1.msra.mxu1 %v4450_v13 }
 0x2cf   :  { %782 = vmatprep.subr.mxu1 %v4456_v15 }
 0x2d0   :  { %783 = vmatpush1.msra.mxu1 %v4462_v17 }
 0x2d1   :  { %784 = vmatprep.subr.mxu1 %v4468_v19 }
 0x2d2   :  { %785 = vmatpush1.msra.mxu1 %v4474_v21 }
 0x2d3   :  { %786 = vmatprep.subr.mxu1 %v4480_v23 }
 0x2d4   :  { %787 = vmatpush1.msra.mxu1 %v4486_v25 }
 0x2d5   :  { %788 = vmatprep.subr.mxu1 %v4492_v27 }
 0x2d6   :  { %789 = vmatpush1.msra.mxu1 %v4498_v29 }
 0x2d7   :  { %790 = vmatprep.subr.mxu1 %v4504_v31 }
 0x2d8   :  { %791 = vmatpush1.msra.mxu1 %v4510_v33 }
 0x2d9   :  { %1040 = vmatprep.subr.mxu1 %v4422_v3 }
 0x389   :  { %v562_v20 = vpop.f32.mrf.mxu1 }
 0x38a   :  { %v567_v24 = vadd.f32 %v562_v20, %v285_v16  ;;  %v293_v20 = vadd.f32 %v292_v62, %v4567_v41 }
 0x38b   :  { %v564_v26 = vpop.f32.mrf.mxu1 }
 0x38c   :  { %v568_v28 = vadd.f32 %v564_v26, %v287_v22  ;;  %v3744_v42 = vmul.f32 -1.442695, %v567_v24 }
 0x38e   :  { %v3745_v30 = vmul.f32 -1.442695, %v568_v28 }
 0x390   :  { %3852 = vpow2.f32 %v3745_v30 }
 0x391   :  { %3854 = vtanh.f32 %v568_v28 }
 0x39d   :  { %v3853_v32 = vpop.eup %3852 }
 0x39e   :  { %v576_v34 = vadd.f32 1.0, %v3853_v32  ;;  %v3855_v35 = vpop.eup %3854 }
 0x3a0   :  { %3856 = vrcp.f32 %v576_v34 }
 0x3a1   :  { %3858 = vpow2.f32 %v3744_v42 }
 0x3ad   :  { %v3857_v36 = vpop.eup %3856 }
 0x3ae   :  { %v584_v38 = vsel %vm150_vm1, %v3857_v36, %v3855_v35  ;;  %v3859_v43 = vpop.eup %3858 }
 0x3af   :  { %587 = vrot.lane.b32.xlu1 %v584_v38, %s4309_s3  ;;  %v575_v44 = vadd.f32 1.0, %v3859_v43 }
 0x3b1   :  { %3860 = vrcp.f32 %v575_v44 }
 0x3be   :  { %v3861_v45 = vpop.eup %3860 }
 0x3bf   :  { %v585_v55 = vmul.f32 %v3861_v45, %v4583_v6  ;;  %v4667_v6 = vpop.f32.mrf.mxu0 }
 0x3c1   :  { %v4669_v8 = vpop.f32.mrf.mxu0 }
 0x3c3   :  { %v4671_v10 = vpop.f32.mrf.mxu0 }
 0x3c5   :  { %v4673_v12 = vpop.f32.mrf.mxu0 }
 0x3c7   :  { %v4675_v14 = vpop.f32.mrf.mxu0 }
 0x3c9   :  { %v4677_v16 = vpop.f32.mrf.mxu0 }
 0x421   :  { %v588_v46 = vpop.permute.xlu1 %587 }
 0x422   :  { %v590_v47 = vmul.f32 %v3861_v45, %v588_v46 }
 0x424   :  { %592 = vrot.lane.b32.xlu0 %v590_v47, %s4309_s3 }
 0x496   :  { %v593_v56 = vpop.permute.xlu0 %592 }
 0x497   :  { %v595_v57 = vadd.f32 %v593_v56, %v585_v55  ;;  %v299_v56 = vadd.f32 %v298_v0, %v4567_v41 }
 0x499   :  { %3862 = vtanh.f32 %v595_v57 }
 0x4a6   :  { %v3863_v58 = vpop.eup %3862 }
 0x4a7   :  { %598 = vrot.lane.b32.xlu1 %v3863_v58, %s4309_s3 }
 0x519   :  { %v599_v59 = vpop.permute.xlu1 %598 }
 0x51a   :  { %v601_v60 = vmul.f32 %v599_v59, %v584_v38 }
 0x51c   :  { %603 = vst.msk [vmem:[#allocation3 + $0x8] sm:$0xff] %vm187_vm0, %v601_v60  ;;  %3746 = vmatmul.mubr.msk.f32.vlgmr.msra.gmra.mxu0 %vm187_vm0, %v601_v60 }
 0x51d   :  { %909 = vmatpush1.msra.mxu0 %v4428_v5  ;;  %956 = vmatprep.mubr.f32.mxu0 %v4308_v1 }
 0x51e   :  { %910 = vmatprep.subr.mxu0 %v4433_v7 }
 0x51f   :  { %911 = vmatpush1.msra.mxu0 %v4439_v9 }
 0x520   :  { %912 = vmatprep.subr.mxu0 %v4445_v11 }
 0x521   :  { %913 = vmatpush1.msra.mxu0 %v4450_v13 }
 0x522   :  { %914 = vmatprep.subr.mxu0 %v4456_v15 }
 0x523   :  { %915 = vmatpush1.msra.mxu0 %v4462_v17 }
 0x524   :  { %916 = vmatprep.subr.mxu0 %v4468_v19 }
 0x525   :  { %917 = vmatpush1.msra.mxu0 %v4474_v21 }
 0x526   :  { %918 = vmatprep.subr.mxu0 %v4480_v23 }
 0x527   :  { %919 = vmatpush1.msra.mxu0 %v4486_v25 }
 0x528   :  { %920 = vmatprep.subr.mxu0 %v4492_v27 }
 0x529   :  { %921 = vmatpush1.msra.mxu0 %v4498_v29 }
 0x52a   :  { %922 = vmatprep.subr.mxu0 %v4504_v31 }
 0x52b   :  { %923 = vmatpush1.msra.mxu0 %v4510_v33 }
 0x52c   :  { %1172 = vmatprep.subr.mxu0 %v4422_v3  ;;  %v291_v3 = vadd.f32 %v290_v61, %v4564_v40 }
 0x5dc   :  { %v694_v18 = vpop.f32.mrf.mxu0 }
 0x5dd   :  { %v699_v22 = vadd.f32 %v694_v18, %v291_v3 }
 0x5de   :  { %v696_v24 = vpop.f32.mrf.mxu0 }
 0x5df   :  { %v700_v26 = vadd.f32 %v696_v24, %v293_v20  ;;  %v3747_v38 = vmul.f32 -1.442695, %v699_v22 }
 0x5e1   :  { %v3748_v28 = vmul.f32 -1.442695, %v700_v26 }
 0x5e3   :  { %3864 = vpow2.f32 %v3748_v28 }
 0x5e4   :  { %3866 = vtanh.f32 %v700_v26 }
 0x5f0   :  { %v3865_v30 = vpop.eup %3864 }
 0x5f1   :  { %v708_v32 = vadd.f32 1.0, %v3865_v30  ;;  %v3867_v34 = vpop.eup %3866 }
 0x5f3   :  { %3868 = vrcp.f32 %v708_v32 }
 0x5f4   :  { %3870 = vpow2.f32 %v3747_v38 }
 0x600   :  { %v3869_v35 = vpop.eup %3868 }
 0x601   :  { %v716_v36 = vsel %vm150_vm1, %v3869_v35, %v3867_v34  ;;  %v3871_v42 = vpop.eup %3870 }
 0x602   :  { %719 = vrot.lane.b32.xlu0 %v716_v36, %s4309_s3  ;;  %v707_v43 = vadd.f32 1.0, %v3871_v42 }
 0x604   :  { %3872 = vrcp.f32 %v707_v43 }
 0x611   :  { %v3873_v44 = vpop.eup %3872 }
 0x612   :  { %v717_v47 = vmul.f32 %v3873_v44, %v595_v57 }
 0x674   :  { %v720_v45 = vpop.permute.xlu0 %719 }
 0x675   :  { %v722_v46 = vmul.f32 %v3873_v44, %v720_v45 }
 0x677   :  { %724 = vrot.lane.b32.xlu1 %v722_v46, %s4309_s3 }
 0x6e9   :  { %v725_v48 = vpop.permute.xlu1 %724 }
 0x6ea   :  { %v727_v49 = vadd.f32 %v725_v48, %v717_v47 }
 0x6ec   :  { %3874 = vtanh.f32 %v727_v49 }
 0x6f9   :  { %v3875_v50 = vpop.eup %3874 }
 0x6fa   :  { %730 = vrot.lane.b32.xlu0 %v3875_v50, %s4309_s3 }
 0x76c   :  { %v731_v51 = vpop.permute.xlu0 %730 }
 0x76d   :  { %v733_v52 = vmul.f32 %v731_v51, %v716_v36  ;;  %v311_v51 = vadd.f32 %v4669_v8, %v4567_v41 }
 0x76f   :  { %735 = vst.msk [vmem:[#allocation3 + $0x10] sm:$0xff] %vm187_vm0, %v733_v52  ;;  %3749 = vmatmul.mubr.msk.f32.vlgmr.msra.gmra.mxu1 %vm187_vm0, %v733_v52 }
 0x770   :  { %1041 = vmatpush1.msra.mxu1 %v4428_v5  ;;  %1088 = vmatprep.mubr.f32.mxu1 %v4308_v1 }
 0x771   :  { %1042 = vmatprep.subr.mxu1 %v4433_v7 }
 0x772   :  { %1043 = vmatpush1.msra.mxu1 %v4439_v9 }
 0x773   :  { %1044 = vmatprep.subr.mxu1 %v4445_v11 }
 0x774   :  { %1045 = vmatpush1.msra.mxu1 %v4450_v13 }
 0x775   :  { %1046 = vmatprep.subr.mxu1 %v4456_v15 }
 0x776   :  { %1047 = vmatpush1.msra.mxu1 %v4462_v17 }
 0x777   :  { %1048 = vmatprep.subr.mxu1 %v4468_v19 }
 0x778   :  { %1049 = vmatpush1.msra.mxu1 %v4474_v21 }
 0x779   :  { %1050 = vmatprep.subr.mxu1 %v4480_v23 }
 0x77a   :  { %1051 = vmatpush1.msra.mxu1 %v4486_v25 }
 0x77b   :  { %1052 = vmatprep.subr.mxu1 %v4492_v27 }
 0x77c   :  { %1053 = vmatpush1.msra.mxu1 %v4498_v29 }
 0x77d   :  { %1054 = vmatprep.subr.mxu1 %v4504_v31 }
 0x77e   :  { %1055 = vmatpush1.msra.mxu1 %v4510_v33 }
 0x82f   :  { %v826_v55 = vpop.f32.mrf.mxu1 }
 0x830   :  { %v831_v57 = vadd.f32 %v826_v55, %v297_v53 }
 0x831   :  { %v828_v58 = vpop.f32.mrf.mxu1 }
 0x832   :  { %v832_v59 = vadd.f32 %v828_v58, %v299_v56  ;;  %v3750_v63 = vmul.f32 -1.442695, %v831_v57 }
 0x834   :  { %v3751_v60 = vmul.f32 -1.442695, %v832_v59 }
 0x836   :  { %3876 = vpow2.f32 %v3751_v60 }
 0x837   :  { %3878 = vtanh.f32 %v832_v59 }
 0x843   :  { %v3877_v61 = vpop.eup %3876 }
 0x844   :  { %v840_v62 = vadd.f32 1.0, %v3877_v61  ;;  %v3879_v3 = vpop.eup %3878 }
 0x846   :  { %3880 = vrcp.f32 %v840_v62 }
 0x847   :  { %3882 = vpow2.f32 %v3750_v63 }
 0x853   :  { %v3881_v18 = vpop.eup %3880 }
 0x854   :  { %v848_v20 = vsel %vm150_vm1, %v3881_v18, %v3879_v3  ;;  %v3883_v22 = vpop.eup %3882 }
 0x855   :  { %851 = vrot.lane.b32.xlu1 %v848_v20, %s4309_s3  ;;  %v839_v0 = vadd.f32 1.0, %v3883_v22 }
 0x857   :  { %3884 = vrcp.f32 %v839_v0 }
 0x864   :  { %v3885_v24 = vpop.eup %3884 }
 0x865   :  { %v849_v30 = vmul.f32 %v3885_v24, %v727_v49  ;;  %v309_v49 = vadd.f32 %v4667_v6, %v4564_v40 }
 0x8c7   :  { %v852_v26 = vpop.permute.xlu1 %851 }
 0x8c8   :  { %v854_v28 = vmul.f32 %v3885_v24, %v852_v26  ;;  %v1419_v24 = vld [vmem:[#allocation7 + $0x78] sm:$0xff] }
 0x8ca   :  { %856 = vrot.lane.b32.xlu0 %v854_v28, %s4309_s3 }
 0x93c   :  { %v857_v32 = vpop.permute.xlu0 %856 }
 0x93d   :  { %v859_v34 = vadd.f32 %v857_v32, %v849_v30  ;;  %v1418_v32 = vld [vmem:[#allocation7 + $0x70] sm:$0xff] }
 0x93f   :  { %3886 = vtanh.f32 %v859_v34 }
 0x94c   :  { %v3887_v35 = vpop.eup %3886 }
 0x94d   :  { %862 = vrot.lane.b32.xlu1 %v3887_v35, %s4309_s3  ;;  %v1416_v35 = vld [vmem:[#allocation7 + $0x60] sm:$0xff] }
 0x9bf   :  { %v863_v36 = vpop.permute.xlu1 %862 }
 0x9c0   :  { %v865_v38 = vmul.f32 %v863_v36, %v848_v20  ;;  %v1415_v36 = vld [vmem:[#allocation7 + $0x58] sm:$0xff] }
 0x9c2   :  { %867 = vst.msk [vmem:[#allocation3 + $0x18] sm:$0xff] %vm187_vm0, %v865_v38  ;;  %3752 = vmatmul.mubr.msk.f32.vlgmr.msra.gmra.mxu0 %vm187_vm0, %v865_v38  ;;  %v1414_v38 = vld [vmem:[#allocation7 + $0x50] sm:$0xff] }
 0x9c3   :  { %1173 = vmatpush1.msra.mxu0 %v4428_v5  ;;  %1220 = vmatprep.mubr.f32.mxu0 %v4308_v1  ;;  %v303_v5 = vadd.f32 %v4663_v2, %v4564_v40 }
 0x9c4   :  { %1174 = vmatprep.subr.mxu0 %v4433_v7 }
 0x9c5   :  { %1175 = vmatpush1.msra.mxu0 %v4439_v9  ;;  %v305_v9 = vadd.f32 %v4665_v4, %v4567_v41 }
 0x9c6   :  { %1176 = vmatprep.subr.mxu0 %v4445_v11 }
 0x9c7   :  { %1177 = vmatpush1.msra.mxu0 %v4450_v13 }
 0x9c8   :  { %1178 = vmatprep.subr.mxu0 %v4456_v15 }
 0x9c9   :  { %1179 = vmatpush1.msra.mxu0 %v4462_v17 }
 0x9ca   :  { %1180 = vmatprep.subr.mxu0 %v4468_v19 }
 0x9cb   :  { %1181 = vmatpush1.msra.mxu0 %v4474_v21 }
 0x9cc   :  { %1182 = vmatprep.subr.mxu0 %v4480_v23 }
 0x9cd   :  { %1183 = vmatpush1.msra.mxu0 %v4486_v25 }
 0x9ce   :  { %1184 = vmatprep.subr.mxu0 %v4492_v27 }
 0x9cf   :  { %1185 = vmatpush1.msra.mxu0 %v4498_v29 }
 0x9d0   :  { %1186 = vmatprep.subr.mxu0 %v4504_v31 }
 0x9d1   :  { %1187 = vmatpush1.msra.mxu0 %v4510_v33 }
 0x9d2   :  { %1472 = vmatprep.subr.mxu0 %v1419_v24  ;;  %v1272_v24 = vld [vmem:[#allocation5 + $0x18] sm:$0xff] }
 0xa82   :  { %v958_v7 = vpop.f32.mrf.mxu0 }
 0xa83   :  { %v963_v11 = vadd.f32 %v958_v7, %v303_v5  ;;  %v1413_v5 = vld [vmem:[#allocation7 + $0x48] sm:$0xff]  ;;  %v1412_v7 = vld [vmem:[#allocation7 + $0x40] sm:$0xff] }
 0xa84   :  { %v960_v13 = vpop.f32.mrf.mxu0 }
 0xa85   :  { %v964_v15 = vadd.f32 %v960_v13, %v305_v9  ;;  %v3753_v29 = vmul.f32 -1.442695, %v963_v11  ;;  %v1411_v9 = vld [vmem:[#allocation7 + $0x38] sm:$0xff]  ;;  %v1410_v11 = vld [vmem:[#allocation7 + $0x30] sm:$0xff]  ;;  %v1409_v13 = vld [vmem:[#allocation7 + $0x28] sm:$0xff] }
 0xa87   :  { %v3754_v17 = vmul.f32 -1.442695, %v964_v15 }
 0xa89   :  { %3888 = vpow2.f32 %v3754_v17  ;;  %v1407_v17 = vld [vmem:[#allocation7 + $0x18] sm:$0xff] }
 0xa8a   :  { %3890 = vtanh.f32 %v964_v15  ;;  %v1408_v15 = vld [vmem:[#allocation7 + $0x20] sm:$0xff] }
 0xa96   :  { %v3889_v19 = vpop.eup %3888 }
 0xa97   :  { %v972_v21 = vadd.f32 1.0, %v3889_v19  ;;  %v3891_v23 = vpop.eup %3890  ;;  %v1406_v19 = vld [vmem:[#allocation7 + $0x10] sm:$0xff] }
 0xa99   :  { %3892 = vrcp.f32 %v972_v21  ;;  %v1405_v21 = vld [vmem:[#allocation7 + $0x8] sm:$0xff] }
 0xa9a   :  { %3894 = vpow2.f32 %v3753_v29  ;;  %v1398_v29 = vld [vmem:[#allocation3 + $0x10] sm:$0xff] }
 0xaa6   :  { %v3893_v25 = vpop.eup %3892 }
 0xaa7   :  { %v980_v27 = vsel %vm150_vm1, %v3893_v25, %v3891_v23  ;;  %v3895_v31 = vpop.eup %3894  ;;  %v1404_v23 = vld [vmem:[#allocation7] sm:$0xff] }
 0xaa8   :  { %983 = vrot.lane.b32.xlu0 %v980_v27, %s4309_s3  ;;  %v971_v33 = vadd.f32 1.0, %v3895_v31  ;;  %v1396_v25 = vld [vmem:[#allocation3] sm:$0xff]  ;;  %v1399_v31 = vld [vmem:[#allocation3 + $0x18] sm:$0xff] }
 0xaaa   :  { %3896 = vrcp.f32 %v971_v33 }
 0xab7   :  { %v3897_v2 = vpop.eup %3896 }
 0xab8   :  { %v981_v43 = vmul.f32 %v3897_v2, %v859_v34  ;;  %v1417_v34 = vld [vmem:[#allocation7 + $0x68] sm:$0xff] }
 0xb1a   :  { %v984_v4 = vpop.permute.xlu0 %983 }
 0xb1b   :  { %v986_v42 = vmul.f32 %v3897_v2, %v984_v4  ;;  %v315_v4 = vadd.f32 %v4671_v10, %v4564_v40 }
 0xb1d   :  { %988 = vrot.lane.b32.xlu1 %v986_v42, %s4309_s3 }
 0xb8f   :  { %v989_v44 = vpop.permute.xlu1 %988 }
 0xb90   :  { %v991_v45 = vadd.f32 %v989_v44, %v981_v43  ;;  %v317_v43 = vadd.f32 %v4673_v12, %v4567_v41 }
 0xb92   :  { %3898 = vtanh.f32 %v991_v45 }
 0xb9f   :  { %v3899_v46 = vpop.eup %3898 }
 0xba0   :  { %994 = vrot.lane.b32.xlu0 %v3899_v46, %s4309_s3 }
 0xc12   :  { %v995_v47 = vpop.permute.xlu0 %994 }
 0xc13   :  { %v997_v48 = vmul.f32 %v995_v47, %v980_v27  ;;  %v1397_v27 = vld [vmem:[#allocation3 + $0x8] sm:$0xff] }
 0xc15   :  { %999 = vst.msk [vmem:[#allocation3 + $0x20] sm:$0xff] %vm187_vm0, %v997_v48  ;;  %3755 = vmatmul.mubr.msk.f32.vlgmr.msra.gmra.mxu1 %vm187_vm0, %v997_v48 }
 0xc16   :  { %1352 = vmatprep.mubr.f32.mxu1 %v4308_v1 }
 0xc1c   :  { %v1400_v33 = vld [vmem:[#allocation3 + $0x20] sm:$0xff] }
 0xcd5   :  { %v1090_v50 = vpop.f32.mrf.mxu1 }
 0xcd6   :  { %v1095_v52 = vadd.f32 %v1090_v50, %v309_v49 }
 0xcd7   :  { %v1092_v53 = vpop.f32.mrf.mxu1 }
 0xcd8   :  { %v1096_v55 = vadd.f32 %v1092_v53, %v311_v51  ;;  %v3756_v6 = vmul.f32 -1.442695, %v1095_v52 }
 0xcda   :  { %v3757_v56 = vmul.f32 -1.442695, %v1096_v55 }
 0xcdc   :  { %3900 = vpow2.f32 %v3757_v56 }
 0xcdd   :  { %3902 = vtanh.f32 %v1096_v55 }
 0xce9   :  { %v3901_v57 = vpop.eup %3900 }
 0xcea   :  { %v1104_v58 = vadd.f32 1.0, %v3901_v57  ;;  %v3903_v59 = vpop.eup %3902 }
 0xcec   :  { %3904 = vrcp.f32 %v1104_v58  ;;  %v1284_v58 = vld [vmem:[#allocation5 + $0x78] sm:$0xff] }
 0xced   :  { %3906 = vpow2.f32 %v3756_v6  ;;  %1304 = vmatprep.subr.mxu1 %v1284_v58  ;;  %v1280_v6 = vld [vmem:[#allocation5 + $0x58] sm:$0xff] }
 0xcf9   :  { %v3905_v60 = vpop.eup %3904 }
 0xcfa   :  { %v1112_v61 = vsel %vm150_vm1, %v3905_v60, %v3903_v59  ;;  %v3907_v62 = vpop.eup %3906  ;;  %v1283_v59 = vld [vmem:[#allocation5 + $0x70] sm:$0xff]  ;;  %v1282_v60 = vld [vmem:[#allocation5 + $0x68] sm:$0xff] }
 0xcfb   :  { %1115 = vrot.lane.b32.xlu1 %v1112_v61, %s4309_s3  ;;  %v1103_v8 = vadd.f32 1.0, %v3907_v62  ;;  %1305 = vmatpush1.msra.mxu1 %v1283_v59  ;;  %v1279_v62 = vld [vmem:[#allocation5 + $0x50] sm:$0xff] }
 0xcfc   :  { %1306 = vmatprep.subr.mxu1 %v1282_v60  ;;  %v323_v60 = vadd.f32 %v4677_v16, %v4567_v41 }
 0xcfd   :  { %3908 = vrcp.f32 %v1103_v8  ;;  %v1278_v8 = vld [vmem:[#allocation5 + $0x48] sm:$0xff] }
 0xd0a   :  { %v3909_v3 = vpop.eup %3908 }
 0xd0b   :  { %v1113_v63 = vmul.f32 %v3909_v3, %v991_v45 }
 0xd6d   :  { %v1116_v18 = vpop.permute.xlu1 %1115 }
 0xd6e   :  { %v1118_v20 = vmul.f32 %v3909_v3, %v1116_v18  ;;  %v1277_v3 = vld [vmem:[#allocation5 + $0x40] sm:$0xff]  ;;  %v1276_v18 = vld [vmem:[#allocation5 + $0x38] sm:$0xff] }
 0xd70   :  { %1120 = vrot.lane.b32.xlu0 %v1118_v20, %s4309_s3  ;;  %v1275_v20 = vld [vmem:[#allocation5 + $0x30] sm:$0xff] }
 0xde2   :  { %v1121_v22 = vpop.permute.xlu0 %1120 }
 0xde3   :  { %v4749_v0 = vadd.f32 %v1121_v22, %v1113_v63  ;;  %v1274_v63 = vld [vmem:[#allocation5 + $0x28] sm:$0xff]  ;;  %v1273_v22 = vld [vmem:[#allocation5 + $0x20] sm:$0xff] }
 0xde5   :  { %3910 = vtanh.f32 %v4749_v0 }
 0xdf2   :  { %v3911_v26 = vpop.eup %3910 }
 0xdf3   :  { %1126 = vrot.lane.b32.xlu1 %v3911_v26, %s4309_s3  ;;  %v1271_v26 = vld [vmem:[#allocation5 + $0x10] sm:$0xff] }
 0xe65   :  { %v1127_v28 = vpop.permute.xlu1 %1126 }
 0xe66   :  { %v1129_v30 = vmul.f32 %v1127_v28, %v1112_v61  ;;  %v1281_v61 = vld [vmem:[#allocation5 + $0x60] sm:$0xff]  ;;  %v1270_v28 = vld [vmem:[#allocation5 + $0x8] sm:$0xff] }
 0xe67   :  { %1307 = vmatpush1.msra.mxu1 %v1281_v61 }
 0xe68   :  { %1131 = vst.msk [vmem:[#allocation3 + $0x28] sm:$0xff] %vm187_vm0, %v1129_v30  ;;  %3758 = vmatmul.mubr.msk.f32.vlgmr.msra.gmra.mxu0 %vm187_vm0, %v1129_v30  ;;  %1308 = vmatprep.subr.mxu1 %v1280_v6 }
 0xe69   :  { %1473 = vmatpush1.msra.mxu0 %v1418_v32  ;;  %1520 = vmatprep.mubr.f32.mxu0 %v4308_v1 }
 0xe6a   :  { %1474 = vmatprep.subr.mxu0 %v1417_v34  ;;  %1309 = vmatpush1.msra.mxu1 %v1279_v62 }
 0xe6b   :  { %1475 = vmatpush1.msra.mxu0 %v1416_v35  ;;  %1310 = vmatprep.subr.mxu1 %v1278_v8  ;;  %v1269_v35 = vld [vmem:[#allocation5] sm:$0xff] }
 0xe6c   :  { %1476 = vmatprep.subr.mxu0 %v1415_v36  ;;  %1311 = vmatpush1.msra.mxu1 %v1277_v3  ;;  %v4783_v36 = vld [vmem:[#allocation9 + $0x78] sm:$0xff] }
 0xe6d   :  { %1477 = vmatpush1.msra.mxu0 %v1414_v38  ;;  %1312 = vmatprep.subr.mxu1 %v1276_v18  ;;  %v4786_v38 = vld [vmem:[#allocation9 + $0x70] sm:$0xff] }
 0xe6e   :  { %1478 = vmatprep.subr.mxu0 %v1413_v5  ;;  %1313 = vmatpush1.msra.mxu1 %v1275_v20  ;;  %v4789_v5 = vld [vmem:[#allocation9 + $0x68] sm:$0xff] }
 0xe6f   :  { %1479 = vmatpush1.msra.mxu0 %v1412_v7  ;;  %v1401_v2 = vld [vmem:[#allocation3 + $0x28] sm:$0xff]  ;;  %1314 = vmatprep.subr.mxu1 %v1274_v63  ;;  %v4795_v7 = vld [vmem:[#allocation9 + $0x58] sm:$0xff] }
 0xe70   :  { %1480 = vmatprep.subr.mxu0 %v1411_v9  ;;  %1315 = vmatpush1.msra.mxu1 %v1273_v22  ;;  %v4798_v9 = vld [vmem:[#allocation9 + $0x50] sm:$0xff] }
 0xe71   :  { %1481 = vmatpush1.msra.mxu0 %v1410_v11  ;;  %1316 = vmatprep.subr.mxu1 %v1272_v24  ;;  %v4801_v11 = vld [vmem:[#allocation9 + $0x48] sm:$0xff] }
 0xe72   :  { %1482 = vmatprep.subr.mxu0 %v1409_v13  ;;  %1317 = vmatpush1.msra.mxu1 %v1271_v26  ;;  %v4804_v13 = vld [vmem:[#allocation9 + $0x40] sm:$0xff] }
 0xe73   :  { %1483 = vmatpush1.msra.mxu0 %v1408_v15  ;;  %1318 = vmatprep.subr.mxu1 %v1270_v28  ;;  %v4807_v15 = vld [vmem:[#allocation9 + $0x38] sm:$0xff] }
 0xe74   :  { %1484 = vmatprep.subr.mxu0 %v1407_v17  ;;  %1319 = vmatpush1.msra.mxu1 %v1269_v35  ;;  %v4810_v17 = vld [vmem:[#allocation9 + $0x30] sm:$0xff] }
 0xe75   :  { %1485 = vmatpush1.msra.mxu0 %v1406_v19  ;;  %1619 = vmatprep.subr.mxu1 %v4783_v36  ;;  %v4813_v19 = vld [vmem:[#allocation9 + $0x28] sm:$0xff] }
 0xe76   :  { %1486 = vmatprep.subr.mxu0 %v1405_v21 }
 0xe77   :  { %1487 = vmatpush1.msra.mxu0 %v1404_v23  ;;  %v4816_v23 = vld [vmem:[#allocation9 + $0x20] sm:$0xff] }
 0xe78   :  { %3764 = vmatmul.mubr.msk.f32.vlgmr.msra.gmra.mxu0 %vm187_vm0, %v1396_v25  ;;  %1875 = vmatprep.subr.mxu0 %v4783_v36  ;;  %v4820_v25 = vld [vmem:[#allocation9 + $0x18] sm:$0xff] }
 0xe79   :  { %1526 = vmatprep.mubr.f32.mxu0 %v4308_v1  ;;  %1876 = vmatpush1.msra.mxu0 %v4786_v38 }
 0xe7a   :  { %1877 = vmatprep.subr.mxu0 %v4789_v5 }
 0xe7c   :  { %3765 = vmatmul.mubr.msk.f32.gmra.mxu0 %vm187_vm0, %v1397_v27  ;;  %v4823_v27 = vld [vmem:[#allocation9 + $0x10] sm:$0xff] }
 0xe7d   :  { %1532 = vmatprep.mubr.f32.mxu0 %v4308_v1 }
 0xe80   :  { %3766 = vmatmul.mubr.msk.f32.gmra.mxu0 %vm187_vm0, %v1398_v29  ;;  %v4826_v29 = vld [vmem:[#allocation9 + $0x8] sm:$0xff] }
 0xe81   :  { %1538 = vmatprep.mubr.f32.mxu0 %v4308_v1 }
 0xe84   :  { %3767 = vmatmul.mubr.msk.f32.gmra.mxu0 %vm187_vm0, %v1399_v31  ;;  %v4829_v31 = vld [vmem:[#allocation9] sm:$0xff] }
 0xe85   :  { %1544 = vmatprep.mubr.f32.mxu0 %v4308_v1 }
 0xe88   :  { %3768 = vmatmul.mubr.msk.f32.gmra.mxu0 %vm187_vm0, %v1400_v33 }
 0xe89   :  { %1550 = vmatprep.mubr.f32.mxu0 %v4308_v1 }
 0xe8c   :  { %3769 = vmatmul.mubr.msk.f32.gmra.mxu0 %vm187_vm0, %v1401_v2 }
 0xe8d   :  { %1556 = vmatprep.mubr.f32.mxu0 %v4308_v1 }
 0xf28   :  { %v1222_v42 = vpop.f32.mrf.mxu0 }
 0xf29   :  { %v1227_v44 = vadd.f32 %v1222_v42, %v315_v4  ;;  %v321_v42 = vadd.f32 %v4675_v14, %v4564_v40 }
 0xf2a   :  { %v1224_v45 = vpop.f32.mrf.mxu0 }
 0xf2b   :  { %v1228_v46 = vadd.f32 %v1224_v45, %v317_v43  ;;  %v3759_v10 = vmul.f32 -1.442695, %v1227_v44  ;;  %v1420_v45 = vld [vmem:[#allocation10] sm:$0x3] }
 0xf2d   :  { %v3760_v47 = vmul.f32 -1.442695, %v1228_v46 }
 0xf2f   :  { %3912 = vpow2.f32 %v3760_v47  ;;  %v4877_v47 = vrot.slane %v1420_v45, %v4556_v37 }
 0xf30   :  { %3914 = vtanh.f32 %v1228_v46 }
 0xf38   :  { %v1522_v46 = vpop.f32.mrf.mxu0 }
 0xf3c   :  { %v3913_v48 = vpop.eup %3912 }
 0xf3d   :  { %v1236_v49 = vadd.f32 1.0, %v3913_v48  ;;  %v3915_v50 = vpop.eup %3914  ;;  %v4880_v48 = vrot.slane %v1420_v45, %v4561_v39 }
 0xf3f   :  { %3916 = vrcp.f32 %v1236_v49  ;;  %v1524_v49 = vpop.f32.mrf.mxu0 }
 0xf40   :  { %3918 = vpow2.f32 %v3759_v10  ;;  %v1525_v10 = vadd.f32 %v1524_v49, %v4880_v48 }
 0xf4c   :  { %v3917_v51 = vpop.eup %3916 }
 0xf4d   :  { %v4774_v52 = vsel %vm150_vm1, %v3917_v51, %v3915_v50  ;;  %v3919_v12 = vpop.eup %3918  ;;  %v1523_v51 = vadd.f32 %v1522_v46, %v4877_v47 }
 0xf4e   :  { %1247 = vrot.lane.b32.xlu0 %v4774_v52, %s4309_s3  ;;  %v1235_v53 = vadd.f32 1.0, %v3919_v12 }
 0xf50   :  { %3920 = vrcp.f32 %v1235_v53 }
 0xf5d   :  { %v3921_v55 = vpop.eup %3920 }
 0xf5e   :  { %v1245_v30 = vmul.f32 %v3921_v55, %v4749_v0  ;;  %v4792_v0 = vld [vmem:[#allocation9 + $0x60] sm:$0xff] }
 0xf5f   :  { %1878 = vmatpush1.msra.mxu0 %v4792_v0 }
 0xf60   :  { %1879 = vmatprep.subr.mxu0 %v4795_v7 }
 0xf61   :  { %1880 = vmatpush1.msra.mxu0 %v4798_v9 }
 0xf62   :  { %1881 = vmatprep.subr.mxu0 %v4801_v11 }
 0xf63   :  { %1882 = vmatpush1.msra.mxu0 %v4804_v13 }
 0xf64   :  { %1883 = vmatprep.subr.mxu0 %v4807_v15 }
 0xf65   :  { %1884 = vmatpush1.msra.mxu0 %v4810_v17 }
 0xf66   :  { %1885 = vmatprep.subr.mxu0 %v4813_v19 }
 0xf67   :  { %1886 = vmatpush1.msra.mxu0 %v4816_v23 }
 0xf68   :  { %1887 = vmatprep.subr.mxu0 %v4820_v25 }
 0xf69   :  { %1888 = vmatpush1.msra.mxu0 %v4823_v27 }
 0xf6a   :  { %1889 = vmatprep.subr.mxu0 %v4826_v29 }
 0xf6b   :  { %1890 = vmatpush1.msra.mxu0 %v4829_v31 }
 0xf6c   :  { %2131 = vmatprep.subr.mxu0 %v4783_v36 }
 0xfc0   :  { %v1248_v56 = vpop.permute.xlu0 %1247 }
 0xfc1   :  { %v1250_v57 = vmul.f32 %v3921_v55, %v1248_v56 }
 0xfc3   :  { %1252 = vrot.lane.b32.xlu1 %v1250_v57, %s4309_s3 }
0x1035   :  { %v1253_v32 = vpop.permute.xlu1 %1252 }
0x1036   :  { %v4780_v34 = vadd.f32 %v1253_v32, %v1245_v30 }
0x1038   :  { %3922 = vtanh.f32 %v4780_v34 }
0x1045   :  { %v3923_v21 = vpop.eup %3922 }
0x1046   :  { %1258 = vrot.lane.b32.xlu0 %v3923_v21, %s4309_s3 }
0x10b8   :  { %v1259_v33 = vpop.permute.xlu0 %1258 }
0x10b9   :  { %v1261_v2 = vmul.f32 %v1259_v33, %v4774_v52 }
0x10bb   :  { %1263 = vst.msk [vmem:[#allocation3 + $0x30] sm:$0xff] %vm187_vm0, %v1261_v2  ;;  %3761 = vmatmul.mubr.msk.f32.vlgmr.msra.gmra.mxu1 %vm187_vm0, %v1261_v2 }
0x10bc   :  { %1620 = vmatpush1.msra.mxu1 %v4786_v38  ;;  %1667 = vmatprep.mubr.f32.mxu1 %v4308_v1 }
0x10bd   :  { %1621 = vmatprep.subr.mxu1 %v4789_v5 }
0x10be   :  { %1622 = vmatpush1.msra.mxu1 %v4792_v0 }
0x10bf   :  { %1623 = vmatprep.subr.mxu1 %v4795_v7 }
0x10c0   :  { %1624 = vmatpush1.msra.mxu1 %v4798_v9 }
0x10c1   :  { %1625 = vmatprep.subr.mxu1 %v4801_v11 }
0x10c2   :  { %1626 = vmatpush1.msra.mxu1 %v4804_v13  ;;  %v1402_v4 = vld [vmem:[#allocation3 + $0x30] sm:$0xff] }
0x10c3   :  { %1627 = vmatprep.subr.mxu1 %v4807_v15  ;;  %3770 = vmatmul.mubr.msk.f32.gmra.mxu0 %vm187_vm0, %v1402_v4 }
0x10c4   :  { %1628 = vmatpush1.msra.mxu1 %v4810_v17  ;;  %1562 = vmatprep.mubr.f32.mxu0 %v4308_v1 }
0x10c5   :  { %1629 = vmatprep.subr.mxu1 %v4813_v19 }
0x10c6   :  { %1630 = vmatpush1.msra.mxu1 %v4816_v23 }
0x10c7   :  { %1631 = vmatprep.subr.mxu1 %v4820_v25 }
0x10c8   :  { %1632 = vmatpush1.msra.mxu1 %v4823_v27 }
0x10c9   :  { %1633 = vmatprep.subr.mxu1 %v4826_v29 }
0x10ca   :  { %1634 = vmatpush1.msra.mxu1 %v4829_v31 }
0x10cb   :  { %1668 = vmatmul.mubr.f32.vlgmr.msra.gmra.mxu1 %v4308_v1  ;;  %1747 = vmatprep.subr.mxu1 %v4783_v36 }
0x10cc   :  { %1748 = vmatpush1.msra.mxu1 %v4786_v38  ;;  %1795 = vmatprep.mubr.f32.mxu1 %v4308_v1 }
0x10cd   :  { %1749 = vmatprep.subr.mxu1 %v4789_v5 }
0x10ce   :  { %1750 = vmatpush1.msra.mxu1 %v4792_v0 }
0x10cf   :  { %1751 = vmatprep.subr.mxu1 %v4795_v7 }
0x10d0   :  { %1752 = vmatpush1.msra.mxu1 %v4798_v9 }
0x10d1   :  { %1753 = vmatprep.subr.mxu1 %v4801_v11 }
0x10d2   :  { %1754 = vmatpush1.msra.mxu1 %v4804_v13 }
0x10d3   :  { %1755 = vmatprep.subr.mxu1 %v4807_v15 }
0x10d4   :  { %1756 = vmatpush1.msra.mxu1 %v4810_v17 }
0x10d5   :  { %1757 = vmatprep.subr.mxu1 %v4813_v19 }
0x10d6   :  { %1758 = vmatpush1.msra.mxu1 %v4816_v23 }
0x10d7   :  { %1759 = vmatprep.subr.mxu1 %v4820_v25 }
0x10d8   :  { %1760 = vmatpush1.msra.mxu1 %v4823_v27 }
0x10d9   :  { %1761 = vmatprep.subr.mxu1 %v4826_v29 }
0x10da   :  { %1762 = vmatpush1.msra.mxu1 %v4829_v31 }
0x10db   :  { %2003 = vmatprep.subr.mxu1 %v4783_v36 }
0x117b   :  { %v1354_v43 = vpop.f32.mrf.mxu1 }
0x117c   :  { %v1359_v44 = vadd.f32 %v1354_v43, %v321_v42 }
0x117d   :  { %v1356_v50 = vpop.f32.mrf.mxu1 }
0x117e   :  { %v1360_v61 = vadd.f32 %v1356_v50, %v323_v60  ;;  %v3762_v16 = vmul.f32 -1.442695, %v1359_v44 }
0x1180   :  { %v3763_v62 = vmul.f32 -1.442695, %v1360_v61 }
0x118b   :  { %v1669_v52 = vpop.f32.mrf.mxu1 }
0x118c   :  { %v1674_v12 = vadd.f32 %v1669_v52, %v1523_v51 }
0x118d   :  { %v1671_v53 = vpop.f32.mrf.mxu1 }
0x118e   :  { %v1675_v40 = vadd.f32 %v1671_v53, %v1525_v10  ;;  %v3772_v6 = vmul.f32 -1.442695, %v1674_v12  ;;  %v1528_v12 = vpop.f32.mrf.mxu0 }
0x1190   :  { %v3773_v14 = vmul.f32 -1.442695, %v1675_v40  ;;  %v1530_v53 = vpop.f32.mrf.mxu0 }
0x1192   :  { %3924 = vpow2.f32 %v3773_v14 }
0x1193   :  { %3926 = vtanh.f32 %v1675_v40  ;;  %v1529_v40 = vadd.f32 %v1528_v12, %v4877_v47 }
0x119f   :  { %v3925_v55 = vpop.eup %3924 }
0x11a0   :  { %v1683_v56 = vadd.f32 1.0, %v3925_v55  ;;  %v3927_v57 = vpop.eup %3926  ;;  %v1531_v55 = vadd.f32 %v1530_v53, %v4880_v48 }
0x11a2   :  { %3928 = vrcp.f32 %v1683_v56 }
0x11a3   :  { %3930 = vpow2.f32 %v3772_v6 }
0x11a4   :  { %3932 = vpow2.f32 %v3763_v62 }
0x11af   :  { %v3929_v58 = vpop.eup %3928 }
0x11b0   :  { %v1691_v59 = vsel %vm150_vm1, %v3929_v58, %v3927_v57  ;;  %v3931_v8 = vpop.eup %3930 }
0x11b1   :  { %1694 = vrot.lane.b32.xlu1 %v1691_v59, %s4309_s3  ;;  %v3933_v3 = vpop.eup %3932  ;;  %v1682_v18 = vadd.f32 1.0, %v3931_v8 }
0x11b2   :  { %v1368_v20 = vadd.f32 1.0, %v3933_v3 }
0x11b3   :  { %3934 = vrcp.f32 %v1682_v18 }
0x11b4   :  { %3936 = vrcp.f32 %v1368_v20 }
0x11b5   :  { %3938 = vtanh.f32 %v1360_v61 }
0x11b6   :  { %3940 = vpow2.f32 %v3762_v16 }
0x11c0   :  { %v3935_v63 = vpop.eup %3934 }
0x11c1   :  { %v3937_v26 = vpop.eup %3936  ;;  %v1692_v35 = vmul.f32 0.0, %v3935_v63 }
0x11c2   :  { %v3939_v28 = vpop.eup %3938 }
0x11c3   :  { %v1376_v41 = vsel %vm150_vm1, %v3937_v26, %v3939_v28  ;;  %v3941_v30 = vpop.eup %3940 }
0x11c4   :  { %v1367_v32 = vadd.f32 1.0, %v3941_v30 }
0x11c6   :  { %3942 = vrcp.f32 %v1367_v32 }
0x11d3   :  { %v3943_v2 = vpop.eup %3942 }
0x11d4   :  { %v1377_v44 = vmul.f32 %v3943_v2, %v4780_v34 }
0x1223   :  { %v1695_v22 = vpop.permute.xlu1 %1694 }
0x1224   :  { %v1697_v24 = vmul.f32 %v3935_v63, %v1695_v22 }
0x1226   :  { %1699 = vrot.lane.b32.xlu0 %v1697_v24, %s4309_s3 }
0x122a   :  { %1379 = vrot.lane.b32.xlu0 %v1376_v41, %s4309_s3 }
0x1298   :  { %v1700_v21 = vpop.permute.xlu0 %1699 }
0x1299   :  { %v4893_v33 = vadd.f32 %v1700_v21, %v1692_v35  ;;  %v1534_v35 = vpop.f32.mrf.mxu0 }
0x129b   :  { %3944 = vtanh.f32 %v4893_v33  ;;  %v1536_v21 = vpop.f32.mrf.mxu0 }
0x129c   :  { %v1380_v4 = vpop.permute.xlu0 %1379 }
0x129d   :  { %v1382_v42 = vmul.f32 %v3943_v2, %v1380_v4 }
0x129f   :  { %1384 = vrot.lane.b32.xlu0 %v1382_v42, %s4309_s3 }
0x12a8   :  { %v3945_v43 = vpop.eup %3944 }
0x12a9   :  { %1705 = vrot.lane.b32.xlu1 %v3945_v43, %s4309_s3 }
0x1311   :  { %v1385_v45 = vpop.permute.xlu0 %1384 }
0x1312   :  { %v1387_v46 = vadd.f32 %v1385_v45, %v1377_v44 }
0x1314   :  { %3946 = vtanh.f32 %v1387_v46 }
0x131b   :  { %v1706_v49 = vpop.permute.xlu1 %1705 }
0x131c   :  { %v1708_v50 = vmul.f32 %v1706_v49, %v1691_v59 }
0x131e   :  { %1709 = vst.msk [vmem:[#allocation3] sm:$0xff] %vm187_vm0, %v1708_v50  ;;  %3774 = vmatmul.mubr.msk.f32.vlgmr.msra.gmra.mxu1 %vm187_vm0, %v1708_v50 }
0x131f   :  { %2004 = vmatpush1.msra.mxu1 %v4786_v38  ;;  %2051 = vmatprep.mubr.f32.mxu1 %v4308_v1 }
0x1320   :  { %2005 = vmatprep.subr.mxu1 %v4789_v5 }
0x1321   :  { %v3947_v51 = vpop.eup %3946  ;;  %2006 = vmatpush1.msra.mxu1 %v4792_v0 }
0x1322   :  { %1390 = vrot.lane.b32.xlu0 %v3947_v51, %s4309_s3  ;;  %2007 = vmatprep.subr.mxu1 %v4795_v7 }
0x1323   :  { %2008 = vmatpush1.msra.mxu1 %v4798_v9 }
0x1324   :  { %2009 = vmatprep.subr.mxu1 %v4801_v11 }
0x1325   :  { %2010 = vmatpush1.msra.mxu1 %v4804_v13 }
0x1326   :  { %2011 = vmatprep.subr.mxu1 %v4807_v15 }
0x1327   :  { %2012 = vmatpush1.msra.mxu1 %v4810_v17 }
0x1328   :  { %2013 = vmatprep.subr.mxu1 %v4813_v19 }
0x1329   :  { %2014 = vmatpush1.msra.mxu1 %v4816_v23 }
0x132a   :  { %2015 = vmatprep.subr.mxu1 %v4820_v25 }
0x132b   :  { %2016 = vmatpush1.msra.mxu1 %v4823_v27 }
0x132c   :  { %2017 = vmatprep.subr.mxu1 %v4826_v29 }
0x132d   :  { %2018 = vmatpush1.msra.mxu1 %v4829_v31 }
0x132e   :  { %2259 = vmatprep.subr.mxu1 %v4783_v36 }
0x1394   :  { %v1391_v34 = vpop.permute.xlu0 %1390 }
0x1395   :  { %v1393_v52 = vmul.f32 %v1391_v34, %v1376_v41  ;;  %v1537_v34 = vadd.f32 %v1536_v21, %v4880_v48 }
0x1397   :  { %1395 = vst.msk [vmem:[#allocation3 + $0x38] sm:$0xff] %vm187_vm0, %v1393_v52 }
0x139e   :  { %v1403_v10 = vld [vmem:[#allocation3 + $0x38] sm:$0xff] }
0x139f   :  { %3771 = vmatmul.mubr.msk.f32.gmra.mxu0 %vm187_vm0, %v1403_v10 }
0x13a0   :  { %1923 = vmatprep.mubr.f32.mxu0 %v4308_v1 }
0x13de   :  { %v1797_v14 = vpop.f32.mrf.mxu1 }
0x13df   :  { %v1802_v56 = vadd.f32 %v1797_v14, %v1529_v40 }
0x13e0   :  { %v1799_v57 = vpop.f32.mrf.mxu1 }
0x13e1   :  { %v1803_v58 = vadd.f32 %v1799_v57, %v1531_v55  ;;  %v3775_v3 = vmul.f32 -1.442695, %v1802_v56 }
0x13e3   :  { %v3776_v59 = vmul.f32 -1.442695, %v1803_v58 }
0x13e5   :  { %3948 = vpow2.f32 %v3776_v59 }
0x13e6   :  { %3950 = vtanh.f32 %v1803_v58 }
0x13f2   :  { %v3949_v60 = vpop.eup %3948 }
0x13f3   :  { %v1811_v61 = vadd.f32 1.0, %v3949_v60  ;;  %v3951_v6 = vpop.eup %3950 }
0x13f5   :  { %3952 = vrcp.f32 %v1811_v61 }
0x13f6   :  { %3954 = vpow2.f32 %v3775_v3 }
0x1402   :  { %v3953_v62 = vpop.eup %3952 }
0x1403   :  { %v1819_v8 = vsel %vm150_vm1, %v3953_v62, %v3951_v6  ;;  %v3955_v18 = vpop.eup %3954 }
0x1404   :  { %1822 = vrot.lane.b32.xlu1 %v1819_v8, %s4309_s3  ;;  %v1810_v20 = vadd.f32 1.0, %v3955_v18 }
0x1406   :  { %3956 = vrcp.f32 %v1810_v20 }
0x1413   :  { %v3957_v63 = vpop.eup %3956 }
0x1414   :  { %v1820_v26 = vmul.f32 %v3957_v63, %v4893_v33  ;;  %v1540_v33 = vpop.f32.mrf.mxu0 }
0x1416   :  { %v1542_v2 = vpop.f32.mrf.mxu0 }
0x1418   :  { %v4949_v4 = vpop.f32.mrf.mxu0 }
0x141a   :  { %v4951_v42 = vpop.f32.mrf.mxu0 }
0x141c   :  { %v4953_v43 = vpop.f32.mrf.mxu0 }
0x141e   :  { %v4955_v44 = vpop.f32.mrf.mxu0 }
0x1420   :  { %v4957_v45 = vpop.f32.mrf.mxu0 }
0x1422   :  { %v4959_v46 = vpop.f32.mrf.mxu0 }
0x145f   :  { %v4961_v49 = vpop.f32.mrf.mxu0 }
0x1461   :  { %v4963_v50 = vpop.f32.mrf.mxu0 }
0x1476   :  { %v1823_v22 = vpop.permute.xlu1 %1822 }
0x1477   :  { %v1825_v24 = vmul.f32 %v3957_v63, %v1823_v22 }
0x1479   :  { %1827 = vrot.lane.b32.xlu1 %v1825_v24, %s4309_s3  ;;  %v1541_v24 = vadd.f32 %v1540_v33, %v4877_v47 }
0x14eb   :  { %v1828_v28 = vpop.permute.xlu1 %1827 }
0x14ec   :  { %v1830_v41 = vadd.f32 %v1828_v28, %v1820_v26  ;;  %v1543_v28 = vadd.f32 %v1542_v2, %v4880_v48 }
0x14ee   :  { %3958 = vtanh.f32 %v1830_v41 }
0x14fb   :  { %v3959_v16 = vpop.eup %3958 }
0x14fc   :  { %1833 = vrot.lane.b32.xlu1 %v3959_v16, %s4309_s3 }
0x156e   :  { %v1834_v30 = vpop.permute.xlu1 %1833 }
0x156f   :  { %v1836_v32 = vmul.f32 %v1834_v30, %v1819_v8 }
0x1571   :  { %1837 = vst.msk [vmem:[#allocation3 + $0x8] sm:$0xff] %vm187_vm0, %v1836_v32  ;;  %3777 = vmatmul.mubr.msk.f32.vlgmr.msra.gmra.mxu0 %vm187_vm0, %v1836_v32 }
0x1572   :  { %2132 = vmatpush1.msra.mxu0 %v4786_v38  ;;  %2179 = vmatprep.mubr.f32.mxu0 %v4308_v1 }
0x1573   :  { %2133 = vmatprep.subr.mxu0 %v4789_v5 }
0x1574   :  { %2134 = vmatpush1.msra.mxu0 %v4792_v0 }
0x1575   :  { %2135 = vmatprep.subr.mxu0 %v4795_v7 }
0x1576   :  { %2136 = vmatpush1.msra.mxu0 %v4798_v9 }
0x1577   :  { %2137 = vmatprep.subr.mxu0 %v4801_v11 }
0x1578   :  { %2138 = vmatpush1.msra.mxu0 %v4804_v13 }
0x1579   :  { %2139 = vmatprep.subr.mxu0 %v4807_v15 }
0x157a   :  { %2140 = vmatpush1.msra.mxu0 %v4810_v17 }
0x157b   :  { %2141 = vmatprep.subr.mxu0 %v4813_v19 }
0x157c   :  { %2142 = vmatpush1.msra.mxu0 %v4816_v23 }
0x157d   :  { %2143 = vmatprep.subr.mxu0 %v4820_v25 }
0x157e   :  { %2144 = vmatpush1.msra.mxu0 %v4823_v27 }
0x157f   :  { %2145 = vmatprep.subr.mxu0 %v4826_v29 }
0x1580   :  { %2146 = vmatpush1.msra.mxu0 %v4829_v31 }
0x1581   :  { %2387 = vmatprep.subr.mxu0 %v4783_v36  ;;  %v1535_v36 = vadd.f32 %v1534_v35, %v4877_v47 }
0x1631   :  { %v1925_v51 = vpop.f32.mrf.mxu0 }
0x1632   :  { %v1930_v52 = vadd.f32 %v1925_v51, %v1535_v36 }
0x1633   :  { %v1927_v10 = vpop.f32.mrf.mxu0 }
0x1634   :  { %v1931_v12 = vadd.f32 %v1927_v10, %v1537_v34  ;;  %v3778_v58 = vmul.f32 -1.442695, %v1930_v52 }
0x1636   :  { %v3779_v53 = vmul.f32 -1.442695, %v1931_v12 }
0x1638   :  { %3960 = vpow2.f32 %v3779_v53 }
0x1639   :  { %3962 = vtanh.f32 %v1931_v12 }
0x1645   :  { %v3961_v40 = vpop.eup %3960 }
0x1646   :  { %v1939_v14 = vadd.f32 1.0, %v3961_v40  ;;  %v3963_v55 = vpop.eup %3962 }
0x1648   :  { %3964 = vrcp.f32 %v1939_v14 }
0x1649   :  { %3966 = vpow2.f32 %v3778_v58 }
0x1655   :  { %v3965_v56 = vpop.eup %3964 }
0x1656   :  { %v1947_v57 = vsel %vm150_vm1, %v3965_v56, %v3963_v55  ;;  %v3967_v59 = vpop.eup %3966 }
0x1657   :  { %1950 = vrot.lane.b32.xlu0 %v1947_v57, %s4309_s3  ;;  %v1938_v60 = vadd.f32 1.0, %v3967_v59 }
0x1659   :  { %3968 = vrcp.f32 %v1938_v60 }
0x1666   :  { %v3969_v61 = vpop.eup %3968 }
0x1667   :  { %v1948_v8 = vmul.f32 %v3969_v61, %v1830_v41 }
0x16c9   :  { %v1951_v6 = vpop.permute.xlu0 %1950 }
0x16ca   :  { %v1953_v62 = vmul.f32 %v3969_v61, %v1951_v6 }
0x16cc   :  { %1955 = vrot.lane.b32.xlu1 %v1953_v62, %s4309_s3 }
0x173e   :  { %v1956_v3 = vpop.permute.xlu1 %1955 }
0x173f   :  { %v1958_v18 = vadd.f32 %v1956_v3, %v1948_v8 }
0x1741   :  { %3970 = vtanh.f32 %v1958_v18 }
0x174e   :  { %v3971_v20 = vpop.eup %3970 }
0x174f   :  { %1961 = vrot.lane.b32.xlu0 %v3971_v20, %s4309_s3 }
0x17c1   :  { %v1962_v63 = vpop.permute.xlu0 %1961 }
0x17c2   :  { %v1964_v22 = vmul.f32 %v1962_v63, %v1947_v57  ;;  %v1555_v63 = vadd.f32 %v4955_v44, %v4880_v48 }
0x17c4   :  { %1965 = vst.msk [vmem:[#allocation3 + $0x10] sm:$0xff] %vm187_vm0, %v1964_v22  ;;  %3780 = vmatmul.mubr.msk.f32.vlgmr.msra.gmra.mxu1 %vm187_vm0, %v1964_v22 }
0x17c5   :  { %2260 = vmatpush1.msra.mxu1 %v4786_v38  ;;  %2307 = vmatprep.mubr.f32.mxu1 %v4308_v1 }
0x17c6   :  { %2261 = vmatprep.subr.mxu1 %v4789_v5 }
0x17c7   :  { %2262 = vmatpush1.msra.mxu1 %v4792_v0 }
0x17c8   :  { %2263 = vmatprep.subr.mxu1 %v4795_v7 }
0x17c9   :  { %2264 = vmatpush1.msra.mxu1 %v4798_v9 }
0x17ca   :  { %2265 = vmatprep.subr.mxu1 %v4801_v11 }
0x17cb   :  { %2266 = vmatpush1.msra.mxu1 %v4804_v13 }
0x17cc   :  { %2267 = vmatprep.subr.mxu1 %v4807_v15 }
0x17cd   :  { %2268 = vmatpush1.msra.mxu1 %v4810_v17 }
0x17ce   :  { %2269 = vmatprep.subr.mxu1 %v4813_v19 }
0x17cf   :  { %2270 = vmatpush1.msra.mxu1 %v4816_v23 }
0x17d0   :  { %2271 = vmatprep.subr.mxu1 %v4820_v25 }
0x17d1   :  { %2272 = vmatpush1.msra.mxu1 %v4823_v27 }
0x17d2   :  { %2273 = vmatprep.subr.mxu1 %v4826_v29 }
0x17d3   :  { %2274 = vmatpush1.msra.mxu1 %v4829_v31 }
0x1884   :  { %v2053_v26 = vpop.f32.mrf.mxu1 }
0x1885   :  { %v2058_v41 = vadd.f32 %v2053_v26, %v1541_v24 }
0x1886   :  { %v2055_v16 = vpop.f32.mrf.mxu1 }
0x1887   :  { %v2059_v30 = vadd.f32 %v2055_v16, %v1543_v28  ;;  %v3781_v33 = vmul.f32 -1.442695, %v2058_v41 }
0x1889   :  { %v3782_v32 = vmul.f32 -1.442695, %v2059_v30 }
0x188b   :  { %3972 = vpow2.f32 %v3782_v32 }
0x188c   :  { %3974 = vtanh.f32 %v2059_v30 }
0x1898   :  { %v3973_v35 = vpop.eup %3972 }
0x1899   :  { %v2067_v21 = vadd.f32 1.0, %v3973_v35  ;;  %v3975_v36 = vpop.eup %3974 }
0x189b   :  { %3976 = vrcp.f32 %v2067_v21 }
0x189c   :  { %3978 = vpow2.f32 %v3781_v33 }
0x18a8   :  { %v3977_v51 = vpop.eup %3976 }
0x18a9   :  { %v2075_v34 = vsel %vm150_vm1, %v3977_v51, %v3975_v36  ;;  %v3979_v52 = vpop.eup %3978 }
0x18aa   :  { %2078 = vrot.lane.b32.xlu1 %v2075_v34, %s4309_s3  ;;  %v2066_v2 = vadd.f32 1.0, %v3979_v52 }
0x18ac   :  { %3980 = vrcp.f32 %v2066_v2 }
0x18b9   :  { %v3981_v10 = vpop.eup %3980 }
0x18ba   :  { %v2076_v40 = vmul.f32 %v3981_v10, %v1958_v18  ;;  %v1553_v18 = vadd.f32 %v4953_v43, %v4877_v47 }
0x191c   :  { %v2079_v12 = vpop.permute.xlu1 %2078 }
0x191d   :  { %v2081_v53 = vmul.f32 %v3981_v10, %v2079_v12  ;;  %v2629_v10 = vld [vmem:[#allocation12 + $0x78] sm:$0xff] }
0x191f   :  { %2083 = vrot.lane.b32.xlu0 %v2081_v53, %s4309_s3 }
0x1991   :  { %v2084_v14 = vpop.permute.xlu0 %2083 }
0x1992   :  { %v2086_v55 = vadd.f32 %v2084_v14, %v2076_v40  ;;  %v2628_v14 = vld [vmem:[#allocation12 + $0x70] sm:$0xff] }
0x1994   :  { %3982 = vtanh.f32 %v2086_v55 }
0x19a1   :  { %v3983_v56 = vpop.eup %3982 }
0x19a2   :  { %2089 = vrot.lane.b32.xlu1 %v3983_v56, %s4309_s3  ;;  %v2626_v56 = vld [vmem:[#allocation12 + $0x60] sm:$0xff] }
0x1a14   :  { %v2090_v57 = vpop.permute.xlu1 %2089 }
0x1a15   :  { %v2092_v58 = vmul.f32 %v2090_v57, %v2075_v34  ;;  %v2625_v57 = vld [vmem:[#allocation12 + $0x58] sm:$0xff] }
0x1a17   :  { %2093 = vst.msk [vmem:[#allocation3 + $0x18] sm:$0xff] %vm187_vm0, %v2092_v58  ;;  %3783 = vmatmul.mubr.msk.f32.vlgmr.msra.gmra.mxu0 %vm187_vm0, %v2092_v58  ;;  %v2624_v58 = vld [vmem:[#allocation12 + $0x50] sm:$0xff] }
0x1a18   :  { %2388 = vmatpush1.msra.mxu0 %v4786_v38  ;;  %2435 = vmatprep.mubr.f32.mxu0 %v4308_v1  ;;  %v1547_v38 = vadd.f32 %v4949_v4, %v4877_v47 }
0x1a19   :  { %2389 = vmatprep.subr.mxu0 %v4789_v5 }
0x1a1a   :  { %2390 = vmatpush1.msra.mxu0 %v4792_v0  ;;  %v1549_v0 = vadd.f32 %v4951_v42, %v4880_v48 }
0x1a1b   :  { %2391 = vmatprep.subr.mxu0 %v4795_v7 }
0x1a1c   :  { %2392 = vmatpush1.msra.mxu0 %v4798_v9 }
0x1a1d   :  { %2393 = vmatprep.subr.mxu0 %v4801_v11 }
0x1a1e   :  { %2394 = vmatpush1.msra.mxu0 %v4804_v13 }
0x1a1f   :  { %2395 = vmatprep.subr.mxu0 %v4807_v15 }
0x1a20   :  { %2396 = vmatpush1.msra.mxu0 %v4810_v17 }
0x1a21   :  { %2397 = vmatprep.subr.mxu0 %v4813_v19 }
0x1a22   :  { %2398 = vmatpush1.msra.mxu0 %v4816_v23 }
0x1a23   :  { %2399 = vmatprep.subr.mxu0 %v4820_v25 }
0x1a24   :  { %2400 = vmatpush1.msra.mxu0 %v4823_v27 }
0x1a25   :  { %2401 = vmatprep.subr.mxu0 %v4826_v29 }
0x1a26   :  { %2402 = vmatpush1.msra.mxu0 %v4829_v31 }
0x1a27   :  { %2682 = vmatprep.subr.mxu0 %v2629_v10  ;;  %v2483_v10 = vld [vmem:[#allocation9 + $0x18] sm:$0xff] }
0x1ad7   :  { %v2181_v5 = vpop.f32.mrf.mxu0 }
0x1ad8   :  { %v2186_v7 = vadd.f32 %v2181_v5, %v1547_v38  ;;  %v2623_v38 = vld [vmem:[#allocation12 + $0x48] sm:$0xff]  ;;  %v2622_v5 = vld [vmem:[#allocation12 + $0x40] sm:$0xff] }
0x1ad9   :  { %v2183_v9 = vpop.f32.mrf.mxu0 }
0x1ada   :  { %v2187_v11 = vadd.f32 %v2183_v9, %v1549_v0  ;;  %v3784_v27 = vmul.f32 -1.442695, %v2186_v7  ;;  %v2621_v0 = vld [vmem:[#allocation12 + $0x38] sm:$0xff]  ;;  %v2620_v7 = vld [vmem:[#allocation12 + $0x30] sm:$0xff]  ;;  %v2619_v9 = vld [vmem:[#allocation12 + $0x28] sm:$0xff] }
0x1adc   :  { %v3785_v13 = vmul.f32 -1.442695, %v2187_v11 }
0x1ade   :  { %3984 = vpow2.f32 %v3785_v13  ;;  %v2617_v13 = vld [vmem:[#allocation12 + $0x18] sm:$0xff] }
0x1adf   :  { %3986 = vtanh.f32 %v2187_v11  ;;  %v2618_v11 = vld [vmem:[#allocation12 + $0x20] sm:$0xff] }
0x1aeb   :  { %v3985_v15 = vpop.eup %3984 }
0x1aec   :  { %v2195_v17 = vadd.f32 1.0, %v3985_v15  ;;  %v3987_v19 = vpop.eup %3986  ;;  %v2616_v15 = vld [vmem:[#allocation12 + $0x10] sm:$0xff] }
0x1aee   :  { %3988 = vrcp.f32 %v2195_v17  ;;  %v2615_v17 = vld [vmem:[#allocation12 + $0x8] sm:$0xff] }
0x1aef   :  { %3990 = vpow2.f32 %v3784_v27  ;;  %v2608_v27 = vld [vmem:[#allocation3 + $0x10] sm:$0xff] }
0x1afb   :  { %v3989_v23 = vpop.eup %3988 }
0x1afc   :  { %v2203_v25 = vsel %vm150_vm1, %v3989_v23, %v3987_v19  ;;  %v3991_v29 = vpop.eup %3990  ;;  %v2614_v19 = vld [vmem:[#allocation12] sm:$0xff] }
0x1afd   :  { %2206 = vrot.lane.b32.xlu0 %v2203_v25, %s4309_s3  ;;  %v2194_v31 = vadd.f32 1.0, %v3991_v29  ;;  %v2606_v23 = vld [vmem:[#allocation3] sm:$0xff]  ;;  %v2609_v29 = vld [vmem:[#allocation3 + $0x18] sm:$0xff] }
0x1aff   :  { %3992 = vrcp.f32 %v2194_v31 }
0x1b0c   :  { %v3993_v4 = vpop.eup %3992 }
0x1b0d   :  { %v2204_v60 = vmul.f32 %v3993_v4, %v2086_v55  ;;  %v2627_v55 = vld [vmem:[#allocation12 + $0x68] sm:$0xff] }
0x1b6f   :  { %v2207_v42 = vpop.permute.xlu0 %2206 }
0x1b70   :  { %v2209_v59 = vmul.f32 %v3993_v4, %v2207_v42  ;;  %v1559_v42 = vadd.f32 %v4957_v45, %v4877_v47 }
0x1b72   :  { %2211 = vrot.lane.b32.xlu1 %v2209_v59, %s4309_s3 }
0x1be4   :  { %v2212_v61 = vpop.permute.xlu1 %2211 }
0x1be5   :  { %v2214_v6 = vadd.f32 %v2212_v61, %v2204_v60  ;;  %v1561_v60 = vadd.f32 %v4959_v46, %v4880_v48 }
0x1be7   :  { %3994 = vtanh.f32 %v2214_v6 }
0x1bf4   :  { %v3995_v62 = vpop.eup %3994 }
0x1bf5   :  { %2217 = vrot.lane.b32.xlu0 %v3995_v62, %s4309_s3 }
0x1c67   :  { %v2218_v8 = vpop.permute.xlu0 %2217 }
0x1c68   :  { %v2220_v3 = vmul.f32 %v2218_v8, %v2203_v25  ;;  %v2607_v25 = vld [vmem:[#allocation3 + $0x8] sm:$0xff] }
0x1c6a   :  { %2221 = vst.msk [vmem:[#allocation3 + $0x20] sm:$0xff] %vm187_vm0, %v2220_v3  ;;  %3786 = vmatmul.mubr.msk.f32.vlgmr.msra.gmra.mxu1 %vm187_vm0, %v2220_v3 }
0x1c6b   :  { %2563 = vmatprep.mubr.f32.mxu1 %v4308_v1 }
0x1c71   :  { %v2610_v31 = vld [vmem:[#allocation3 + $0x20] sm:$0xff] }
0x1d2a   :  { %v2309_v20 = vpop.f32.mrf.mxu1 }
0x1d2b   :  { %v2314_v22 = vadd.f32 %v2309_v20, %v1553_v18 }
0x1d2c   :  { %v2311_v24 = vpop.f32.mrf.mxu1 }
0x1d2d   :  { %v2315_v26 = vadd.f32 %v2311_v24, %v1555_v63  ;;  %v3787_v43 = vmul.f32 -1.442695, %v2314_v22 }
0x1d2f   :  { %v3788_v28 = vmul.f32 -1.442695, %v2315_v26 }
0x1d31   :  { %3996 = vpow2.f32 %v3788_v28 }
0x1d32   :  { %3998 = vtanh.f32 %v2315_v26 }
0x1d3e   :  { %v3997_v41 = vpop.eup %3996 }
0x1d3f   :  { %v2323_v16 = vadd.f32 1.0, %v3997_v41  ;;  %v3999_v30 = vpop.eup %3998 }
0x1d41   :  { %4000 = vrcp.f32 %v2323_v16  ;;  %v2495_v16 = vld [vmem:[#allocation9 + $0x78] sm:$0xff] }
0x1d42   :  { %4002 = vpow2.f32 %v3787_v43  ;;  %2515 = vmatprep.subr.mxu1 %v2495_v16  ;;  %v2491_v43 = vld [vmem:[#allocation9 + $0x58] sm:$0xff]  ;;  %v1567_v16 = vadd.f32 %v4963_v50, %v4880_v48 }
0x1d4e   :  { %v4001_v32 = vpop.eup %4000 }
0x1d4f   :  { %v2331_v35 = vsel %vm150_vm1, %v4001_v32, %v3999_v30  ;;  %v4003_v21 = vpop.eup %4002  ;;  %v2494_v30 = vld [vmem:[#allocation9 + $0x70] sm:$0xff]  ;;  %v2493_v32 = vld [vmem:[#allocation9 + $0x68] sm:$0xff] }
0x1d50   :  { %2334 = vrot.lane.b32.xlu1 %v2331_v35, %s4309_s3  ;;  %v2322_v44 = vadd.f32 1.0, %v4003_v21  ;;  %2516 = vmatpush1.msra.mxu1 %v2494_v30  ;;  %v2490_v21 = vld [vmem:[#allocation9 + $0x50] sm:$0xff] }
0x1d51   :  { %2517 = vmatprep.subr.mxu1 %v2493_v32 }
0x1d52   :  { %4004 = vrcp.f32 %v2322_v44  ;;  %v2489_v44 = vld [vmem:[#allocation9 + $0x48] sm:$0xff] }
0x1d5f   :  { %v4005_v36 = vpop.eup %4004 }
0x1d60   :  { %v2332_v33 = vmul.f32 %v4005_v36, %v2214_v6 }
0x1dc2   :  { %v2335_v51 = vpop.permute.xlu1 %2334 }
0x1dc3   :  { %v2337_v34 = vmul.f32 %v4005_v36, %v2335_v51  ;;  %v2488_v36 = vld [vmem:[#allocation9 + $0x40] sm:$0xff]  ;;  %v2487_v51 = vld [vmem:[#allocation9 + $0x38] sm:$0xff] }
0x1dc5   :  { %2339 = vrot.lane.b32.xlu0 %v2337_v34, %s4309_s3  ;;  %v2486_v34 = vld [vmem:[#allocation9 + $0x30] sm:$0xff] }
0x1e37   :  { %v2340_v52 = vpop.permute.xlu0 %2339 }
0x1e38   :  { %v5035_v2 = vadd.f32 %v2340_v52, %v2332_v33  ;;  %v2485_v33 = vld [vmem:[#allocation9 + $0x28] sm:$0xff]  ;;  %v2484_v52 = vld [vmem:[#allocation9 + $0x20] sm:$0xff] }
0x1e3a   :  { %4006 = vtanh.f32 %v5035_v2 }
0x1e47   :  { %v4007_v12 = vpop.eup %4006 }
0x1e48   :  { %2345 = vrot.lane.b32.xlu1 %v4007_v12, %s4309_s3  ;;  %v2482_v12 = vld [vmem:[#allocation9 + $0x10] sm:$0xff] }
0x1eba   :  { %v2346_v53 = vpop.permute.xlu1 %2345 }
0x1ebb   :  { %v2348_v40 = vmul.f32 %v2346_v53, %v2331_v35  ;;  %v2492_v35 = vld [vmem:[#allocation9 + $0x60] sm:$0xff]  ;;  %v2481_v53 = vld [vmem:[#allocation9 + $0x8] sm:$0xff] }
0x1ebc   :  { %2518 = vmatpush1.msra.mxu1 %v2492_v35 }
0x1ebd   :  { %2349 = vst.msk [vmem:[#allocation3 + $0x28] sm:$0xff] %vm187_vm0, %v2348_v40  ;;  %3789 = vmatmul.mubr.msk.f32.vlgmr.msra.gmra.mxu0 %vm187_vm0, %v2348_v40  ;;  %2519 = vmatprep.subr.mxu1 %v2491_v43 }
0x1ebe   :  { %2683 = vmatpush1.msra.mxu0 %v2628_v14  ;;  %2730 = vmatprep.mubr.f32.mxu0 %v4308_v1 }
0x1ebf   :  { %2684 = vmatprep.subr.mxu0 %v2627_v55  ;;  %2520 = vmatpush1.msra.mxu1 %v2490_v21 }
0x1ec0   :  { %2685 = vmatpush1.msra.mxu0 %v2626_v56  ;;  %2521 = vmatprep.subr.mxu1 %v2489_v44  ;;  %v2480_v56 = vld [vmem:[#allocation9] sm:$0xff] }
0x1ec1   :  { %2686 = vmatprep.subr.mxu0 %v2625_v57  ;;  %2522 = vmatpush1.msra.mxu1 %v2488_v36  ;;  %v5069_v57 = vld [vmem:[#allocation13 + $0x78] sm:$0xff] }
0x1ec2   :  { %2687 = vmatpush1.msra.mxu0 %v2624_v58  ;;  %2523 = vmatprep.subr.mxu1 %v2487_v51  ;;  %v5071_v58 = vld [vmem:[#allocation13 + $0x70] sm:$0xff] }
0x1ec3   :  { %2688 = vmatprep.subr.mxu0 %v2623_v38  ;;  %2524 = vmatpush1.msra.mxu1 %v2486_v34  ;;  %v5075_v38 = vld [vmem:[#allocation13 + $0x68] sm:$0xff] }
0x1ec4   :  { %2689 = vmatpush1.msra.mxu0 %v2622_v5  ;;  %v2611_v4 = vld [vmem:[#allocation3 + $0x28] sm:$0xff]  ;;  %2525 = vmatprep.subr.mxu1 %v2485_v33  ;;  %v5081_v5 = vld [vmem:[#allocation13 + $0x58] sm:$0xff] }
0x1ec5   :  { %2690 = vmatprep.subr.mxu0 %v2621_v0  ;;  %2526 = vmatpush1.msra.mxu1 %v2484_v52  ;;  %v5084_v0 = vld [vmem:[#allocation13 + $0x50] sm:$0xff] }
0x1ec6   :  { %2691 = vmatpush1.msra.mxu0 %v2620_v7  ;;  %2527 = vmatprep.subr.mxu1 %v2483_v10  ;;  %v5087_v7 = vld [vmem:[#allocation13 + $0x48] sm:$0xff] }
0x1ec7   :  { %2692 = vmatprep.subr.mxu0 %v2619_v9  ;;  %2528 = vmatpush1.msra.mxu1 %v2482_v12  ;;  %v5090_v9 = vld [vmem:[#allocation13 + $0x40] sm:$0xff] }
0x1ec8   :  { %2693 = vmatpush1.msra.mxu0 %v2618_v11  ;;  %2529 = vmatprep.subr.mxu1 %v2481_v53  ;;  %v5093_v11 = vld [vmem:[#allocation13 + $0x38] sm:$0xff] }
0x1ec9   :  { %2694 = vmatprep.subr.mxu0 %v2617_v13  ;;  %2530 = vmatpush1.msra.mxu1 %v2480_v56  ;;  %v5096_v13 = vld [vmem:[#allocation13 + $0x30] sm:$0xff] }
0x1eca   :  { %2695 = vmatpush1.msra.mxu0 %v2616_v15  ;;  %2829 = vmatprep.subr.mxu1 %v5069_v57 }
0x1ecb   :  { %2696 = vmatprep.subr.mxu0 %v2615_v17  ;;  %v5099_v17 = vld [vmem:[#allocation13 + $0x28] sm:$0xff] }
0x1ecc   :  { %2697 = vmatpush1.msra.mxu0 %v2614_v19  ;;  %v5103_v19 = vld [vmem:[#allocation13 + $0x20] sm:$0xff] }
0x1ecd   :  { %3795 = vmatmul.mubr.msk.f32.vlgmr.msra.gmra.mxu0 %vm187_vm0, %v2606_v23  ;;  %3051 = vmatprep.subr.mxu0 %v5069_v57  ;;  %v5106_v23 = vld [vmem:[#allocation13 + $0x18] sm:$0xff] }
0x1ece   :  { %2736 = vmatprep.mubr.f32.mxu0 %v4308_v1  ;;  %3052 = vmatpush1.msra.mxu0 %v5071_v58 }
0x1ecf   :  { %3053 = vmatprep.subr.mxu0 %v5075_v38 }
0x1ed1   :  { %3796 = vmatmul.mubr.msk.f32.gmra.mxu0 %vm187_vm0, %v2607_v25  ;;  %v5109_v25 = vld [vmem:[#allocation13 + $0x10] sm:$0xff] }
0x1ed2   :  { %2742 = vmatprep.mubr.f32.mxu0 %v4308_v1 }
0x1ed5   :  { %3797 = vmatmul.mubr.msk.f32.gmra.mxu0 %vm187_vm0, %v2608_v27  ;;  %v5112_v27 = vld [vmem:[#allocation13 + $0x8] sm:$0xff] }
0x1ed6   :  { %2748 = vmatprep.mubr.f32.mxu0 %v4308_v1 }
0x1ed9   :  { %3798 = vmatmul.mubr.msk.f32.gmra.mxu0 %vm187_vm0, %v2609_v29  ;;  %v5115_v29 = vld [vmem:[#allocation13] sm:$0xff] }
0x1eda   :  { %2754 = vmatprep.mubr.f32.mxu0 %v4308_v1 }
0x1edd   :  { %3799 = vmatmul.mubr.msk.f32.gmra.mxu0 %vm187_vm0, %v2610_v31 }
0x1ede   :  { %2760 = vmatprep.mubr.f32.mxu0 %v4308_v1 }
0x1ee1   :  { %3800 = vmatmul.mubr.msk.f32.gmra.mxu0 %vm187_vm0, %v2611_v4 }
0x1ee2   :  { %2766 = vmatprep.mubr.f32.mxu0 %v4308_v1 }
0x1f7d   :  { %v2437_v59 = vpop.f32.mrf.mxu0 }
0x1f7e   :  { %v2442_v61 = vadd.f32 %v2437_v59, %v1559_v42  ;;  %v1565_v59 = vadd.f32 %v4961_v49, %v4877_v47 }
0x1f7f   :  { %v2439_v6 = vpop.f32.mrf.mxu0 }
0x1f80   :  { %v2443_v62 = vadd.f32 %v2439_v6, %v1561_v60  ;;  %v3790_v45 = vmul.f32 -1.442695, %v2442_v61  ;;  %v2630_v6 = vld [vmem:[#allocation15] sm:$0x3] }
0x1f82   :  { %v3791_v8 = vmul.f32 -1.442695, %v2443_v62 }
0x1f84   :  { %4008 = vpow2.f32 %v3791_v8  ;;  %v5163_v8 = vrot.slane %v2630_v6, %v4556_v37 }
0x1f85   :  { %4010 = vtanh.f32 %v2443_v62 }
0x1f8d   :  { %v2732_v62 = vpop.f32.mrf.mxu0 }
0x1f91   :  { %v4009_v3 = vpop.eup %4008 }
0x1f92   :  { %v2451_v18 = vadd.f32 1.0, %v4009_v3  ;;  %v4011_v20 = vpop.eup %4010  ;;  %v5166_v3 = vrot.slane %v2630_v6, %v4561_v39 }
0x1f94   :  { %4012 = vrcp.f32 %v2451_v18  ;;  %v2734_v18 = vpop.f32.mrf.mxu0 }
0x1f95   :  { %4014 = vpow2.f32 %v3790_v45  ;;  %v2735_v45 = vadd.f32 %v2734_v18, %v5166_v3 }
0x1fa1   :  { %v4013_v63 = vpop.eup %4012 }
0x1fa2   :  { %v5060_v22 = vsel %vm150_vm1, %v4013_v63, %v4011_v20  ;;  %v4015_v46 = vpop.eup %4014  ;;  %v2733_v63 = vadd.f32 %v2732_v62, %v5163_v8 }
0x1fa3   :  { %2462 = vrot.lane.b32.xlu0 %v5060_v22, %s4309_s3  ;;  %v2450_v24 = vadd.f32 1.0, %v4015_v46 }
0x1fa5   :  { %4016 = vrcp.f32 %v2450_v24 }
0x1fb2   :  { %v4017_v26 = vpop.eup %4016 }
0x1fb3   :  { %v2460_v40 = vmul.f32 %v4017_v26, %v5035_v2  ;;  %v5078_v2 = vld [vmem:[#allocation13 + $0x60] sm:$0xff] }
0x1fb4   :  { %3054 = vmatpush1.msra.mxu0 %v5078_v2 }
0x1fb5   :  { %3055 = vmatprep.subr.mxu0 %v5081_v5 }
0x1fb6   :  { %3056 = vmatpush1.msra.mxu0 %v5084_v0 }
0x1fb7   :  { %3057 = vmatprep.subr.mxu0 %v5087_v7 }
0x1fb8   :  { %3058 = vmatpush1.msra.mxu0 %v5090_v9 }
0x1fb9   :  { %3059 = vmatprep.subr.mxu0 %v5093_v11 }
0x1fba   :  { %3060 = vmatpush1.msra.mxu0 %v5096_v13 }
0x1fbb   :  { %3061 = vmatprep.subr.mxu0 %v5099_v17 }
0x1fbc   :  { %3062 = vmatpush1.msra.mxu0 %v5103_v19 }
0x1fbd   :  { %3063 = vmatprep.subr.mxu0 %v5106_v23 }
0x1fbe   :  { %3064 = vmatpush1.msra.mxu0 %v5109_v25 }
0x1fbf   :  { %3065 = vmatprep.subr.mxu0 %v5112_v27 }
0x1fc0   :  { %3066 = vmatpush1.msra.mxu0 %v5115_v29 }
0x1fc1   :  { %3273 = vmatprep.subr.mxu0 %v5069_v57 }
0x2015   :  { %v2463_v28 = vpop.permute.xlu0 %2462 }
0x2016   :  { %v2465_v41 = vmul.f32 %v4017_v26, %v2463_v28 }
0x2018   :  { %2467 = vrot.lane.b32.xlu1 %v2465_v41, %s4309_s3 }
0x208a   :  { %v2468_v14 = vpop.permute.xlu1 %2467 }
0x208b   :  { %v5066_v55 = vadd.f32 %v2468_v14, %v2460_v40 }
0x208d   :  { %4018 = vtanh.f32 %v5066_v55 }
0x209a   :  { %v4019_v15 = vpop.eup %4018 }
0x209b   :  { %2473 = vrot.lane.b32.xlu0 %v4019_v15, %s4309_s3 }
0x210d   :  { %v2474_v31 = vpop.permute.xlu0 %2473 }
0x210e   :  { %v2476_v4 = vmul.f32 %v2474_v31, %v5060_v22 }
0x2110   :  { %2477 = vst.msk [vmem:[#allocation3 + $0x30] sm:$0xff] %vm187_vm0, %v2476_v4  ;;  %3792 = vmatmul.mubr.msk.f32.vlgmr.msra.gmra.mxu1 %vm187_vm0, %v2476_v4 }
0x2111   :  { %2830 = vmatpush1.msra.mxu1 %v5071_v58  ;;  %2877 = vmatprep.mubr.f32.mxu1 %v4308_v1 }
0x2112   :  { %2831 = vmatprep.subr.mxu1 %v5075_v38 }
0x2113   :  { %2832 = vmatpush1.msra.mxu1 %v5078_v2 }
0x2114   :  { %2833 = vmatprep.subr.mxu1 %v5081_v5 }
0x2115   :  { %2834 = vmatpush1.msra.mxu1 %v5084_v0 }
0x2116   :  { %2835 = vmatprep.subr.mxu1 %v5087_v7 }
0x2117   :  { %2836 = vmatpush1.msra.mxu1 %v5090_v9  ;;  %v2612_v42 = vld [vmem:[#allocation3 + $0x30] sm:$0xff] }
0x2118   :  { %2837 = vmatprep.subr.mxu1 %v5093_v11  ;;  %3801 = vmatmul.mubr.msk.f32.gmra.mxu0 %vm187_vm0, %v2612_v42 }
0x2119   :  { %2838 = vmatpush1.msra.mxu1 %v5096_v13  ;;  %2772 = vmatprep.mubr.f32.mxu0 %v4308_v1 }
0x211a   :  { %2839 = vmatprep.subr.mxu1 %v5099_v17 }
0x211b   :  { %2840 = vmatpush1.msra.mxu1 %v5103_v19 }
0x211c   :  { %2841 = vmatprep.subr.mxu1 %v5106_v23 }
0x211d   :  { %2842 = vmatpush1.msra.mxu1 %v5109_v25 }
0x211e   :  { %2843 = vmatprep.subr.mxu1 %v5112_v27 }
0x211f   :  { %2844 = vmatpush1.msra.mxu1 %v5115_v29 }
0x2120   :  { %2878 = vmatmul.mubr.f32.vlgmr.msra.gmra.mxu1 %v4308_v1  ;;  %2940 = vmatprep.subr.mxu1 %v5069_v57 }
0x2121   :  { %2941 = vmatpush1.msra.mxu1 %v5071_v58  ;;  %2988 = vmatprep.mubr.f32.mxu1 %v4308_v1 }
0x2122   :  { %2942 = vmatprep.subr.mxu1 %v5075_v38 }
0x2123   :  { %2943 = vmatpush1.msra.mxu1 %v5078_v2 }
0x2124   :  { %2944 = vmatprep.subr.mxu1 %v5081_v5 }
0x2125   :  { %2945 = vmatpush1.msra.mxu1 %v5084_v0 }
0x2126   :  { %2946 = vmatprep.subr.mxu1 %v5087_v7 }
0x2127   :  { %2947 = vmatpush1.msra.mxu1 %v5090_v9 }
0x2128   :  { %2948 = vmatprep.subr.mxu1 %v5093_v11 }
0x2129   :  { %2949 = vmatpush1.msra.mxu1 %v5096_v13 }
0x212a   :  { %2950 = vmatprep.subr.mxu1 %v5099_v17 }
0x212b   :  { %2951 = vmatpush1.msra.mxu1 %v5103_v19 }
0x212c   :  { %2952 = vmatprep.subr.mxu1 %v5106_v23 }
0x212d   :  { %2953 = vmatpush1.msra.mxu1 %v5109_v25 }
0x212e   :  { %2954 = vmatprep.subr.mxu1 %v5112_v27 }
0x212f   :  { %2955 = vmatpush1.msra.mxu1 %v5115_v29 }
0x2130   :  { %3162 = vmatprep.subr.mxu1 %v5069_v57 }
0x21d0   :  { %v2565_v60 = vpop.f32.mrf.mxu1 }
0x21d1   :  { %v2570_v61 = vadd.f32 %v2565_v60, %v1565_v59 }
0x21d2   :  { %v2567_v20 = vpop.f32.mrf.mxu1 }
0x21d3   :  { %v2571_v30 = vadd.f32 %v2567_v20, %v1567_v16  ;;  %v3793_v50 = vmul.f32 -1.442695, %v2570_v61 }
0x21d5   :  { %v3794_v35 = vmul.f32 -1.442695, %v2571_v30 }
0x21e0   :  { %v2879_v22 = vpop.f32.mrf.mxu1 }
0x21e1   :  { %v2884_v46 = vadd.f32 %v2879_v22, %v2733_v63  ;;  %v2738_v22 = vpop.f32.mrf.mxu0 }
0x21e2   :  { %v2881_v24 = vpop.f32.mrf.mxu1 }
0x21e3   :  { %v2885_v47 = vadd.f32 %v2881_v24, %v2735_v45  ;;  %v3803_v32 = vmul.f32 -1.442695, %v2884_v46  ;;  %v2740_v45 = vpop.f32.mrf.mxu0  ;;  %v2739_v46 = vadd.f32 %v2738_v22, %v5163_v8 }
0x21e5   :  { %v3804_v49 = vmul.f32 -1.442695, %v2885_v47 }
0x21e7   :  { %4020 = vpow2.f32 %v3804_v49 }
0x21e8   :  { %4022 = vtanh.f32 %v2885_v47  ;;  %v2741_v47 = vadd.f32 %v2740_v45, %v5166_v3 }
0x21f4   :  { %v4021_v26 = vpop.eup %4020 }
0x21f5   :  { %v2893_v28 = vadd.f32 1.0, %v4021_v26  ;;  %v4023_v37 = vpop.eup %4022 }
0x21f7   :  { %4024 = vrcp.f32 %v2893_v28 }
0x21f8   :  { %4026 = vpow2.f32 %v3803_v32 }
0x21f9   :  { %4028 = vpow2.f32 %v3794_v35 }
0x2204   :  { %v4025_v41 = vpop.eup %4024 }
0x2205   :  { %v2901_v39 = vsel %vm150_vm1, %v4025_v41, %v4023_v37  ;;  %v4027_v43 = vpop.eup %4026 }
0x2206   :  { %2904 = vrot.lane.b32.xlu1 %v2901_v39, %s4309_s3  ;;  %v4029_v21 = vpop.eup %4028  ;;  %v2892_v44 = vadd.f32 1.0, %v4027_v43 }
0x2207   :  { %v2579_v36 = vadd.f32 1.0, %v4029_v21 }
0x2208   :  { %4030 = vrcp.f32 %v2892_v44 }
0x2209   :  { %4032 = vrcp.f32 %v2579_v36 }
0x220a   :  { %4034 = vtanh.f32 %v2571_v30 }
0x220b   :  { %4036 = vpow2.f32 %v3793_v50 }
0x2215   :  { %v4031_v51 = vpop.eup %4030 }
0x2216   :  { %v4033_v52 = vpop.eup %4032  ;;  %v2902_v40 = vmul.f32 0.0, %v4031_v51 }
0x2217   :  { %v4035_v10 = vpop.eup %4034 }
0x2218   :  { %v2587_v48 = vsel %vm150_vm1, %v4033_v52, %v4035_v10  ;;  %v4037_v12 = vpop.eup %4036 }
0x2219   :  { %v2578_v53 = vadd.f32 1.0, %v4037_v12  ;;  %v2744_v12 = vpop.f32.mrf.mxu0 }
0x221b   :  { %4038 = vrcp.f32 %v2578_v53  ;;  %v2746_v53 = vpop.f32.mrf.mxu0 }
0x2228   :  { %v4039_v15 = vpop.eup %4038 }
0x2229   :  { %v2588_v59 = vmul.f32 %v4039_v15, %v5066_v55 }
0x2278   :  { %v2905_v34 = vpop.permute.xlu1 %2904 }
0x2279   :  { %v2907_v33 = vmul.f32 %v4031_v51, %v2905_v34 }
0x227b   :  { %2909 = vrot.lane.b32.xlu0 %v2907_v33, %s4309_s3 }
0x227f   :  { %2590 = vrot.lane.b32.xlu0 %v2587_v48, %s4309_s3 }
0x22ed   :  { %v2910_v14 = vpop.permute.xlu0 %2909 }
0x22ee   :  { %v5179_v56 = vadd.f32 %v2910_v14, %v2902_v40  ;;  %v2750_v40 = vpop.f32.mrf.mxu0 }
0x22f0   :  { %4040 = vtanh.f32 %v5179_v56  ;;  %v2752_v14 = vpop.f32.mrf.mxu0 }
0x22f1   :  { %v2591_v31 = vpop.permute.xlu0 %2590 }
0x22f2   :  { %v2593_v4 = vmul.f32 %v4039_v15, %v2591_v31 }
0x22f4   :  { %2595 = vrot.lane.b32.xlu0 %v2593_v4, %s4309_s3 }
0x22fd   :  { %v4041_v42 = vpop.eup %4040 }
0x22fe   :  { %2915 = vrot.lane.b32.xlu1 %v4041_v42, %s4309_s3 }
0x2366   :  { %v2596_v60 = vpop.permute.xlu0 %2595 }
0x2367   :  { %v2598_v61 = vadd.f32 %v2596_v60, %v2588_v59 }
0x2369   :  { %4042 = vtanh.f32 %v2598_v61 }
0x2370   :  { %v2916_v6 = vpop.permute.xlu1 %2915 }
0x2371   :  { %v2918_v62 = vmul.f32 %v2916_v6, %v2901_v39  ;;  %v2745_v6 = vadd.f32 %v2744_v12, %v5163_v8 }
0x2373   :  { %3805 = vmatmul.mubr.msk.f32.vlgmr.msra.gmra.mxu1 %vm187_vm0, %v2918_v62 }
0x2374   :  { %3163 = vmatpush1.msra.mxu1 %v5071_v58  ;;  %3210 = vmatprep.mubr.f32.mxu1 %v4308_v1 }
0x2375   :  { %3164 = vmatprep.subr.mxu1 %v5075_v38 }
0x2376   :  { %v4043_v18 = vpop.eup %4042  ;;  %3165 = vmatpush1.msra.mxu1 %v5078_v2 }
0x2377   :  { %2601 = vrot.lane.b32.xlu0 %v4043_v18, %s4309_s3  ;;  %3166 = vmatprep.subr.mxu1 %v5081_v5  ;;  %v2747_v18 = vadd.f32 %v2746_v53, %v5166_v3 }
0x2378   :  { %3167 = vmatpush1.msra.mxu1 %v5084_v0 }
0x2379   :  { %3168 = vmatprep.subr.mxu1 %v5087_v7 }
0x237a   :  { %3169 = vmatpush1.msra.mxu1 %v5090_v9 }
0x237b   :  { %3170 = vmatprep.subr.mxu1 %v5093_v11 }
0x237c   :  { %3171 = vmatpush1.msra.mxu1 %v5096_v13 }
0x237d   :  { %3172 = vmatprep.subr.mxu1 %v5099_v17 }
0x237e   :  { %3173 = vmatpush1.msra.mxu1 %v5103_v19 }
0x237f   :  { %3174 = vmatprep.subr.mxu1 %v5106_v23 }
0x2380   :  { %3175 = vmatpush1.msra.mxu1 %v5109_v25 }
0x2381   :  { %3176 = vmatprep.subr.mxu1 %v5112_v27 }
0x2382   :  { %3177 = vmatpush1.msra.mxu1 %v5115_v29 }
0x2383   :  { %3384 = vmatprep.subr.mxu1 %v5069_v57 }
0x23e9   :  { %v2602_v55 = vpop.permute.xlu0 %2601 }
0x23ea   :  { %v2604_v20 = vmul.f32 %v2602_v55, %v2587_v48 }
0x23ec   :  { %2605 = vst.msk [vmem:[#allocation3 + $0x38] sm:$0xff] %vm187_vm0, %v2604_v20 }
0x23f3   :  { %v2613_v63 = vld [vmem:[#allocation3 + $0x38] sm:$0xff] }
0x23f4   :  { %3802 = vmatmul.mubr.msk.f32.gmra.mxu0 %vm187_vm0, %v2613_v63 }
0x23f5   :  { %3099 = vmatprep.mubr.f32.mxu0 %v4308_v1 }
0x2433   :  { %v2990_v24 = vpop.f32.mrf.mxu1 }
0x2434   :  { %v2995_v49 = vadd.f32 %v2990_v24, %v2739_v46 }
0x2435   :  { %v2992_v26 = vpop.f32.mrf.mxu1 }
0x2436   :  { %v2996_v28 = vadd.f32 %v2992_v26, %v2741_v47  ;;  %v3806_v35 = vmul.f32 -1.442695, %v2995_v49 }
0x2438   :  { %v3807_v37 = vmul.f32 -1.442695, %v2996_v28 }
0x243a   :  { %4044 = vpow2.f32 %v3807_v37 }
0x243b   :  { %4046 = vtanh.f32 %v2996_v28 }
0x2447   :  { %v4045_v41 = vpop.eup %4044 }
0x2448   :  { %v3004_v39 = vadd.f32 1.0, %v4045_v41  ;;  %v4047_v16 = vpop.eup %4046 }
0x244a   :  { %4048 = vrcp.f32 %v3004_v39 }
0x244b   :  { %4050 = vpow2.f32 %v3806_v35 }
0x2457   :  { %v4049_v30 = vpop.eup %4048 }
0x2458   :  { %v3012_v32 = vsel %vm150_vm1, %v4049_v30, %v4047_v16  ;;  %v4051_v43 = vpop.eup %4050 }
0x2459   :  { %3015 = vrot.lane.b32.xlu1 %v3012_v32, %s4309_s3  ;;  %v3003_v21 = vadd.f32 1.0, %v4051_v43 }
0x245b   :  { %4052 = vrcp.f32 %v3003_v21 }
0x2468   :  { %v4053_v44 = vpop.eup %4052 }
0x2469   :  { %v3013_v34 = vmul.f32 %v4053_v44, %v5179_v56  ;;  %v5233_v56 = vpop.f32.mrf.mxu0 }
0x246b   :  { %v5235_v15 = vpop.f32.mrf.mxu0 }
0x246d   :  { %v5237_v31 = vpop.f32.mrf.mxu0 }
0x246f   :  { %v5239_v4 = vpop.f32.mrf.mxu0 }
0x2471   :  { %v5241_v42 = vpop.f32.mrf.mxu0 }
0x2473   :  { %v5243_v59 = vpop.f32.mrf.mxu0 }
0x24b4   :  { %v5245_v60 = vpop.f32.mrf.mxu0 }
0x24b6   :  { %v5247_v61 = vpop.f32.mrf.mxu0 }
0x24cb   :  { %v3016_v36 = vpop.permute.xlu1 %3015 }
0x24cc   :  { %v3018_v51 = vmul.f32 %v4053_v44, %v3016_v36  ;;  %v2751_v36 = vadd.f32 %v2750_v40, %v5163_v8 }
0x24ce   :  { %3020 = vrot.lane.b32.xlu1 %v3018_v51, %s4309_s3 }
0x2540   :  { %v3021_v33 = vpop.permute.xlu1 %3020 }
0x2541   :  { %v3023_v52 = vadd.f32 %v3021_v33, %v3013_v34  ;;  %v2753_v34 = vadd.f32 %v2752_v14, %v5166_v3 }
0x2543   :  { %4054 = vtanh.f32 %v3023_v52 }
0x2550   :  { %v4055_v10 = vpop.eup %4054 }
0x2551   :  { %3026 = vrot.lane.b32.xlu1 %v4055_v10, %s4309_s3 }
0x25c3   :  { %v3027_v48 = vpop.permute.xlu1 %3026 }
0x25c4   :  { %v3029_v50 = vmul.f32 %v3027_v48, %v3012_v32 }
0x25c6   :  { %3808 = vmatmul.mubr.msk.f32.vlgmr.msra.gmra.mxu0 %vm187_vm0, %v3029_v50 }
0x25c7   :  { %3274 = vmatpush1.msra.mxu0 %v5071_v58  ;;  %3321 = vmatprep.mubr.f32.mxu0 %v4308_v1 }
0x25c8   :  { %3275 = vmatprep.subr.mxu0 %v5075_v38 }
0x25c9   :  { %3276 = vmatpush1.msra.mxu0 %v5078_v2 }
0x25ca   :  { %3277 = vmatprep.subr.mxu0 %v5081_v5 }
0x25cb   :  { %3278 = vmatpush1.msra.mxu0 %v5084_v0 }
0x25cc   :  { %3279 = vmatprep.subr.mxu0 %v5087_v7 }
0x25cd   :  { %3280 = vmatpush1.msra.mxu0 %v5090_v9 }
0x25ce   :  { %3281 = vmatprep.subr.mxu0 %v5093_v11 }
0x25cf   :  { %3282 = vmatpush1.msra.mxu0 %v5096_v13 }
0x25d0   :  { %3283 = vmatprep.subr.mxu0 %v5099_v17 }
0x25d1   :  { %3284 = vmatpush1.msra.mxu0 %v5103_v19 }
0x25d2   :  { %3285 = vmatprep.subr.mxu0 %v5106_v23 }
0x25d3   :  { %3286 = vmatpush1.msra.mxu0 %v5109_v25 }
0x25d4   :  { %3287 = vmatprep.subr.mxu0 %v5112_v27 }
0x25d5   :  { %3288 = vmatpush1.msra.mxu0 %v5115_v29 }
0x25d6   :  { %3495 = vmatprep.subr.mxu0 %v5069_v57 }
0x2686   :  { %v3101_v62 = vpop.f32.mrf.mxu0 }
0x2687   :  { %v3106_v55 = vadd.f32 %v3101_v62, %v2745_v6 }
0x2688   :  { %v3103_v20 = vpop.f32.mrf.mxu0 }
0x2689   :  { %v3107_v63 = vadd.f32 %v3103_v20, %v2747_v18  ;;  %v3809_v26 = vmul.f32 -1.442695, %v3106_v55 }
0x268b   :  { %v3810_v22 = vmul.f32 -1.442695, %v3107_v63 }
0x268d   :  { %4056 = vpow2.f32 %v3810_v22 }
0x268e   :  { %4058 = vtanh.f32 %v3107_v63 }
0x269a   :  { %v4057_v45 = vpop.eup %4056 }
0x269b   :  { %v3115_v46 = vadd.f32 1.0, %v4057_v45  ;;  %v4059_v24 = vpop.eup %4058 }
0x269d   :  { %4060 = vrcp.f32 %v3115_v46 }
0x269e   :  { %4062 = vpow2.f32 %v3809_v26 }
0x26aa   :  { %v4061_v47 = vpop.eup %4060 }
0x26ab   :  { %v3123_v49 = vsel %vm150_vm1, %v4061_v47, %v4059_v24  ;;  %v4063_v28 = vpop.eup %4062 }
0x26ac   :  { %3126 = vrot.lane.b32.xlu0 %v3123_v49, %s4309_s3  ;;  %v3114_v37 = vadd.f32 1.0, %v4063_v28  ;;  %v2759_v28 = vadd.f32 %v5235_v15, %v5166_v3 }
0x26ae   :  { %4064 = vrcp.f32 %v3114_v37 }
0x26bb   :  { %v4065_v41 = vpop.eup %4064 }
0x26bc   :  { %v3124_v30 = vmul.f32 %v4065_v41, %v3023_v52 }
0x271e   :  { %v3127_v39 = vpop.permute.xlu0 %3126 }
0x271f   :  { %v3129_v16 = vmul.f32 %v4065_v41, %v3127_v39 }
0x2721   :  { %3131 = vrot.lane.b32.xlu1 %v3129_v16, %s4309_s3 }
0x2793   :  { %v3132_v32 = vpop.permute.xlu1 %3131 }
0x2794   :  { %v3134_v35 = vadd.f32 %v3132_v32, %v3124_v30 }
0x2796   :  { %4066 = vtanh.f32 %v3134_v35 }
0x27a3   :  { %v4067_v43 = vpop.eup %4066 }
0x27a4   :  { %3137 = vrot.lane.b32.xlu0 %v4067_v43, %s4309_s3 }
0x2816   :  { %v3138_v21 = vpop.permute.xlu0 %3137 }
0x2817   :  { %v3140_v44 = vmul.f32 %v3138_v21, %v3123_v49  ;;  %v2757_v49 = vadd.f32 %v5233_v56, %v5163_v8 }
0x2819   :  { %3811 = vmatmul.mubr.msk.f32.vlgmr.msra.gmra.mxu1 %vm187_vm0, %v3140_v44 }
0x281a   :  { %3385 = vmatpush1.msra.mxu1 %v5071_v58  ;;  %3432 = vmatprep.mubr.f32.mxu1 %v4308_v1 }
0x281b   :  { %3386 = vmatprep.subr.mxu1 %v5075_v38 }
0x281c   :  { %3387 = vmatpush1.msra.mxu1 %v5078_v2 }
0x281d   :  { %3388 = vmatprep.subr.mxu1 %v5081_v5 }
0x281e   :  { %3389 = vmatpush1.msra.mxu1 %v5084_v0 }
0x281f   :  { %3390 = vmatprep.subr.mxu1 %v5087_v7 }
0x2820   :  { %3391 = vmatpush1.msra.mxu1 %v5090_v9 }
0x2821   :  { %3392 = vmatprep.subr.mxu1 %v5093_v11 }
0x2822   :  { %3393 = vmatpush1.msra.mxu1 %v5096_v13 }
0x2823   :  { %3394 = vmatprep.subr.mxu1 %v5099_v17 }
0x2824   :  { %3395 = vmatpush1.msra.mxu1 %v5103_v19 }
0x2825   :  { %3396 = vmatprep.subr.mxu1 %v5106_v23 }
0x2826   :  { %3397 = vmatpush1.msra.mxu1 %v5109_v25 }
0x2827   :  { %3398 = vmatprep.subr.mxu1 %v5112_v27 }
0x2828   :  { %3399 = vmatpush1.msra.mxu1 %v5115_v29 }
0x2829   :  { %3606 = vmatprep.subr.mxu1 %v5069_v57 }
0x28d9   :  { %v3212_v51 = vpop.f32.mrf.mxu1 }
0x28da   :  { %v3217_v33 = vadd.f32 %v3212_v51, %v2751_v36 }
0x28db   :  { %v3214_v52 = vpop.f32.mrf.mxu1 }
0x28dc   :  { %v3218_v10 = vadd.f32 %v3214_v52, %v2753_v34  ;;  %v3812_v57 = vmul.f32 -1.442695, %v3217_v33 }
0x28de   :  { %v3813_v48 = vmul.f32 -1.442695, %v3218_v10 }
0x28e0   :  { %4068 = vpow2.f32 %v3813_v48 }
0x28e1   :  { %4070 = vtanh.f32 %v3218_v10 }
0x28ed   :  { %v4069_v50 = vpop.eup %4068 }
0x28ee   :  { %v3226_v12 = vadd.f32 1.0, %v4069_v50  ;;  %v4071_v53 = vpop.eup %4070 }
0x28f0   :  { %4072 = vrcp.f32 %v3226_v12 }
0x28f1   :  { %4074 = vpow2.f32 %v3812_v57 }
0x28fd   :  { %v4073_v6 = vpop.eup %4072 }
0x28fe   :  { %v3234_v62 = vsel %vm150_vm1, %v4073_v6, %v4071_v53  ;;  %v4075_v40 = vpop.eup %4074 }
0x28ff   :  { %3237 = vrot.lane.b32.xlu1 %v3234_v62, %s4309_s3  ;;  %v3225_v14 = vadd.f32 1.0, %v4075_v40 }
0x2901   :  { %4076 = vrcp.f32 %v3225_v14 }
0x290e   :  { %v4077_v18 = vpop.eup %4076 }
0x290f   :  { %v3235_v63 = vmul.f32 %v4077_v18, %v3134_v35 }
0x2971   :  { %v3238_v55 = vpop.permute.xlu1 %3237 }
0x2972   :  { %v3240_v20 = vmul.f32 %v4077_v18, %v3238_v55  ;;  %v2769_v18 = vadd.f32 %v5241_v42, %v5163_v8 }
0x2974   :  { %3242 = vrot.lane.b32.xlu0 %v3240_v20, %s4309_s3  ;;  %v2771_v20 = vadd.f32 %v5243_v59, %v5166_v3 }
0x29e6   :  { %v3243_v22 = vpop.permute.xlu0 %3242 }
0x29e7   :  { %v3245_v45 = vadd.f32 %v3243_v22, %v3235_v63 }
0x29e9   :  { %4078 = vtanh.f32 %v3245_v45 }
0x29f6   :  { %v4079_v46 = vpop.eup %4078 }
0x29f7   :  { %3248 = vrot.lane.b32.xlu1 %v4079_v46, %s4309_s3 }
0x2a69   :  { %v3249_v24 = vpop.permute.xlu1 %3248 }
0x2a6a   :  { %v3251_v47 = vmul.f32 %v3249_v24, %v3234_v62 }
0x2a6c   :  { %3814 = vmatmul.mubr.msk.f32.vlgmr.msra.gmra.mxu0 %vm187_vm0, %v3251_v47 }
0x2a6d   :  { %3496 = vmatpush1.msra.mxu0 %v5071_v58  ;;  %3543 = vmatprep.mubr.f32.mxu0 %v4308_v1 }
0x2a6e   :  { %3497 = vmatprep.subr.mxu0 %v5075_v38 }
0x2a6f   :  { %3498 = vmatpush1.msra.mxu0 %v5078_v2 }
0x2a70   :  { %3499 = vmatprep.subr.mxu0 %v5081_v5 }
0x2a71   :  { %3500 = vmatpush1.msra.mxu0 %v5084_v0 }
0x2a72   :  { %3501 = vmatprep.subr.mxu0 %v5087_v7 }
0x2a73   :  { %3502 = vmatpush1.msra.mxu0 %v5090_v9 }
0x2a74   :  { %3503 = vmatprep.subr.mxu0 %v5093_v11 }
0x2a75   :  { %3504 = vmatpush1.msra.mxu0 %v5096_v13 }
0x2a76   :  { %3505 = vmatprep.subr.mxu0 %v5099_v17 }
0x2a77   :  { %3506 = vmatpush1.msra.mxu0 %v5103_v19 }
0x2a78   :  { %3507 = vmatprep.subr.mxu0 %v5106_v23 }
0x2a79   :  { %3508 = vmatpush1.msra.mxu0 %v5109_v25 }
0x2a7a   :  { %3509 = vmatprep.subr.mxu0 %v5112_v27 }
0x2a7b   :  { %3510 = vmatpush1.msra.mxu0 %v5115_v29 }
0x2b2c   :  { %v3323_v26 = vpop.f32.mrf.mxu0 }
0x2b2d   :  { %v3328_v37 = vadd.f32 %v3323_v26, %v2757_v49 }
0x2b2e   :  { %v3325_v41 = vpop.f32.mrf.mxu0 }
0x2b2f   :  { %v3329_v39 = vadd.f32 %v3325_v41, %v2759_v28  ;;  %v3815_v56 = vmul.f32 -1.442695, %v3328_v37 }
0x2b31   :  { %v3816_v16 = vmul.f32 -1.442695, %v3329_v39 }
0x2b33   :  { %4080 = vpow2.f32 %v3816_v16 }
0x2b34   :  { %4082 = vtanh.f32 %v3329_v39 }
0x2b40   :  { %v4081_v30 = vpop.eup %4080 }
0x2b41   :  { %v3337_v32 = vadd.f32 1.0, %v4081_v30  ;;  %v4083_v35 = vpop.eup %4082 }
0x2b43   :  { %4084 = vrcp.f32 %v3337_v32 }
0x2b44   :  { %4086 = vpow2.f32 %v3815_v56 }
0x2b50   :  { %v4085_v43 = vpop.eup %4084 }
0x2b51   :  { %v3345_v21 = vsel %vm150_vm1, %v4085_v43, %v4083_v35  ;;  %v4087_v44 = vpop.eup %4086 }
0x2b52   :  { %3348 = vrot.lane.b32.xlu0 %v3345_v21, %s4309_s3  ;;  %v3336_v15 = vadd.f32 1.0, %v4087_v44  ;;  %v2775_v44 = vadd.f32 %v5245_v60, %v5163_v8 }
0x2b54   :  { %4088 = vrcp.f32 %v3336_v15 }
0x2b61   :  { %v4089_v36 = vpop.eup %4088 }
0x2b62   :  { %v3346_v33 = vmul.f32 %v4089_v36, %v3245_v45 }
0x2bc4   :  { %v3349_v51 = vpop.permute.xlu0 %3348 }
0x2bc5   :  { %v3351_v34 = vmul.f32 %v4089_v36, %v3349_v51  ;;  %v2777_v36 = vadd.f32 %v5247_v61, %v5166_v3 }
0x2bc7   :  { %3353 = vrot.lane.b32.xlu1 %v3351_v34, %s4309_s3 }
0x2c39   :  { %v3354_v52 = vpop.permute.xlu1 %3353 }
0x2c3a   :  { %v3356_v10 = vadd.f32 %v3354_v52, %v3346_v33 }
0x2c3c   :  { %4090 = vtanh.f32 %v3356_v10 }
0x2c49   :  { %v4091_v48 = vpop.eup %4090 }
0x2c4a   :  { %3359 = vrot.lane.b32.xlu0 %v4091_v48, %s4309_s3 }
0x2cbc   :  { %v3360_v50 = vpop.permute.xlu0 %3359 }
0x2cbd   :  { %v3362_v12 = vmul.f32 %v3360_v50, %v3345_v21 }
0x2cbf   :  { %3817 = vmatmul.mubr.msk.f32.vlgmr.msra.gmra.mxu1 %vm187_vm0, %v3362_v12 }
0x2cc0   :  { %3607 = vmatpush1.msra.mxu1 %v5071_v58  ;;  %3654 = vmatprep.mubr.f32.mxu1 %v4308_v1  ;;  %v2763_v1 = vadd.f32 %v5237_v31, %v5163_v8 }
0x2cc1   :  { %3608 = vmatprep.subr.mxu1 %v5075_v38  ;;  %v2765_v38 = vadd.f32 %v5239_v4, %v5166_v3 }
0x2cc2   :  { %3609 = vmatpush1.msra.mxu1 %v5078_v2 }
0x2cc3   :  { %3610 = vmatprep.subr.mxu1 %v5081_v5 }
0x2cc4   :  { %3611 = vmatpush1.msra.mxu1 %v5084_v0 }
0x2cc5   :  { %3612 = vmatprep.subr.mxu1 %v5087_v7 }
0x2cc6   :  { %3613 = vmatpush1.msra.mxu1 %v5090_v9 }
0x2cc7   :  { %3614 = vmatprep.subr.mxu1 %v5093_v11 }
0x2cc8   :  { %3615 = vmatpush1.msra.mxu1 %v5096_v13 }
0x2cc9   :  { %3616 = vmatprep.subr.mxu1 %v5099_v17 }
0x2cca   :  { %3617 = vmatpush1.msra.mxu1 %v5103_v19 }
0x2ccb   :  { %3618 = vmatprep.subr.mxu1 %v5106_v23 }
0x2ccc   :  { %3619 = vmatpush1.msra.mxu1 %v5109_v25 }
0x2ccd   :  { %3620 = vmatprep.subr.mxu1 %v5112_v27 }
0x2cce   :  { %3621 = vmatpush1.msra.mxu1 %v5115_v29 }
0x2d7f   :  { %v3434_v58 = vpop.f32.mrf.mxu1 }
0x2d80   :  { %v3439_v2 = vadd.f32 %v3434_v58, %v2763_v1 }
0x2d81   :  { %v3436_v5 = vpop.f32.mrf.mxu1 }
0x2d82   :  { %v3440_v0 = vadd.f32 %v3436_v5, %v2765_v38  ;;  %v3818_v23 = vmul.f32 -1.442695, %v3439_v2 }
0x2d84   :  { %v3819_v7 = vmul.f32 -1.442695, %v3440_v0 }
0x2d86   :  { %4092 = vpow2.f32 %v3819_v7 }
0x2d87   :  { %4094 = vtanh.f32 %v3440_v0 }
0x2d93   :  { %v4093_v9 = vpop.eup %4092 }
0x2d94   :  { %v3448_v11 = vadd.f32 1.0, %v4093_v9  ;;  %v4095_v13 = vpop.eup %4094  ;;  %v3826_v9 = vld [vmem:[#allocation16] ss:$0 sm:$0xff] }
0x2d96   :  { %4096 = vrcp.f32 %v3448_v11 }
0x2d97   :  { %4098 = vpow2.f32 %v3818_v23 }
0x2da3   :  { %v4097_v17 = vpop.eup %4096 }
0x2da4   :  { %v3456_v19 = vsel %vm150_vm1, %v4097_v17, %v4095_v13  ;;  %v4099_v25 = vpop.eup %4098 }
0x2da5   :  { %3459 = vrot.lane.b32.xlu1 %v3456_v19, %s4309_s3  ;;  %v3447_v27 = vadd.f32 1.0, %v4099_v25 }
0x2da7   :  { %4100 = vrcp.f32 %v3447_v27 }
0x2db4   :  { %v4101_v29 = vpop.eup %4100 }
0x2db5   :  { %v3457_v53 = vmul.f32 %v4101_v29, %v3356_v10 }
0x2e17   :  { %v3460_v31 = vpop.permute.xlu1 %3459 }
0x2e18   :  { %v3462_v4 = vmul.f32 %v4101_v29, %v3460_v31 }
0x2e1a   :  { %3464 = vrot.lane.b32.xlu0 %v3462_v4, %s4309_s3 }
0x2e8c   :  { %v3465_v6 = vpop.permute.xlu0 %3464 }
0x2e8d   :  { %v3467_v62 = vadd.f32 %v3465_v6, %v3457_v53 }
0x2e8f   :  { %4102 = vtanh.f32 %v3467_v62 }
0x2e9c   :  { %v4103_v57 = vpop.eup %4102 }
0x2e9d   :  { %3470 = vrot.lane.b32.xlu1 %v4103_v57, %s4309_s3 }
0x2f0f   :  { %v3471_v40 = vpop.permute.xlu1 %3470 }
0x2f10   :  { %v3473_v14 = vmul.f32 %v3471_v40, %v3456_v19  ;;  %v3827_v19 = vld [vmem:[#allocation4] ss:$0 sm:$0xff] }
0x2f12   :  { %3820 = vmatmul.mubr.msk.f32.vlgmr.msra.gmra.mxu0 %vm187_vm0, %v3473_v14 }
0x2fd2   :  { %v3545_v55 = vpop.f32.mrf.mxu0 }
0x2fd3   :  { %v3550_v63 = vadd.f32 %v3545_v55, %v2769_v18 }
0x2fd4   :  { %v3547_v22 = vpop.f32.mrf.mxu0 }
0x2fd5   :  { %v3551_v45 = vadd.f32 %v3547_v22, %v2771_v20  ;;  %v3821_v42 = vmul.f32 -1.442695, %v3550_v63 }
0x2fd7   :  { %v3822_v46 = vmul.f32 -1.442695, %v3551_v45 }
0x2fd9   :  { %4104 = vpow2.f32 %v3822_v46 }
0x2fda   :  { %4106 = vtanh.f32 %v3551_v45 }
0x2fe6   :  { %v4105_v24 = vpop.eup %4104 }
0x2fe7   :  { %v3559_v47 = vadd.f32 1.0, %v4105_v24  ;;  %v4107_v49 = vpop.eup %4106 }
0x2fe9   :  { %4108 = vrcp.f32 %v3559_v47 }
0x2fea   :  { %4110 = vpow2.f32 %v3821_v42 }
0x2ff6   :  { %v4109_v26 = vpop.eup %4108 }
0x2ff7   :  { %v3567_v28 = vsel %vm150_vm1, %v4109_v26, %v4107_v49  ;;  %v4111_v37 = vpop.eup %4110 }
0x2ff8   :  { %3570 = vrot.lane.b32.xlu0 %v3567_v28, %s4309_s3  ;;  %v3558_v59 = vadd.f32 1.0, %v4111_v37 }
0x2ffa   :  { %4112 = vrcp.f32 %v3558_v59 }
0x3007   :  { %v4113_v41 = vpop.eup %4112 }
0x3008   :  { %v3568_v30 = vmul.f32 %v4113_v41, %v3467_v62 }
0x306a   :  { %v3571_v39 = vpop.permute.xlu0 %3570 }
0x306b   :  { %v3573_v16 = vmul.f32 %v4113_v41, %v3571_v39 }
0x306d   :  { %3575 = vrot.lane.b32.xlu1 %v3573_v16, %s4309_s3 }
0x30df   :  { %v3576_v32 = vpop.permute.xlu1 %3575 }
0x30e0   :  { %v3578_v35 = vadd.f32 %v3576_v32, %v3568_v30 }
0x30e2   :  { %4114 = vtanh.f32 %v3578_v35 }
0x30ef   :  { %v4115_v43 = vpop.eup %4114 }
0x30f0   :  { %3581 = vrot.lane.b32.xlu0 %v4115_v43, %s4309_s3 }
0x3162   :  { %v3582_v21 = vpop.permute.xlu0 %3581 }
0x3163   :  { %v3584_v56 = vmul.f32 %v3582_v21, %v3567_v28 }
0x3165   :  { %3823 = vmatmul.mubr.msk.f32.vlgmr.msra.gmra.mxu1 %vm187_vm0, %v3584_v56 }
0x3225   :  { %v3656_v15 = vpop.f32.mrf.mxu1 }
0x3226   :  { %v3661_v51 = vadd.f32 %v3656_v15, %v2775_v44 }
0x3227   :  { %v3658_v34 = vpop.f32.mrf.mxu1 }
0x3228   :  { %v3662_v33 = vadd.f32 %v3658_v34, %v2777_v36  ;;  %v3824_v8 = vmul.f32 -1.442695, %v3661_v51 }
0x322a   :  { %v3825_v52 = vmul.f32 -1.442695, %v3662_v33 }
0x322c   :  { %4116 = vpow2.f32 %v3825_v52 }
0x322d   :  { %4118 = vtanh.f32 %v3662_v33 }
0x3239   :  { %v4117_v10 = vpop.eup %4116 }
0x323a   :  { %v3670_v48 = vadd.f32 1.0, %v4117_v10  ;;  %v4119_v50 = vpop.eup %4118 }
0x323c   :  { %4120 = vrcp.f32 %v3670_v48 }
0x323d   :  { %4122 = vpow2.f32 %v3824_v8 }
0x3249   :  { %v4121_v12 = vpop.eup %4120 }
0x324a   :  { %v3678_v1 = vsel %vm150_vm1, %v4121_v12, %v4119_v50  ;;  %v4123_v60 = vpop.eup %4122 }
0x324b   :  { %3681 = vrot.lane.b32.xlu1 %v3678_v1, %s4309_s3  ;;  %v3669_v3 = vadd.f32 1.0, %v4123_v60 }
0x324d   :  { %4124 = vrcp.f32 %v3669_v3 }
0x325a   :  { %v4125_v61 = vpop.eup %4124 }
0x325b   :  { %v3679_v2 = vmul.f32 %v4125_v61, %v3578_v35 }
0x32bd   :  { %v3682_v58 = vpop.permute.xlu1 %3681 }
0x32be   :  { %v3684_v38 = vmul.f32 %v4125_v61, %v3682_v58 }
0x32c0   :  { %3686 = vrot.lane.b32.xlu0 %v3684_v38, %s4309_s3 }
0x3332   :  { %v3687_v5 = vpop.permute.xlu0 %3686 }
0x3333   :  { %v3689_v0 = vadd.f32 %v3687_v5, %v3679_v2 }
0x3335   :  { %4126 = vtanh.f32 %v3689_v0 }
0x3342   :  { %v4127_v7 = vpop.eup %4126 }
0x3343   :  { %3692 = vrot.lane.b32.xlu1 %v4127_v7, %s4309_s3 }
0x33b5   :  { %v3693_v54 = vpop.permute.xlu1 %3692 }
0x33b6   :  { %v3695_v11 = vmul.f32 %v3693_v54, %v3678_v1 }
0x33b8   :  { %v3703_v13 = vmul.f32 %v3826_v9, %v3695_v11 }
0x33ba   :  { %v3704_v17 = vsel %vm187_vm0, %v3703_v13, 0.0 }
0x33bb   :  { %3705 = vadd.xlane.f32.xlu0 %v3704_v17 }
0x3444   :  { %v3706_v23 = vpop.xlane.xlu0 %3705 }
0x3445   :  { %v3714_v25 = vadd.f32 %v3827_v19, %v3706_v23 }
0x3447   :  { %3716 = vst.msk [vmem:[%s5369_s12] sm:$0xff] %vm3715_vm2, %v3714_v25 }
0x3448   :  { %3721 = vsyncpa [#allocation6], 1 }
0x3449   :  { %3722 = vsyncpa [#allocation8], 1 }
0x344a   :  { %3723 = vsyncpa [#allocation11], 1 }
0x344b   :  { %3724 = vsyncpa [#allocation14], 1 }
0x344c   :  { %3725 = vsyncpa [#allocation17], 1 }

</bundles_post_ra>
